<compile_context>
chip_gen: v7x
topology: tpu7x:2x2x1
jax: 0.10.0
libtpu: 0.0.40
codegen_flags: <defaults>
</compile_context>

<pallas_src>
import jax
import jax.numpy as jnp
from jax.experimental import pallas as pl
from jax.experimental.pallas import tpu as pltpu

# ---------------- architecture constants ----------------
HIDDEN = 32                 # hidden_state_sz == resnet_embedding_sz
CIN = HIDDEN                # conv1 input channels
GLOVE = 16                  # glove_dim
ASPACE = 8                  # action_space
HW = 7 * 7                  # fixed 7x7 spatial
KPAD = 64                   # per-channel pixel count padded 49 -> 64 (aligned K)
CONV_OUT = 64
ACT_EMB = 10
PW_IN = CONV_OUT + CONV_OUT + ACT_EMB    # 138
LSTM_IN = HW * CONV_OUT                  # 3136
GATES = 4 * HIDDEN                       # 128
OUT_ROWS = CONV_OUT + 8                  # fused lane-dense output rows

# ---------------- packed small-parameter block layout (rows x 128, f32) -----
PK_PW_IMG_R = 0      # rows   0: 64, cols 0:64  pointwise W, image block (out,in)
PK_PW_GLV_R = 64     # rows  64:128, cols 0:64  pointwise W, glove block
PK_MISC_R = 128      # rows 128:192:
PK_PW_ACT_C = 0      #   cols 0:10   pointwise W, action block (64,10)
PK_CONV_B_C = 10     #   col  10     conv1 bias   (64,1)
PK_PW_B_C = 11       #   col  11     pointwise bias (64,1)
PK_GLV_W_R = 192     # rows 192:208, cols 0:64  glove_w.T   (16,64)
PK_GLV_B_R = 208     # row  208,     cols 0:64  glove_b     (1,64)
PK_ACT_W_R = 216     # rows 216:224, cols 0:10  action_w.T  (8,10)
PK_ACT_B_R = 224     # row  224,     cols 0:10  action_b    (1,10)
PK_WHH_R = 232       # rows 232:264, cols 0:128 lstm_w_hh.T (32,128)
PK_LSTM_B_R = 264    # row  264,     cols 0:128 b_ih + b_hh (1,128)
PK_HEAD_W_R = 272    # rows 272:304, cols 0:64  [actor_w.T | critic_w.T | 0-pad]
PK_HEAD_B_R = 304    # row  304,     cols 0:64  [actor_b   | critic_b   | 0-pad]
PK_CONV_W_R = 312    # rows 312:376, cols 0:CIN conv1 weight (64, CIN)
PK_ROWS = 376

VMEM_SPEC = pl.BlockSpec(memory_space=pltpu.MemorySpace.VMEM)
ANY_SPEC = pl.BlockSpec(memory_space=pl.ANY)


# ---------------- fused forward kernel ----------------
def savn_kernel(state_ref, tgt_ref, act_ref, hx_ref, cx_ref, pk_ref, wih_hbm,
                out_ref, wih_vmem, dma_sem, part_ref):
    f32 = jnp.float32
    half = CONV_OUT // 2

    # 0) the only sizable payload (W_ih, 1 MB bf16, tile-aligned) is fetched
    #    as two chunks so the tail of the copy hides behind the first 32
    #    channel matmuls (v5e/v6e); both overlap the conv/pointwise compute.
    cp0 = pltpu.make_async_copy(wih_hbm.at[0:half], wih_vmem.at[0:half],
                                dma_sem.at[0])
    cp1 = pltpu.make_async_copy(wih_hbm.at[half:CONV_OUT],
                                wih_vmem.at[half:CONV_OUT], dma_sem.at[1])
    cp0.start()
    cp1.start()

    # 1) image embedding: 1x1 conv == (64, Cin) @ (Cin, 49) matmul, channels
    #    as rows.  Dropout after this is identity (inference).
    conv_w = pk_ref[PK_CONV_W_R:PK_CONV_W_R + CONV_OUT, 0:CIN]
    conv_b = pk_ref[PK_MISC_R:PK_MISC_R + CONV_OUT, PK_CONV_B_C:PK_CONV_B_C + 1]
    img = jnp.maximum(
        jnp.dot(conv_w, state_ref[...], preferred_element_type=f32) + conv_b, 0.0)
    out_ref[0:CONV_OUT, 0:HW] = img            # rows 0:64 of the fused output

    # 2) glove / action embeddings as row vectors (1,64) / (1,10).
    glv_wt = pk_ref[PK_GLV_W_R:PK_GLV_W_R + GLOVE, 0:CONV_OUT]
    glv_b = pk_ref[PK_GLV_B_R:PK_GLV_B_R + 1, 0:CONV_OUT]
    g_row = jnp.maximum(
        jnp.dot(tgt_ref[...], glv_wt, preferred_element_type=f32) + glv_b, 0.0)

    act_wt = pk_ref[PK_ACT_W_R:PK_ACT_W_R + ASPACE, 0:ACT_EMB]
    act_b = pk_ref[PK_ACT_B_R:PK_ACT_B_R + 1, 0:ACT_EMB]
    a_row = jnp.maximum(
        jnp.dot(act_ref[...], act_wt, preferred_element_type=f32) + act_b, 0.0)

    # 3) pointwise 1x1 conv over concat([img, glove, action]): glove/action/
    #    bias terms are per-output-channel constants -> a (64,1) column.
    pw_img = pk_ref[PK_PW_IMG_R:PK_PW_IMG_R + CONV_OUT, 0:CONV_OUT]
    pw_glv = pk_ref[PK_PW_GLV_R:PK_PW_GLV_R + CONV_OUT, 0:CONV_OUT]
    pw_act = pk_ref[PK_MISC_R:PK_MISC_R + CONV_OUT, PK_PW_ACT_C:PK_PW_ACT_C + ACT_EMB]
    pw_b = pk_ref[PK_MISC_R:PK_MISC_R + CONV_OUT, PK_PW_B_C:PK_PW_B_C + 1]
    col = (jnp.sum(pw_glv * g_row, axis=1, keepdims=True)
           + jnp.sum(pw_act * a_row, axis=1, keepdims=True)
           + pw_b)                                               # (64, 1)
    x_cm = jnp.maximum(
        jnp.dot(pw_img, img, preferred_element_type=f32) + col, 0.0)   # (64, 49)

    # Hoisted once: pad pixels 49..63 with explicit zeros (weight rows there
    # are also zero) and cast to bf16.  No per-row casts in the loop below.
    x_pad = jnp.concatenate(
        [x_cm, jnp.zeros((CONV_OUT, KPAD - HW), f32)], axis=1)          # (64, 64)
    x_bf = x_pad.astype(jnp.bfloat16)

    # 4) LSTMCell.  gates = x_flat @ W_ih^T + hx @ W_hh^T + (b_ih + b_hh).
    #    hx/bias term first so it overlaps the in-flight W_ih DMA.
    whh = pk_ref[PK_WHH_R:PK_WHH_R + HIDDEN, :]
    lstm_b = pk_ref[PK_LSTM_B_R:PK_LSTM_B_R + 1, :]
    gates_hb = lstm_b + jnp.dot(hx_ref[...], whh, preferred_element_type=f32)

    #    Channel-major flatten folded into the (64, 64, 128) weight layout:
    #    64 INDEPENDENT (1,64)x(64,128) bf16 matmuls, each writing its partial
    #    into part_ref -- no serial add chain, matmuls pipeline on the MXU.
    cp0.wait()                                   # channels 0..31 available
    for c in range(half):
        part_ref[c:c + 1, :] = jnp.dot(x_bf[c:c + 1, :], wih_vmem[c],
                                       preferred_element_type=f32)
    cp1.wait()                                   # channels 32..63 available
    for c in range(half, CONV_OUT):
        part_ref[c:c + 1, :] = jnp.dot(x_bf[c:c + 1, :], wih_vmem[c],
                                       preferred_element_type=f32)

    gates = gates_hb + jnp.sum(part_ref[...], axis=0, keepdims=True)   # (1,128)

    # Gate nonlinearities on the full (1,128) vreg (EUP slot), then 32-lane
    # picks.  PyTorch LSTMCell gate order: input, forget, cell, output.
    sig = jax.nn.sigmoid(gates)
    tnh = jnp.tanh(gates)
    i_g = sig[:, 0:HIDDEN]
    f_g = sig[:, HIDDEN:2 * HIDDEN]
    g_g = tnh[:, 2 * HIDDEN:3 * HIDDEN]
    o_g = sig[:, 3 * HIDDEN:4 * HIDDEN]
    c_new = f_g * cx_ref[...] + i_g * g_g
    h_new = o_g * jnp.tanh(c_new)

    # 5) actor + critic fused into one (32, 64) matmul (cols 9:64 are zeros).
    head_w = pk_ref[PK_HEAD_W_R:PK_HEAD_W_R + HIDDEN, 0:2 * HIDDEN]
    head_b = pk_ref[PK_HEAD_B_R:PK_HEAD_B_R + 1, 0:2 * HIDDEN]
    lv = jnp.dot(h_new, head_w, preferred_element_type=f32) + head_b     # (1, 64)

    # 6) packed lane-dense row 64: [hx | cx | logit | value | 0-pad]; rows
    #    65..71 are zero filler so the trailing store is one full (8,128) vst.
    packed_row = jnp.concatenate([h_new, c_new, lv], axis=1)             # (1, 128)
    out_ref[CONV_OUT:, :] = jnp.concatenate(
        [packed_row, jnp.zeros((OUT_ROWS - CONV_OUT - 1, GATES), f32)], axis=0)


# ---------------- wrapper ----------------
@jax.jit
def savn_forward(state, target, action_probs, hx, cx, packed_params, wih_pad):
    f32 = jnp.float32
    # All host-side layout changes below are free reshapes (no transposes).
    state_cm = state.astype(f32).reshape(CIN, HW)        # NCHW (1,C,7,7) -> (C,49)
    target = target.astype(f32)                          # (1, GLOVE)
    action_probs = action_probs.astype(f32)              # (1, ASPACE)
    hx = hx.astype(f32)
    cx = cx.astype(f32)

    fused = pl.pallas_call(
        savn_kernel,
        out_shape=jax.ShapeDtypeStruct((OUT_ROWS, GATES), f32),
        in_specs=[VMEM_SPEC] * 6 + [ANY_SPEC],
        out_specs=VMEM_SPEC,
        scratch_shapes=[pltpu.VMEM((CONV_OUT, KPAD, GATES), jnp.bfloat16),
                        pltpu.SemaphoreType.DMA((2,)),
                        pltpu.VMEM((CONV_OUT, GATES), jnp.float32)],
    )(state_cm, target, action_probs, hx, cx, packed_params, wih_pad)

    image_embedding = fused[0:CONV_OUT, 0:HW].reshape(1, CONV_OUT, 7, 7)
    hx_new = fused[CONV_OUT:CONV_OUT + 1, 0:HIDDEN]
    cx_new = fused[CONV_OUT:CONV_OUT + 1, HIDDEN:2 * HIDDEN]
    logit = fused[CONV_OUT:CONV_OUT + 1, 2 * HIDDEN:2 * HIDDEN + ASPACE]
    value = fused[CONV_OUT:CONV_OUT + 1,
                  2 * HIDDEN + ASPACE:2 * HIDDEN + ASPACE + 1]
    return {"value": value, "logit": logit,
            "hidden": (hx_new, cx_new), "embedding": image_embedding}


# ---------------- parameter init (PyTorch-layout logical params) -------------
def init_params(key):
    f32 = jnp.float32
    ks = jax.random.split(key, 10)

    def rnd(k, shape, scale):
        return scale * jax.random.normal(k, shape, f32)

    return {
        "conv1_w": rnd(ks[0], (CONV_OUT, CIN), 0.05),        # 1x1 conv (out, in)
        "conv1_b": jnp.zeros((CONV_OUT,), f32),
        "glove_w": rnd(ks[1], (CONV_OUT, GLOVE), 0.05),      # Linear (out, in)
        "glove_b": rnd(ks[2], (CONV_OUT,), 0.05),
        "action_w": rnd(ks[3], (ACT_EMB, ASPACE), 0.05),
        "action_b": rnd(ks[4], (ACT_EMB,), 0.05),
        "pw_w": rnd(ks[5], (CONV_OUT, PW_IN), 0.05),         # pointwise (out, 138)
        "pw_b": jnp.zeros((CONV_OUT,), f32),
        "lstm_w_ih": rnd(ks[6], (GATES, LSTM_IN), 0.01),
        "lstm_w_hh": rnd(ks[7], (GATES, HIDDEN), 0.05),
        "lstm_b_ih": jnp.zeros((GATES,), f32),               # module fills with 0
        "lstm_b_hh": jnp.zeros((GATES,), f32),
        "actor_w": rnd(ks[8], (ASPACE, HIDDEN), 0.01),       # norm_col_init-ish
        "actor_b": jnp.zeros((ASPACE,), f32),
        "critic_w": rnd(ks[9], (1, HIDDEN), 1.0 / (HIDDEN ** 0.5)),
        "critic_b": jnp.zeros((1,), f32),
    }


def pack_params(p):
    """One-time parameter re-layout (done at init, NOT per step):
       (a) all small tensors into a single (PK_ROWS, 128) f32 block,
       (b) lstm W_ih as (64, 64, 128) bf16 = W_ih.T reshaped per channel and
           zero-padded from 49 to 64 rows so the HBM layout matches bf16 VMEM
           tiling (one dense DMA burst, tile-aligned per-channel slices)."""
    f32 = jnp.float32
    pk = jnp.zeros((PK_ROWS, 128), f32)
    pk = pk.at[PK_PW_IMG_R:PK_PW_IMG_R + CONV_OUT, 0:CONV_OUT].set(
        p["pw_w"][:, 0:CONV_OUT])
    pk = pk.at[PK_PW_GLV_R:PK_PW_GLV_R + CONV_OUT, 0:CONV_OUT].set(
        p["pw_w"][:, CONV_OUT:2 * CONV_OUT])
    pk = pk.at[PK_MISC_R:PK_MISC_R + CONV_OUT, PK_PW_ACT_C:PK_PW_ACT_C + ACT_EMB].set(
        p["pw_w"][:, 2 * CONV_OUT:])
    pk = pk.at[PK_MISC_R:PK_MISC_R + CONV_OUT, PK_CONV_B_C].set(p["conv1_b"])
    pk = pk.at[PK_MISC_R:PK_MISC_R + CONV_OUT, PK_PW_B_C].set(p["pw_b"])
    pk = pk.at[PK_GLV_W_R:PK_GLV_W_R + GLOVE, 0:CONV_OUT].set(p["glove_w"].T)
    pk = pk.at[PK_GLV_B_R, 0:CONV_OUT].set(p["glove_b"])
    pk = pk.at[PK_ACT_W_R:PK_ACT_W_R + ASPACE, 0:ACT_EMB].set(p["action_w"].T)
    pk = pk.at[PK_ACT_B_R, 0:ACT_EMB].set(p["action_b"])
    pk = pk.at[PK_WHH_R:PK_WHH_R + HIDDEN, :].set(p["lstm_w_hh"].T)
    pk = pk.at[PK_LSTM_B_R, :].set(p["lstm_b_ih"] + p["lstm_b_hh"])
    pk = pk.at[PK_HEAD_W_R:PK_HEAD_W_R + HIDDEN, 0:ASPACE].set(p["actor_w"].T)
    pk = pk.at[PK_HEAD_W_R:PK_HEAD_W_R + HIDDEN, ASPACE].set(p["critic_w"][0])
    pk = pk.at[PK_HEAD_B_R, 0:ASPACE].set(p["actor_b"])
    pk = pk.at[PK_HEAD_B_R, ASPACE].set(p["critic_b"][0])
    pk = pk.at[PK_CONV_W_R:PK_CONV_W_R + CONV_OUT, 0:CIN].set(p["conv1_w"])

    wih3 = p["lstm_w_ih"].T.reshape(CONV_OUT, HW, GATES)        # channel-major
    wih_pad = jnp.zeros((CONV_OUT, KPAD, GATES), f32)
    wih_pad = wih_pad.at[:, 0:HW, :].set(wih3).astype(jnp.bfloat16)
    return pk, wih_pad


# ---------------- pure-JAX reference (mirrors the PyTorch forward) -----------
def savn_reference(state, target, action_probs, hx, cx, p):
    f32 = jnp.float32
    s = state.astype(f32).reshape(CIN, HW)
    img = jax.nn.relu(p["conv1_w"] @ s + p["conv1_b"][:, None])
    g = jax.nn.relu(target.astype(f32) @ p["glove_w"].T + p["glove_b"][None, :])
    a = jax.nn.relu(action_probs.astype(f32) @ p["action_w"].T + p["action_b"][None, :])
    cat = jnp.concatenate([img,
                           jnp.broadcast_to(g.T, (CONV_OUT, HW)),
                           jnp.broadcast_to(a.T, (ACT_EMB, HW))], axis=0)
    x = jax.nn.relu(p["pw_w"] @ cat + p["pw_b"][:, None])
    x_flat = x.reshape(1, LSTM_IN)                 # == torch x.view(1, -1)
    gates = (x_flat @ p["lstm_w_ih"].T + hx.astype(f32) @ p["lstm_w_hh"].T
             + p["lstm_b_ih"][None, :] + p["lstm_b_hh"][None, :])
    i_g = jax.nn.sigmoid(gates[:, 0:HIDDEN])
    f_g = jax.nn.sigmoid(gates[:, HIDDEN:2 * HIDDEN])
    g_g = jnp.tanh(gates[:, 2 * HIDDEN:3 * HIDDEN])
    o_g = jax.nn.sigmoid(gates[:, 3 * HIDDEN:])
    c_new = f_g * cx.astype(f32) + i_g * g_g
    h_new = o_g * jnp.tanh(c_new)
    logit = h_new @ p["actor_w"].T + p["actor_b"][None, :]
    value = h_new @ p["critic_w"].T + p["critic_b"][None, :]
    return {"value": value, "logit": logit, "hidden": (h_new, c_new),
            "embedding": img.reshape(1, CONV_OUT, 7, 7)}


if __name__ == "__main__":
    key = jax.random.PRNGKey(0)
    k_in, k_par = jax.random.split(key)
    ks = jax.random.split(k_in, 5)

    state = jax.random.normal(ks[0], (1, CIN, 7, 7), jnp.float32)   # NCHW
    target = jax.random.normal(ks[1], (1, GLOVE), jnp.float32)
    action_probs = jax.nn.softmax(jax.random.normal(ks[2], (1, ASPACE), jnp.float32))
    hx = 0.5 * jax.random.normal(ks[3], (1, HIDDEN), jnp.float32)
    cx = 0.5 * jax.random.normal(ks[4], (1, HIDDEN), jnp.float32)

    params = init_params(k_par)
    packed_params, wih_pad = pack_params(params)   # one-time parameter re-layout

    out = savn_forward(state, target, action_probs, hx, cx, packed_params, wih_pad)
    jax.block_until_ready(out)

    # shape + numerics check against the pure-JAX reference
    ref = savn_reference(state, target, action_probs, hx, cx, params)
    assert out["value"].shape == (1, 1)
    assert out["logit"].shape == (1, ASPACE)
    assert out["hidden"][0].shape == (1, HIDDEN)
    assert out["hidden"][1].shape == (1, HIDDEN)
    assert out["embedding"].shape == (1, CONV_OUT, 7, 7)
    for name in ("value", "logit", "embedding"):
        assert jnp.allclose(out[name], ref[name], rtol=2e-2, atol=2e-2), name
    for got, want in zip(out["hidden"], ref["hidden"]):
        assert jnp.allclose(got, want, rtol=2e-2, atol=2e-2), "hidden"

    print("KERNEL_OK")
</pallas_src>

<mosaic_0001>
module attributes {stable_mosaic.version = 11 : i64} {
  func.func @savn_kernel(%arg0: memref<32x49xf32, #tpu.memory_space<vmem>>, %arg1: memref<1x16xf32, #tpu.memory_space<vmem>>, %arg2: memref<1x8xf32, #tpu.memory_space<vmem>>, %arg3: memref<1x32xf32, #tpu.memory_space<vmem>>, %arg4: memref<1x32xf32, #tpu.memory_space<vmem>>, %arg5: memref<376x128xf32, #tpu.memory_space<vmem>>, %arg6: memref<64x64x128xbf16, #tpu.memory_space<any>>, %arg7: memref<72x128xf32, #tpu.memory_space<vmem>>, %arg8: memref<64x64x128xbf16, #tpu.memory_space<vmem>>, %arg9: memref<2x!tpu.dma_semaphore, #tpu.memory_space<semaphore_mem>>, %arg10: memref<64x128xf32, #tpu.memory_space<vmem>>) attributes {dimension_semantics = [], scalar_prefetch = 0 : i64, scratch_operands = 3 : i64, tpu.core_type = #tpu.core_type<tc>} {
    %c0_i32 = arith.constant 0 : i32
    %c0_i32_0 = arith.constant 0 : i32
    %c0_i32_1 = arith.constant 0 : i32
    %c0_i32_2 = arith.constant 0 : i32
    %0 = tpu.memref_slice %arg6[%c0_i32_0, %c0_i32_1, %c0_i32_2] : memref<64x64x128xbf16, #tpu.memory_space<any>> -> memref<32x64x128xbf16, #tpu.memory_space<any>>
    %c0_i32_3 = arith.constant 0 : i32
    %c0_i32_4 = arith.constant 0 : i32
    %c0_i32_5 = arith.constant 0 : i32
    %1 = tpu.memref_slice %arg8[%c0_i32_3, %c0_i32_4, %c0_i32_5] : memref<64x64x128xbf16, #tpu.memory_space<vmem>> -> memref<32x64x128xbf16, #tpu.memory_space<vmem>>
    %2 = tpu.memref_slice %arg9[%c0_i32] : memref<2x!tpu.dma_semaphore, #tpu.memory_space<semaphore_mem>> -> memref<1x!tpu.dma_semaphore, #tpu.memory_space<semaphore_mem>>
    %3 = tpu.memref_squeeze %2 : memref<1x!tpu.dma_semaphore, #tpu.memory_space<semaphore_mem>> -> memref<!tpu.dma_semaphore, #tpu.memory_space<semaphore_mem>>
    tpu.enqueue_dma source(%0 : memref<32x64x128xbf16, #tpu.memory_space<any>>) target(%1 : memref<32x64x128xbf16, #tpu.memory_space<vmem>>) target_semaphore(%3 : memref<!tpu.dma_semaphore, #tpu.memory_space<semaphore_mem>>)
    %c1_i32 = arith.constant 1 : i32
    %c32_i32 = arith.constant 32 : i32
    %c0_i32_6 = arith.constant 0 : i32
    %c0_i32_7 = arith.constant 0 : i32
    %4 = tpu.memref_slice %arg6[%c32_i32, %c0_i32_6, %c0_i32_7] : memref<64x64x128xbf16, #tpu.memory_space<any>> -> memref<32x64x128xbf16, #tpu.memory_space<any>>
    %c32_i32_8 = arith.constant 32 : i32
    %c0_i32_9 = arith.constant 0 : i32
    %c0_i32_10 = arith.constant 0 : i32
    %5 = tpu.memref_slice %arg8[%c32_i32_8, %c0_i32_9, %c0_i32_10] : memref<64x64x128xbf16, #tpu.memory_space<vmem>> -> memref<32x64x128xbf16, #tpu.memory_space<vmem>>
    %6 = tpu.memref_slice %arg9[%c1_i32] : memref<2x!tpu.dma_semaphore, #tpu.memory_space<semaphore_mem>> -> memref<1x!tpu.dma_semaphore, #tpu.memory_space<semaphore_mem>>
    %7 = tpu.memref_squeeze %6 : memref<1x!tpu.dma_semaphore, #tpu.memory_space<semaphore_mem>> -> memref<!tpu.dma_semaphore, #tpu.memory_space<semaphore_mem>>
    tpu.enqueue_dma source(%4 : memref<32x64x128xbf16, #tpu.memory_space<any>>) target(%5 : memref<32x64x128xbf16, #tpu.memory_space<vmem>>) target_semaphore(%7 : memref<!tpu.dma_semaphore, #tpu.memory_space<semaphore_mem>>)
    %c312 = arith.constant 312 : index
    %c0 = arith.constant 0 : index
    %8 = vector.load %arg5[%c312, %c0] : memref<376x128xf32, #tpu.memory_space<vmem>>, vector<64x32xf32>
    %c128 = arith.constant 128 : index
    %c10 = arith.constant 10 : index
    %9 = vector.load %arg5[%c128, %c10] : memref<376x128xf32, #tpu.memory_space<vmem>>, vector<64x1xf32>
    %c0_11 = arith.constant 0 : index
    %c0_12 = arith.constant 0 : index
    %10 = vector.load %arg0[%c0_11, %c0_12] : memref<32x49xf32, #tpu.memory_space<vmem>>, vector<32x49xf32>
    %cst = arith.constant dense<0.000000e+00> : vector<64x49xf32>
    %11 = tpu.matmul %8, %10, %cst {dimension_numbers = #tpu.dot_dimension_numbers<[1], [0], [0], [1], [0, 0, 1, 1], [], []>} : vector<64x32xf32>, vector<32x49xf32>, vector<64x49xf32> -> vector<64x49xf32>
    %12 = vector.broadcast %9 : vector<64x1xf32> to vector<64x49xf32>
    %13 = arith.addf %11, %12 : vector<64x49xf32>
    %cst_13 = arith.constant 0.000000e+00 : f32
    %14 = vector.broadcast %cst_13 : f32 to vector<64x49xf32>
    %15 = arith.maximumf %13, %14 : vector<64x49xf32>
    %c0_14 = arith.constant 0 : index
    %c0_15 = arith.constant 0 : index
    %16 = vector.load %arg7[%c0_14, %c0_15] : memref<72x128xf32, #tpu.memory_space<vmem>>, vector<64x49xf32>
    tpu.vector_store %arg7[%c0_14, %c0_15], %15 {strides = array<i32>} : memref<72x128xf32, #tpu.memory_space<vmem>>, vector<64x49xf32>,
    %c192 = arith.constant 192 : index
    %c0_16 = arith.constant 0 : index
    %17 = vector.load %arg5[%c192, %c0_16] : memref<376x128xf32, #tpu.memory_space<vmem>>, vector<16x64xf32>
    %c208 = arith.constant 208 : index
    %c0_17 = arith.constant 0 : index
    %18 = vector.load %arg5[%c208, %c0_17] : memref<376x128xf32, #tpu.memory_space<vmem>>, vector<1x64xf32>
    %c0_18 = arith.constant 0 : index
    %c0_19 = arith.constant 0 : index
    %19 = vector.load %arg1[%c0_18, %c0_19] : memref<1x16xf32, #tpu.memory_space<vmem>>, vector<1x16xf32>
    %cst_20 = arith.constant dense<0.000000e+00> : vector<1x64xf32>
    %20 = tpu.matmul %19, %17, %cst_20 {dimension_numbers = #tpu.dot_dimension_numbers<[1], [0], [0], [1], [0, 0, 1, 1], [], []>} : vector<1x16xf32>, vector<16x64xf32>, vector<1x64xf32> -> vector<1x64xf32>
    %21 = arith.addf %20, %18 : vector<1x64xf32>
    %cst_21 = arith.constant 0.000000e+00 : f32
    %22 = vector.broadcast %cst_21 : f32 to vector<1x64xf32>
    %23 = arith.maximumf %21, %22 : vector<1x64xf32>
    %c216 = arith.constant 216 : index
    %c0_22 = arith.constant 0 : index
    %24 = vector.load %arg5[%c216, %c0_22] : memref<376x128xf32, #tpu.memory_space<vmem>>, vector<8x10xf32>
    %c224 = arith.constant 224 : index
    %c0_23 = arith.constant 0 : index
    %25 = vector.load %arg5[%c224, %c0_23] : memref<376x128xf32, #tpu.memory_space<vmem>>, vector<1x10xf32>
    %c0_24 = arith.constant 0 : index
    %c0_25 = arith.constant 0 : index
    %26 = vector.load %arg2[%c0_24, %c0_25] : memref<1x8xf32, #tpu.memory_space<vmem>>, vector<1x8xf32>
    %cst_26 = arith.constant dense<0.000000e+00> : vector<1x10xf32>
    %27 = tpu.matmul %26, %24, %cst_26 {dimension_numbers = #tpu.dot_dimension_numbers<[1], [0], [0], [1], [0, 0, 1, 1], [], []>} : vector<1x8xf32>, vector<8x10xf32>, vector<1x10xf32> -> vector<1x10xf32>
    %28 = arith.addf %27, %25 : vector<1x10xf32>
    %cst_27 = arith.constant 0.000000e+00 : f32
    %29 = vector.broadcast %cst_27 : f32 to vector<1x10xf32>
    %30 = arith.maximumf %28, %29 : vector<1x10xf32>
    %c0_28 = arith.constant 0 : index
    %c0_29 = arith.constant 0 : index
    %31 = vector.load %arg5[%c0_28, %c0_29] : memref<376x128xf32, #tpu.memory_space<vmem>>, vector<64x64xf32>
    %c64 = arith.constant 64 : index
    %c0_30 = arith.constant 0 : index
    %32 = vector.load %arg5[%c64, %c0_30] : memref<376x128xf32, #tpu.memory_space<vmem>>, vector<64x64xf32>
    %c128_31 = arith.constant 128 : index
    %c0_32 = arith.constant 0 : index
    %33 = vector.load %arg5[%c128_31, %c0_32] : memref<376x128xf32, #tpu.memory_space<vmem>>, vector<64x10xf32>
    %c128_33 = arith.constant 128 : index
    %c11 = arith.constant 11 : index
    %34 = vector.load %arg5[%c128_33, %c11] : memref<376x128xf32, #tpu.memory_space<vmem>>, vector<64x1xf32>
    %35 = vector.broadcast %23 : vector<1x64xf32> to vector<64x64xf32>
    %36 = arith.mulf %32, %35 : vector<64x64xf32>
    %cst_34 = arith.constant dense<0.000000e+00> : vector<64xf32>
    %37 = vector.multi_reduction <add>, %36, %cst_34 [1] : vector<64x64xf32> to vector<64xf32>
    %38 = vector.shape_cast %37 : vector<64xf32> to vector<64x1xf32>
    %39 = vector.broadcast %30 : vector<1x10xf32> to vector<64x10xf32>
    %40 = arith.mulf %33, %39 : vector<64x10xf32>
    %cst_35 = arith.constant dense<0.000000e+00> : vector<64xf32>
    %41 = vector.multi_reduction <add>, %40, %cst_35 [1] : vector<64x10xf32> to vector<64xf32>
    %42 = vector.shape_cast %41 : vector<64xf32> to vector<64x1xf32>
    %43 = arith.addf %38, %42 : vector<64x1xf32>
    %44 = arith.addf %43, %34 : vector<64x1xf32>
    %cst_36 = arith.constant dense<0.000000e+00> : vector<64x49xf32>
    %45 = tpu.matmul %31, %15, %cst_36 {dimension_numbers = #tpu.dot_dimension_numbers<[1], [0], [0], [1], [0, 0, 1, 1], [], []>} : vector<64x64xf32>, vector<64x49xf32>, vector<64x49xf32> -> vector<64x49xf32>
    %46 = vector.broadcast %44 : vector<64x1xf32> to vector<64x49xf32>
    %47 = arith.addf %45, %46 : vector<64x49xf32>
    %cst_37 = arith.constant 0.000000e+00 : f32
    %48 = vector.broadcast %cst_37 : f32 to vector<64x49xf32>
    %49 = arith.maximumf %47, %48 : vector<64x49xf32>
    %cst_38 = arith.constant 0.000000e+00 : f32
    %50 = vector.broadcast %cst_38 : f32 to vector<64x15xf32>
    %51 = tpu.concatenate %49, %50 in 1 : vector<64x49xf32>, vector<64x15xf32> -> vector<64x64xf32>
    %52 = arith.truncf %51 : vector<64x64xf32> to vector<64x64xbf16>
    %c232 = arith.constant 232 : index
    %c0_39 = arith.constant 0 : index
    %53 = vector.load %arg5[%c232, %c0_39] : memref<376x128xf32, #tpu.memory_space<vmem>>, vector<32x128xf32>
    %c264 = arith.constant 264 : index
    %c0_40 = arith.constant 0 : index
    %54 = vector.load %arg5[%c264, %c0_40] : memref<376x128xf32, #tpu.memory_space<vmem>>, vector<1x128xf32>
    %c0_41 = arith.constant 0 : index
    %c0_42 = arith.constant 0 : index
    %55 = vector.load %arg3[%c0_41, %c0_42] : memref<1x32xf32, #tpu.memory_space<vmem>>, vector<1x32xf32>
    %cst_43 = arith.constant dense<0.000000e+00> : vector<1x128xf32>
    %56 = tpu.matmul %55, %53, %cst_43 {dimension_numbers = #tpu.dot_dimension_numbers<[1], [0], [0], [1], [0, 0, 1, 1], [], []>} : vector<1x32xf32>, vector<32x128xf32>, vector<1x128xf32> -> vector<1x128xf32>
    %57 = arith.addf %54, %56 : vector<1x128xf32>
    %c0_i32_44 = arith.constant 0 : i32
    %c0_i32_45 = arith.constant 0 : i32
    %c0_i32_46 = arith.constant 0 : i32
    %c0_i32_47 = arith.constant 0 : i32
    %58 = tpu.memref_slice %arg6[%c0_i32_45, %c0_i32_46, %c0_i32_47] : memref<64x64x128xbf16, #tpu.memory_space<any>> -> memref<32x64x128xbf16, #tpu.memory_space<any>>
    %c0_i32_48 = arith.constant 0 : i32
    %c0_i32_49 = arith.constant 0 : i32
    %c0_i32_50 = arith.constant 0 : i32
    %59 = tpu.memref_slice %arg8[%c0_i32_48, %c0_i32_49, %c0_i32_50] : memref<64x64x128xbf16, #tpu.memory_space<vmem>> -> memref<32x64x128xbf16, #tpu.memory_space<vmem>>
    %60 = tpu.memref_slice %arg9[%c0_i32_44] : memref<2x!tpu.dma_semaphore, #tpu.memory_space<semaphore_mem>> -> memref<1x!tpu.dma_semaphore, #tpu.memory_space<semaphore_mem>>
    %61 = tpu.memref_squeeze %60 : memref<1x!tpu.dma_semaphore, #tpu.memory_space<semaphore_mem>> -> memref<!tpu.dma_semaphore, #tpu.memory_space<semaphore_mem>>
    tpu.wait_dma2 semaphore(%61 : memref<!tpu.dma_semaphore, #tpu.memory_space<semaphore_mem>>) src(%58 : memref<32x64x128xbf16, #tpu.memory_space<any>>) dst(%59 : memref<32x64x128xbf16, #tpu.memory_space<vmem>>)
    %62 = vector.extract_strided_slice %52 {offsets = [0, 0], sizes = [1, 64], strides = [1, 1]} : vector<64x64xbf16> to vector<1x64xbf16>
    %c0_51 = arith.constant 0 : index
    %c0_52 = arith.constant 0 : index
    %c0_53 = arith.constant 0 : index
    %63 = vector.load %arg8[%c0_51, %c0_52, %c0_53] : memref<64x64x128xbf16, #tpu.memory_space<vmem>>, vector<1x64x128xbf16>
    %64 = vector.shape_cast %63 : vector<1x64x128xbf16> to vector<64x128xbf16>
    %cst_54 = arith.constant dense<0.000000e+00> : vector<1x128xf32>
    %65 = tpu.matmul %62, %64, %cst_54 {dimension_numbers = #tpu.dot_dimension_numbers<[1], [0], [0], [1], [0, 0, 1, 1], [], []>} : vector<1x64xbf16>, vector<64x128xbf16>, vector<1x128xf32> -> vector<1x128xf32>
    %c0_55 = arith.constant 0 : index
    %c0_56 = arith.constant 0 : index
    %66 = vector.load %arg10[%c0_55, %c0_56] : memref<64x128xf32, #tpu.memory_space<vmem>>, vector<1x128xf32>
    tpu.vector_store %arg10[%c0_55, %c0_56], %65 {strides = array<i32>} : memref<64x128xf32, #tpu.memory_space<vmem>>, vector<1x128xf32>,
    %67 = vector.extract_strided_slice %52 {offsets = [1, 0], sizes = [1, 64], strides = [1, 1]} : vector<64x64xbf16> to vector<1x64xbf16>
    %c1 = arith.constant 1 : index
    %c0_57 = arith.constant 0 : index
    %c0_58 = arith.constant 0 : index
    %68 = vector.load %arg8[%c1, %c0_57, %c0_58] : memref<64x64x128xbf16, #tpu.memory_space<vmem>>, vector<1x64x128xbf16>
    %69 = vector.shape_cast %68 : vector<1x64x128xbf16> to vector<64x128xbf16>
    %cst_59 = arith.constant dense<0.000000e+00> : vector<1x128xf32>
    %70 = tpu.matmul %67, %69, %cst_59 {dimension_numbers = #tpu.dot_dimension_numbers<[1], [0], [0], [1], [0, 0, 1, 1], [], []>} : vector<1x64xbf16>, vector<64x128xbf16>, vector<1x128xf32> -> vector<1x128xf32>
    %c1_60 = arith.constant 1 : index
    %c0_61 = arith.constant 0 : index
    %71 = vector.load %arg10[%c1_60, %c0_61] : memref<64x128xf32, #tpu.memory_space<vmem>>, vector<1x128xf32>
    tpu.vector_store %arg10[%c1_60, %c0_61], %70 {strides = array<i32>} : memref<64x128xf32, #tpu.memory_space<vmem>>, vector<1x128xf32>,
    %72 = vector.extract_strided_slice %52 {offsets = [2, 0], sizes = [1, 64], strides = [1, 1]} : vector<64x64xbf16> to vector<1x64xbf16>
    %c2 = arith.constant 2 : index
    %c0_62 = arith.constant 0 : index
    %c0_63 = arith.constant 0 : index
    %73 = vector.load %arg8[%c2, %c0_62, %c0_63] : memref<64x64x128xbf16, #tpu.memory_space<vmem>>, vector<1x64x128xbf16>
    %74 = vector.shape_cast %73 : vector<1x64x128xbf16> to vector<64x128xbf16>
    %cst_64 = arith.constant dense<0.000000e+00> : vector<1x128xf32>
    %75 = tpu.matmul %72, %74, %cst_64 {dimension_numbers = #tpu.dot_dimension_numbers<[1], [0], [0], [1], [0, 0, 1, 1], [], []>} : vector<1x64xbf16>, vector<64x128xbf16>, vector<1x128xf32> -> vector<1x128xf32>
    %c2_65 = arith.constant 2 : index
    %c0_66 = arith.constant 0 : index
    %76 = vector.load %arg10[%c2_65, %c0_66] : memref<64x128xf32, #tpu.memory_space<vmem>>, vector<1x128xf32>
    tpu.vector_store %arg10[%c2_65, %c0_66], %75 {strides = array<i32>} : memref<64x128xf32, #tpu.memory_space<vmem>>, vector<1x128xf32>,
    %77 = vector.extract_strided_slice %52 {offsets = [3, 0], sizes = [1, 64], strides = [1, 1]} : vector<64x64xbf16> to vector<1x64xbf16>
    %c3 = arith.constant 3 : index
    %c0_67 = arith.constant 0 : index
    %c0_68 = arith.constant 0 : index
    %78 = vector.load %arg8[%c3, %c0_67, %c0_68] : memref<64x64x128xbf16, #tpu.memory_space<vmem>>, vector<1x64x128xbf16>
    %79 = vector.shape_cast %78 : vector<1x64x128xbf16> to vector<64x128xbf16>
    %cst_69 = arith.constant dense<0.000000e+00> : vector<1x128xf32>
    %80 = tpu.matmul %77, %79, %cst_69 {dimension_numbers = #tpu.dot_dimension_numbers<[1], [0], [0], [1], [0, 0, 1, 1], [], []>} : vector<1x64xbf16>, vector<64x128xbf16>, vector<1x128xf32> -> vector<1x128xf32>
    %c3_70 = arith.constant 3 : index
    %c0_71 = arith.constant 0 : index
    %81 = vector.load %arg10[%c3_70, %c0_71] : memref<64x128xf32, #tpu.memory_space<vmem>>, vector<1x128xf32>
    tpu.vector_store %arg10[%c3_70, %c0_71], %80 {strides = array<i32>} : memref<64x128xf32, #tpu.memory_space<vmem>>, vector<1x128xf32>,
    %82 = vector.extract_strided_slice %52 {offsets = [4, 0], sizes = [1, 64], strides = [1, 1]} : vector<64x64xbf16> to vector<1x64xbf16>
    %c4 = arith.constant 4 : index
    %c0_72 = arith.constant 0 : index
    %c0_73 = arith.constant 0 : index
    %83 = vector.load %arg8[%c4, %c0_72, %c0_73] : memref<64x64x128xbf16, #tpu.memory_space<vmem>>, vector<1x64x128xbf16>
    %84 = vector.shape_cast %83 : vector<1x64x128xbf16> to vector<64x128xbf16>
    %cst_74 = arith.constant dense<0.000000e+00> : vector<1x128xf32>
    %85 = tpu.matmul %82, %84, %cst_74 {dimension_numbers = #tpu.dot_dimension_numbers<[1], [0], [0], [1], [0, 0, 1, 1], [], []>} : vector<1x64xbf16>, vector<64x128xbf16>, vector<1x128xf32> -> vector<1x128xf32>
    %c4_75 = arith.constant 4 : index
    %c0_76 = arith.constant 0 : index
    %86 = vector.load %arg10[%c4_75, %c0_76] : memref<64x128xf32, #tpu.memory_space<vmem>>, vector<1x128xf32>
    tpu.vector_store %arg10[%c4_75, %c0_76], %85 {strides = array<i32>} : memref<64x128xf32, #tpu.memory_space<vmem>>, vector<1x128xf32>,
    %87 = vector.extract_strided_slice %52 {offsets = [5, 0], sizes = [1, 64], strides = [1, 1]} : vector<64x64xbf16> to vector<1x64xbf16>
    %c5 = arith.constant 5 : index
    %c0_77 = arith.constant 0 : index
    %c0_78 = arith.constant 0 : index
    %88 = vector.load %arg8[%c5, %c0_77, %c0_78] : memref<64x64x128xbf16, #tpu.memory_space<vmem>>, vector<1x64x128xbf16>
    %89 = vector.shape_cast %88 : vector<1x64x128xbf16> to vector<64x128xbf16>
    %cst_79 = arith.constant dense<0.000000e+00> : vector<1x128xf32>
    %90 = tpu.matmul %87, %89, %cst_79 {dimension_numbers = #tpu.dot_dimension_numbers<[1], [0], [0], [1], [0, 0, 1, 1], [], []>} : vector<1x64xbf16>, vector<64x128xbf16>, vector<1x128xf32> -> vector<1x128xf32>
    %c5_80 = arith.constant 5 : index
    %c0_81 = arith.constant 0 : index
    %91 = vector.load %arg10[%c5_80, %c0_81] : memref<64x128xf32, #tpu.memory_space<vmem>>, vector<1x128xf32>
    tpu.vector_store %arg10[%c5_80, %c0_81], %90 {strides = array<i32>} : memref<64x128xf32, #tpu.memory_space<vmem>>, vector<1x128xf32>,
    %92 = vector.extract_strided_slice %52 {offsets = [6, 0], sizes = [1, 64], strides = [1, 1]} : vector<64x64xbf16> to vector<1x64xbf16>
    %c6 = arith.constant 6 : index
    %c0_82 = arith.constant 0 : index
    %c0_83 = arith.constant 0 : index
    %93 = vector.load %arg8[%c6, %c0_82, %c0_83] : memref<64x64x128xbf16, #tpu.memory_space<vmem>>, vector<1x64x128xbf16>
    %94 = vector.shape_cast %93 : vector<1x64x128xbf16> to vector<64x128xbf16>
    %cst_84 = arith.constant dense<0.000000e+00> : vector<1x128xf32>
    %95 = tpu.matmul %92, %94, %cst_84 {dimension_numbers = #tpu.dot_dimension_numbers<[1], [0], [0], [1], [0, 0, 1, 1], [], []>} : vector<1x64xbf16>, vector<64x128xbf16>, vector<1x128xf32> -> vector<1x128xf32>
    %c6_85 = arith.constant 6 : index
    %c0_86 = arith.constant 0 : index
    %96 = vector.load %arg10[%c6_85, %c0_86] : memref<64x128xf32, #tpu.memory_space<vmem>>, vector<1x128xf32>
    tpu.vector_store %arg10[%c6_85, %c0_86], %95 {strides = array<i32>} : memref<64x128xf32, #tpu.memory_space<vmem>>, vector<1x128xf32>,
    %97 = vector.extract_strided_slice %52 {offsets = [7, 0], sizes = [1, 64], strides = [1, 1]} : vector<64x64xbf16> to vector<1x64xbf16>
    %c7 = arith.constant 7 : index
    %c0_87 = arith.constant 0 : index
    %c0_88 = arith.constant 0 : index
    %98 = vector.load %arg8[%c7, %c0_87, %c0_88] : memref<64x64x128xbf16, #tpu.memory_space<vmem>>, vector<1x64x128xbf16>
    %99 = vector.shape_cast %98 : vector<1x64x128xbf16> to vector<64x128xbf16>
    %cst_89 = arith.constant dense<0.000000e+00> : vector<1x128xf32>
    %100 = tpu.matmul %97, %99, %cst_89 {dimension_numbers = #tpu.dot_dimension_numbers<[1], [0], [0], [1], [0, 0, 1, 1], [], []>} : vector<1x64xbf16>, vector<64x128xbf16>, vector<1x128xf32> -> vector<1x128xf32>
    %c7_90 = arith.constant 7 : index
    %c0_91 = arith.constant 0 : index
    %101 = vector.load %arg10[%c7_90, %c0_91] : memref<64x128xf32, #tpu.memory_space<vmem>>, vector<1x128xf32>
    tpu.vector_store %arg10[%c7_90, %c0_91], %100 {strides = array<i32>} : memref<64x128xf32, #tpu.memory_space<vmem>>, vector<1x128xf32>,
    %102 = vector.extract_strided_slice %52 {offsets = [8, 0], sizes = [1, 64], strides = [1, 1]} : vector<64x64xbf16> to vector<1x64xbf16>
    %c8 = arith.constant 8 : index
    %c0_92 = arith.constant 0 : index
    %c0_93 = arith.constant 0 : index
    %103 = vector.load %arg8[%c8, %c0_92, %c0_93] : memref<64x64x128xbf16, #tpu.memory_space<vmem>>, vector<1x64x128xbf16>
    %104 = vector.shape_cast %103 : vector<1x64x128xbf16> to vector<64x128xbf16>
    %cst_94 = arith.constant dense<0.000000e+00> : vector<1x128xf32>
    %105 = tpu.matmul %102, %104, %cst_94 {dimension_numbers = #tpu.dot_dimension_numbers<[1], [0], [0], [1], [0, 0, 1, 1], [], []>} : vector<1x64xbf16>, vector<64x128xbf16>, vector<1x128xf32> -> vector<1x128xf32>
    %c8_95 = arith.constant 8 : index
    %c0_96 = arith.constant 0 : index
    %106 = vector.load %arg10[%c8_95, %c0_96] : memref<64x128xf32, #tpu.memory_space<vmem>>, vector<1x128xf32>
    tpu.vector_store %arg10[%c8_95, %c0_96], %105 {strides = array<i32>} : memref<64x128xf32, #tpu.memory_space<vmem>>, vector<1x128xf32>,
    %107 = vector.extract_strided_slice %52 {offsets = [9, 0], sizes = [1, 64], strides = [1, 1]} : vector<64x64xbf16> to vector<1x64xbf16>
    %c9 = arith.constant 9 : index
    %c0_97 = arith.constant 0 : index
    %c0_98 = arith.constant 0 : index
    %108 = vector.load %arg8[%c9, %c0_97, %c0_98] : memref<64x64x128xbf16, #tpu.memory_space<vmem>>, vector<1x64x128xbf16>
    %109 = vector.shape_cast %108 : vector<1x64x128xbf16> to vector<64x128xbf16>
    %cst_99 = arith.constant dense<0.000000e+00> : vector<1x128xf32>
    %110 = tpu.matmul %107, %109, %cst_99 {dimension_numbers = #tpu.dot_dimension_numbers<[1], [0], [0], [1], [0, 0, 1, 1], [], []>} : vector<1x64xbf16>, vector<64x128xbf16>, vector<1x128xf32> -> vector<1x128xf32>
    %c9_100 = arith.constant 9 : index
    %c0_101 = arith.constant 0 : index
    %111 = vector.load %arg10[%c9_100, %c0_101] : memref<64x128xf32, #tpu.memory_space<vmem>>, vector<1x128xf32>
    tpu.vector_store %arg10[%c9_100, %c0_101], %110 {strides = array<i32>} : memref<64x128xf32, #tpu.memory_space<vmem>>, vector<1x128xf32>,
    %112 = vector.extract_strided_slice %52 {offsets = [10, 0], sizes = [1, 64], strides = [1, 1]} : vector<64x64xbf16> to vector<1x64xbf16>
    %c10_102 = arith.constant 10 : index
    %c0_103 = arith.constant 0 : index
    %c0_104 = arith.constant 0 : index
    %113 = vector.load %arg8[%c10_102, %c0_103, %c0_104] : memref<64x64x128xbf16, #tpu.memory_space<vmem>>, vector<1x64x128xbf16>
    %114 = vector.shape_cast %113 : vector<1x64x128xbf16> to vector<64x128xbf16>
    %cst_105 = arith.constant dense<0.000000e+00> : vector<1x128xf32>
    %115 = tpu.matmul %112, %114, %cst_105 {dimension_numbers = #tpu.dot_dimension_numbers<[1], [0], [0], [1], [0, 0, 1, 1], [], []>} : vector<1x64xbf16>, vector<64x128xbf16>, vector<1x128xf32> -> vector<1x128xf32>
    %c10_106 = arith.constant 10 : index
    %c0_107 = arith.constant 0 : index
    %116 = vector.load %arg10[%c10_106, %c0_107] : memref<64x128xf32, #tpu.memory_space<vmem>>, vector<1x128xf32>
    tpu.vector_store %arg10[%c10_106, %c0_107], %115 {strides = array<i32>} : memref<64x128xf32, #tpu.memory_space<vmem>>, vector<1x128xf32>,
    %117 = vector.extract_strided_slice %52 {offsets = [11, 0], sizes = [1, 64], strides = [1, 1]} : vector<64x64xbf16> to vector<1x64xbf16>
    %c11_108 = arith.constant 11 : index
    %c0_109 = arith.constant 0 : index
    %c0_110 = arith.constant 0 : index
    %118 = vector.load %arg8[%c11_108, %c0_109, %c0_110] : memref<64x64x128xbf16, #tpu.memory_space<vmem>>, vector<1x64x128xbf16>
    %119 = vector.shape_cast %118 : vector<1x64x128xbf16> to vector<64x128xbf16>
    %cst_111 = arith.constant dense<0.000000e+00> : vector<1x128xf32>
    %120 = tpu.matmul %117, %119, %cst_111 {dimension_numbers = #tpu.dot_dimension_numbers<[1], [0], [0], [1], [0, 0, 1, 1], [], []>} : vector<1x64xbf16>, vector<64x128xbf16>, vector<1x128xf32> -> vector<1x128xf32>
    %c11_112 = arith.constant 11 : index
    %c0_113 = arith.constant 0 : index
    %121 = vector.load %arg10[%c11_112, %c0_113] : memref<64x128xf32, #tpu.memory_space<vmem>>, vector<1x128xf32>
    tpu.vector_store %arg10[%c11_112, %c0_113], %120 {strides = array<i32>} : memref<64x128xf32, #tpu.memory_space<vmem>>, vector<1x128xf32>,
    %122 = vector.extract_strided_slice %52 {offsets = [12, 0], sizes = [1, 64], strides = [1, 1]} : vector<64x64xbf16> to vector<1x64xbf16>
    %c12 = arith.constant 12 : index
    %c0_114 = arith.constant 0 : index
    %c0_115 = arith.constant 0 : index
    %123 = vector.load %arg8[%c12, %c0_114, %c0_115] : memref<64x64x128xbf16, #tpu.memory_space<vmem>>, vector<1x64x128xbf16>
    %124 = vector.shape_cast %123 : vector<1x64x128xbf16> to vector<64x128xbf16>
    %cst_116 = arith.constant dense<0.000000e+00> : vector<1x128xf32>
    %125 = tpu.matmul %122, %124, %cst_116 {dimension_numbers = #tpu.dot_dimension_numbers<[1], [0], [0], [1], [0, 0, 1, 1], [], []>} : vector<1x64xbf16>, vector<64x128xbf16>, vector<1x128xf32> -> vector<1x128xf32>
    %c12_117 = arith.constant 12 : index
    %c0_118 = arith.constant 0 : index
    %126 = vector.load %arg10[%c12_117, %c0_118] : memref<64x128xf32, #tpu.memory_space<vmem>>, vector<1x128xf32>
    tpu.vector_store %arg10[%c12_117, %c0_118], %125 {strides = array<i32>} : memref<64x128xf32, #tpu.memory_space<vmem>>, vector<1x128xf32>,
    %127 = vector.extract_strided_slice %52 {offsets = [13, 0], sizes = [1, 64], strides = [1, 1]} : vector<64x64xbf16> to vector<1x64xbf16>
    %c13 = arith.constant 13 : index
    %c0_119 = arith.constant 0 : index
    %c0_120 = arith.constant 0 : index
    %128 = vector.load %arg8[%c13, %c0_119, %c0_120] : memref<64x64x128xbf16, #tpu.memory_space<vmem>>, vector<1x64x128xbf16>
    %129 = vector.shape_cast %128 : vector<1x64x128xbf16> to vector<64x128xbf16>
    %cst_121 = arith.constant dense<0.000000e+00> : vector<1x128xf32>
    %130 = tpu.matmul %127, %129, %cst_121 {dimension_numbers = #tpu.dot_dimension_numbers<[1], [0], [0], [1], [0, 0, 1, 1], [], []>} : vector<1x64xbf16>, vector<64x128xbf16>, vector<1x128xf32> -> vector<1x128xf32>
    %c13_122 = arith.constant 13 : index
    %c0_123 = arith.constant 0 : index
    %131 = vector.load %arg10[%c13_122, %c0_123] : memref<64x128xf32, #tpu.memory_space<vmem>>, vector<1x128xf32>
    tpu.vector_store %arg10[%c13_122, %c0_123], %130 {strides = array<i32>} : memref<64x128xf32, #tpu.memory_space<vmem>>, vector<1x128xf32>,
    %132 = vector.extract_strided_slice %52 {offsets = [14, 0], sizes = [1, 64], strides = [1, 1]} : vector<64x64xbf16> to vector<1x64xbf16>
    %c14 = arith.constant 14 : index
    %c0_124 = arith.constant 0 : index
    %c0_125 = arith.constant 0 : index
    %133 = vector.load %arg8[%c14, %c0_124, %c0_125] : memref<64x64x128xbf16, #tpu.memory_space<vmem>>, vector<1x64x128xbf16>
    %134 = vector.shape_cast %133 : vector<1x64x128xbf16> to vector<64x128xbf16>
    %cst_126 = arith.constant dense<0.000000e+00> : vector<1x128xf32>
    %135 = tpu.matmul %132, %134, %cst_126 {dimension_numbers = #tpu.dot_dimension_numbers<[1], [0], [0], [1], [0, 0, 1, 1], [], []>} : vector<1x64xbf16>, vector<64x128xbf16>, vector<1x128xf32> -> vector<1x128xf32>
    %c14_127 = arith.constant 14 : index
    %c0_128 = arith.constant 0 : index
    %136 = vector.load %arg10[%c14_127, %c0_128] : memref<64x128xf32, #tpu.memory_space<vmem>>, vector<1x128xf32>
    tpu.vector_store %arg10[%c14_127, %c0_128], %135 {strides = array<i32>} : memref<64x128xf32, #tpu.memory_space<vmem>>, vector<1x128xf32>,
    %137 = vector.extract_strided_slice %52 {offsets = [15, 0], sizes = [1, 64], strides = [1, 1]} : vector<64x64xbf16> to vector<1x64xbf16>
    %c15 = arith.constant 15 : index
    %c0_129 = arith.constant 0 : index
    %c0_130 = arith.constant 0 : index
    %138 = vector.load %arg8[%c15, %c0_129, %c0_130] : memref<64x64x128xbf16, #tpu.memory_space<vmem>>, vector<1x64x128xbf16>
    %139 = vector.shape_cast %138 : vector<1x64x128xbf16> to vector<64x128xbf16>
    %cst_131 = arith.constant dense<0.000000e+00> : vector<1x128xf32>
    %140 = tpu.matmul %137, %139, %cst_131 {dimension_numbers = #tpu.dot_dimension_numbers<[1], [0], [0], [1], [0, 0, 1, 1], [], []>} : vector<1x64xbf16>, vector<64x128xbf16>, vector<1x128xf32> -> vector<1x128xf32>
    %c15_132 = arith.constant 15 : index
    %c0_133 = arith.constant 0 : index
    %141 = vector.load %arg10[%c15_132, %c0_133] : memref<64x128xf32, #tpu.memory_space<vmem>>, vector<1x128xf32>
    tpu.vector_store %arg10[%c15_132, %c0_133], %140 {strides = array<i32>} : memref<64x128xf32, #tpu.memory_space<vmem>>, vector<1x128xf32>,
    %142 = vector.extract_strided_slice %52 {offsets = [16, 0], sizes = [1, 64], strides = [1, 1]} : vector<64x64xbf16> to vector<1x64xbf16>
    %c16 = arith.constant 16 : index
    %c0_134 = arith.constant 0 : index
    %c0_135 = arith.constant 0 : index
    %143 = vector.load %arg8[%c16, %c0_134, %c0_135] : memref<64x64x128xbf16, #tpu.memory_space<vmem>>, vector<1x64x128xbf16>
    %144 = vector.shape_cast %143 : vector<1x64x128xbf16> to vector<64x128xbf16>
    %cst_136 = arith.constant dense<0.000000e+00> : vector<1x128xf32>
    %145 = tpu.matmul %142, %144, %cst_136 {dimension_numbers = #tpu.dot_dimension_numbers<[1], [0], [0], [1], [0, 0, 1, 1], [], []>} : vector<1x64xbf16>, vector<64x128xbf16>, vector<1x128xf32> -> vector<1x128xf32>
    %c16_137 = arith.constant 16 : index
    %c0_138 = arith.constant 0 : index
    %146 = vector.load %arg10[%c16_137, %c0_138] : memref<64x128xf32, #tpu.memory_space<vmem>>, vector<1x128xf32>
    tpu.vector_store %arg10[%c16_137, %c0_138], %145 {strides = array<i32>} : memref<64x128xf32, #tpu.memory_space<vmem>>, vector<1x128xf32>,
    %147 = vector.extract_strided_slice %52 {offsets = [17, 0], sizes = [1, 64], strides = [1, 1]} : vector<64x64xbf16> to vector<1x64xbf16>
    %c17 = arith.constant 17 : index
    %c0_139 = arith.constant 0 : index
    %c0_140 = arith.constant 0 : index
    %148 = vector.load %arg8[%c17, %c0_139, %c0_140] : memref<64x64x128xbf16, #tpu.memory_space<vmem>>, vector<1x64x128xbf16>
    %149 = vector.shape_cast %148 : vector<1x64x128xbf16> to vector<64x128xbf16>
    %cst_141 = arith.constant dense<0.000000e+00> : vector<1x128xf32>
    %150 = tpu.matmul %147, %149, %cst_141 {dimension_numbers = #tpu.dot_dimension_numbers<[1], [0], [0], [1], [0, 0, 1, 1], [], []>} : vector<1x64xbf16>, vector<64x128xbf16>, vector<1x128xf32> -> vector<1x128xf32>
    %c17_142 = arith.constant 17 : index
    %c0_143 = arith.constant 0 : index
    %151 = vector.load %arg10[%c17_142, %c0_143] : memref<64x128xf32, #tpu.memory_space<vmem>>, vector<1x128xf32>
    tpu.vector_store %arg10[%c17_142, %c0_143], %150 {strides = array<i32>} : memref<64x128xf32, #tpu.memory_space<vmem>>, vector<1x128xf32>,
    %152 = vector.extract_strided_slice %52 {offsets = [18, 0], sizes = [1, 64], strides = [1, 1]} : vector<64x64xbf16> to vector<1x64xbf16>
    %c18 = arith.constant 18 : index
    %c0_144 = arith.constant 0 : index
    %c0_145 = arith.constant 0 : index
    %153 = vector.load %arg8[%c18, %c0_144, %c0_145] : memref<64x64x128xbf16, #tpu.memory_space<vmem>>, vector<1x64x128xbf16>
    %154 = vector.shape_cast %153 : vector<1x64x128xbf16> to vector<64x128xbf16>
    %cst_146 = arith.constant dense<0.000000e+00> : vector<1x128xf32>
    %155 = tpu.matmul %152, %154, %cst_146 {dimension_numbers = #tpu.dot_dimension_numbers<[1], [0], [0], [1], [0, 0, 1, 1], [], []>} : vector<1x64xbf16>, vector<64x128xbf16>, vector<1x128xf32> -> vector<1x128xf32>
    %c18_147 = arith.constant 18 : index
    %c0_148 = arith.constant 0 : index
    %156 = vector.load %arg10[%c18_147, %c0_148] : memref<64x128xf32, #tpu.memory_space<vmem>>, vector<1x128xf32>
    tpu.vector_store %arg10[%c18_147, %c0_148], %155 {strides = array<i32>} : memref<64x128xf32, #tpu.memory_space<vmem>>, vector<1x128xf32>,
    %157 = vector.extract_strided_slice %52 {offsets = [19, 0], sizes = [1, 64], strides = [1, 1]} : vector<64x64xbf16> to vector<1x64xbf16>
    %c19 = arith.constant 19 : index
    %c0_149 = arith.constant 0 : index
    %c0_150 = arith.constant 0 : index
    %158 = vector.load %arg8[%c19, %c0_149, %c0_150] : memref<64x64x128xbf16, #tpu.memory_space<vmem>>, vector<1x64x128xbf16>
    %159 = vector.shape_cast %158 : vector<1x64x128xbf16> to vector<64x128xbf16>
    %cst_151 = arith.constant dense<0.000000e+00> : vector<1x128xf32>
    %160 = tpu.matmul %157, %159, %cst_151 {dimension_numbers = #tpu.dot_dimension_numbers<[1], [0], [0], [1], [0, 0, 1, 1], [], []>} : vector<1x64xbf16>, vector<64x128xbf16>, vector<1x128xf32> -> vector<1x128xf32>
    %c19_152 = arith.constant 19 : index
    %c0_153 = arith.constant 0 : index
    %161 = vector.load %arg10[%c19_152, %c0_153] : memref<64x128xf32, #tpu.memory_space<vmem>>, vector<1x128xf32>
    tpu.vector_store %arg10[%c19_152, %c0_153], %160 {strides = array<i32>} : memref<64x128xf32, #tpu.memory_space<vmem>>, vector<1x128xf32>,
    %162 = vector.extract_strided_slice %52 {offsets = [20, 0], sizes = [1, 64], strides = [1, 1]} : vector<64x64xbf16> to vector<1x64xbf16>
    %c20 = arith.constant 20 : index
    %c0_154 = arith.constant 0 : index
    %c0_155 = arith.constant 0 : index
    %163 = vector.load %arg8[%c20, %c0_154, %c0_155] : memref<64x64x128xbf16, #tpu.memory_space<vmem>>, vector<1x64x128xbf16>
    %164 = vector.shape_cast %163 : vector<1x64x128xbf16> to vector<64x128xbf16>
    %cst_156 = arith.constant dense<0.000000e+00> : vector<1x128xf32>
    %165 = tpu.matmul %162, %164, %cst_156 {dimension_numbers = #tpu.dot_dimension_numbers<[1], [0], [0], [1], [0, 0, 1, 1], [], []>} : vector<1x64xbf16>, vector<64x128xbf16>, vector<1x128xf32> -> vector<1x128xf32>
    %c20_157 = arith.constant 20 : index
    %c0_158 = arith.constant 0 : index
    %166 = vector.load %arg10[%c20_157, %c0_158] : memref<64x128xf32, #tpu.memory_space<vmem>>, vector<1x128xf32>
    tpu.vector_store %arg10[%c20_157, %c0_158], %165 {strides = array<i32>} : memref<64x128xf32, #tpu.memory_space<vmem>>, vector<1x128xf32>,
    %167 = vector.extract_strided_slice %52 {offsets = [21, 0], sizes = [1, 64], strides = [1, 1]} : vector<64x64xbf16> to vector<1x64xbf16>
    %c21 = arith.constant 21 : index
    %c0_159 = arith.constant 0 : index
    %c0_160 = arith.constant 0 : index
    %168 = vector.load %arg8[%c21, %c0_159, %c0_160] : memref<64x64x128xbf16, #tpu.memory_space<vmem>>, vector<1x64x128xbf16>
    %169 = vector.shape_cast %168 : vector<1x64x128xbf16> to vector<64x128xbf16>
    %cst_161 = arith.constant dense<0.000000e+00> : vector<1x128xf32>
    %170 = tpu.matmul %167, %169, %cst_161 {dimension_numbers = #tpu.dot_dimension_numbers<[1], [0], [0], [1], [0, 0, 1, 1], [], []>} : vector<1x64xbf16>, vector<64x128xbf16>, vector<1x128xf32> -> vector<1x128xf32>
    %c21_162 = arith.constant 21 : index
    %c0_163 = arith.constant 0 : index
    %171 = vector.load %arg10[%c21_162, %c0_163] : memref<64x128xf32, #tpu.memory_space<vmem>>, vector<1x128xf32>
    tpu.vector_store %arg10[%c21_162, %c0_163], %170 {strides = array<i32>} : memref<64x128xf32, #tpu.memory_space<vmem>>, vector<1x128xf32>,
    %172 = vector.extract_strided_slice %52 {offsets = [22, 0], sizes = [1, 64], strides = [1, 1]} : vector<64x64xbf16> to vector<1x64xbf16>
    %c22 = arith.constant 22 : index
    %c0_164 = arith.constant 0 : index
    %c0_165 = arith.constant 0 : index
    %173 = vector.load %arg8[%c22, %c0_164, %c0_165] : memref<64x64x128xbf16, #tpu.memory_space<vmem>>, vector<1x64x128xbf16>
    %174 = vector.shape_cast %173 : vector<1x64x128xbf16> to vector<64x128xbf16>
    %cst_166 = arith.constant dense<0.000000e+00> : vector<1x128xf32>
    %175 = tpu.matmul %172, %174, %cst_166 {dimension_numbers = #tpu.dot_dimension_numbers<[1], [0], [0], [1], [0, 0, 1, 1], [], []>} : vector<1x64xbf16>, vector<64x128xbf16>, vector<1x128xf32> -> vector<1x128xf32>
    %c22_167 = arith.constant 22 : index
    %c0_168 = arith.constant 0 : index
    %176 = vector.load %arg10[%c22_167, %c0_168] : memref<64x128xf32, #tpu.memory_space<vmem>>, vector<1x128xf32>
    tpu.vector_store %arg10[%c22_167, %c0_168], %175 {strides = array<i32>} : memref<64x128xf32, #tpu.memory_space<vmem>>, vector<1x128xf32>,
    %177 = vector.extract_strided_slice %52 {offsets = [23, 0], sizes = [1, 64], strides = [1, 1]} : vector<64x64xbf16> to vector<1x64xbf16>
    %c23 = arith.constant 23 : index
    %c0_169 = arith.constant 0 : index
    %c0_170 = arith.constant 0 : index
    %178 = vector.load %arg8[%c23, %c0_169, %c0_170] : memref<64x64x128xbf16, #tpu.memory_space<vmem>>, vector<1x64x128xbf16>
    %179 = vector.shape_cast %178 : vector<1x64x128xbf16> to vector<64x128xbf16>
    %cst_171 = arith.constant dense<0.000000e+00> : vector<1x128xf32>
    %180 = tpu.matmul %177, %179, %cst_171 {dimension_numbers = #tpu.dot_dimension_numbers<[1], [0], [0], [1], [0, 0, 1, 1], [], []>} : vector<1x64xbf16>, vector<64x128xbf16>, vector<1x128xf32> -> vector<1x128xf32>
    %c23_172 = arith.constant 23 : index
    %c0_173 = arith.constant 0 : index
    %181 = vector.load %arg10[%c23_172, %c0_173] : memref<64x128xf32, #tpu.memory_space<vmem>>, vector<1x128xf32>
    tpu.vector_store %arg10[%c23_172, %c0_173], %180 {strides = array<i32>} : memref<64x128xf32, #tpu.memory_space<vmem>>, vector<1x128xf32>,
    %182 = vector.extract_strided_slice %52 {offsets = [24, 0], sizes = [1, 64], strides = [1, 1]} : vector<64x64xbf16> to vector<1x64xbf16>
    %c24 = arith.constant 24 : index
    %c0_174 = arith.constant 0 : index
    %c0_175 = arith.constant 0 : index
    %183 = vector.load %arg8[%c24, %c0_174, %c0_175] : memref<64x64x128xbf16, #tpu.memory_space<vmem>>, vector<1x64x128xbf16>
    %184 = vector.shape_cast %183 : vector<1x64x128xbf16> to vector<64x128xbf16>
    %cst_176 = arith.constant dense<0.000000e+00> : vector<1x128xf32>
    %185 = tpu.matmul %182, %184, %cst_176 {dimension_numbers = #tpu.dot_dimension_numbers<[1], [0], [0], [1], [0, 0, 1, 1], [], []>} : vector<1x64xbf16>, vector<64x128xbf16>, vector<1x128xf32> -> vector<1x128xf32>
    %c24_177 = arith.constant 24 : index
    %c0_178 = arith.constant 0 : index
    %186 = vector.load %arg10[%c24_177, %c0_178] : memref<64x128xf32, #tpu.memory_space<vmem>>, vector<1x128xf32>
    tpu.vector_store %arg10[%c24_177, %c0_178], %185 {strides = array<i32>} : memref<64x128xf32, #tpu.memory_space<vmem>>, vector<1x128xf32>,
    %187 = vector.extract_strided_slice %52 {offsets = [25, 0], sizes = [1, 64], strides = [1, 1]} : vector<64x64xbf16> to vector<1x64xbf16>
    %c25 = arith.constant 25 : index
    %c0_179 = arith.constant 0 : index
    %c0_180 = arith.constant 0 : index
    %188 = vector.load %arg8[%c25, %c0_179, %c0_180] : memref<64x64x128xbf16, #tpu.memory_space<vmem>>, vector<1x64x128xbf16>
    %189 = vector.shape_cast %188 : vector<1x64x128xbf16> to vector<64x128xbf16>
    %cst_181 = arith.constant dense<0.000000e+00> : vector<1x128xf32>
    %190 = tpu.matmul %187, %189, %cst_181 {dimension_numbers = #tpu.dot_dimension_numbers<[1], [0], [0], [1], [0, 0, 1, 1], [], []>} : vector<1x64xbf16>, vector<64x128xbf16>, vector<1x128xf32> -> vector<1x128xf32>
    %c25_182 = arith.constant 25 : index
    %c0_183 = arith.constant 0 : index
    %191 = vector.load %arg10[%c25_182, %c0_183] : memref<64x128xf32, #tpu.memory_space<vmem>>, vector<1x128xf32>
    tpu.vector_store %arg10[%c25_182, %c0_183], %190 {strides = array<i32>} : memref<64x128xf32, #tpu.memory_space<vmem>>, vector<1x128xf32>,
    %192 = vector.extract_strided_slice %52 {offsets = [26, 0], sizes = [1, 64], strides = [1, 1]} : vector<64x64xbf16> to vector<1x64xbf16>
    %c26 = arith.constant 26 : index
    %c0_184 = arith.constant 0 : index
    %c0_185 = arith.constant 0 : index
    %193 = vector.load %arg8[%c26, %c0_184, %c0_185] : memref<64x64x128xbf16, #tpu.memory_space<vmem>>, vector<1x64x128xbf16>
    %194 = vector.shape_cast %193 : vector<1x64x128xbf16> to vector<64x128xbf16>
    %cst_186 = arith.constant dense<0.000000e+00> : vector<1x128xf32>
    %195 = tpu.matmul %192, %194, %cst_186 {dimension_numbers = #tpu.dot_dimension_numbers<[1], [0], [0], [1], [0, 0, 1, 1], [], []>} : vector<1x64xbf16>, vector<64x128xbf16>, vector<1x128xf32> -> vector<1x128xf32>
    %c26_187 = arith.constant 26 : index
    %c0_188 = arith.constant 0 : index
    %196 = vector.load %arg10[%c26_187, %c0_188] : memref<64x128xf32, #tpu.memory_space<vmem>>, vector<1x128xf32>
    tpu.vector_store %arg10[%c26_187, %c0_188], %195 {strides = array<i32>} : memref<64x128xf32, #tpu.memory_space<vmem>>, vector<1x128xf32>,
    %197 = vector.extract_strided_slice %52 {offsets = [27, 0], sizes = [1, 64], strides = [1, 1]} : vector<64x64xbf16> to vector<1x64xbf16>
    %c27 = arith.constant 27 : index
    %c0_189 = arith.constant 0 : index
    %c0_190 = arith.constant 0 : index
    %198 = vector.load %arg8[%c27, %c0_189, %c0_190] : memref<64x64x128xbf16, #tpu.memory_space<vmem>>, vector<1x64x128xbf16>
    %199 = vector.shape_cast %198 : vector<1x64x128xbf16> to vector<64x128xbf16>
    %cst_191 = arith.constant dense<0.000000e+00> : vector<1x128xf32>
    %200 = tpu.matmul %197, %199, %cst_191 {dimension_numbers = #tpu.dot_dimension_numbers<[1], [0], [0], [1], [0, 0, 1, 1], [], []>} : vector<1x64xbf16>, vector<64x128xbf16>, vector<1x128xf32> -> vector<1x128xf32>
    %c27_192 = arith.constant 27 : index
    %c0_193 = arith.constant 0 : index
    %201 = vector.load %arg10[%c27_192, %c0_193] : memref<64x128xf32, #tpu.memory_space<vmem>>, vector<1x128xf32>
    tpu.vector_store %arg10[%c27_192, %c0_193], %200 {strides = array<i32>} : memref<64x128xf32, #tpu.memory_space<vmem>>, vector<1x128xf32>,
    %202 = vector.extract_strided_slice %52 {offsets = [28, 0], sizes = [1, 64], strides = [1, 1]} : vector<64x64xbf16> to vector<1x64xbf16>
    %c28 = arith.constant 28 : index
    %c0_194 = arith.constant 0 : index
    %c0_195 = arith.constant 0 : index
    %203 = vector.load %arg8[%c28, %c0_194, %c0_195] : memref<64x64x128xbf16, #tpu.memory_space<vmem>>, vector<1x64x128xbf16>
    %204 = vector.shape_cast %203 : vector<1x64x128xbf16> to vector<64x128xbf16>
    %cst_196 = arith.constant dense<0.000000e+00> : vector<1x128xf32>
    %205 = tpu.matmul %202, %204, %cst_196 {dimension_numbers = #tpu.dot_dimension_numbers<[1], [0], [0], [1], [0, 0, 1, 1], [], []>} : vector<1x64xbf16>, vector<64x128xbf16>, vector<1x128xf32> -> vector<1x128xf32>
    %c28_197 = arith.constant 28 : index
    %c0_198 = arith.constant 0 : index
    %206 = vector.load %arg10[%c28_197, %c0_198] : memref<64x128xf32, #tpu.memory_space<vmem>>, vector<1x128xf32>
    tpu.vector_store %arg10[%c28_197, %c0_198], %205 {strides = array<i32>} : memref<64x128xf32, #tpu.memory_space<vmem>>, vector<1x128xf32>,
    %207 = vector.extract_strided_slice %52 {offsets = [29, 0], sizes = [1, 64], strides = [1, 1]} : vector<64x64xbf16> to vector<1x64xbf16>
    %c29 = arith.constant 29 : index
    %c0_199 = arith.constant 0 : index
    %c0_200 = arith.constant 0 : index
    %208 = vector.load %arg8[%c29, %c0_199, %c0_200] : memref<64x64x128xbf16, #tpu.memory_space<vmem>>, vector<1x64x128xbf16>
    %209 = vector.shape_cast %208 : vector<1x64x128xbf16> to vector<64x128xbf16>
    %cst_201 = arith.constant dense<0.000000e+00> : vector<1x128xf32>
    %210 = tpu.matmul %207, %209, %cst_201 {dimension_numbers = #tpu.dot_dimension_numbers<[1], [0], [0], [1], [0, 0, 1, 1], [], []>} : vector<1x64xbf16>, vector<64x128xbf16>, vector<1x128xf32> -> vector<1x128xf32>
    %c29_202 = arith.constant 29 : index
    %c0_203 = arith.constant 0 : index
    %211 = vector.load %arg10[%c29_202, %c0_203] : memref<64x128xf32, #tpu.memory_space<vmem>>, vector<1x128xf32>
    tpu.vector_store %arg10[%c29_202, %c0_203], %210 {strides = array<i32>} : memref<64x128xf32, #tpu.memory_space<vmem>>, vector<1x128xf32>,
    %212 = vector.extract_strided_slice %52 {offsets = [30, 0], sizes = [1, 64], strides = [1, 1]} : vector<64x64xbf16> to vector<1x64xbf16>
    %c30 = arith.constant 30 : index
    %c0_204 = arith.constant 0 : index
    %c0_205 = arith.constant 0 : index
    %213 = vector.load %arg8[%c30, %c0_204, %c0_205] : memref<64x64x128xbf16, #tpu.memory_space<vmem>>, vector<1x64x128xbf16>
    %214 = vector.shape_cast %213 : vector<1x64x128xbf16> to vector<64x128xbf16>
    %cst_206 = arith.constant dense<0.000000e+00> : vector<1x128xf32>
    %215 = tpu.matmul %212, %214, %cst_206 {dimension_numbers = #tpu.dot_dimension_numbers<[1], [0], [0], [1], [0, 0, 1, 1], [], []>} : vector<1x64xbf16>, vector<64x128xbf16>, vector<1x128xf32> -> vector<1x128xf32>
    %c30_207 = arith.constant 30 : index
    %c0_208 = arith.constant 0 : index
    %216 = vector.load %arg10[%c30_207, %c0_208] : memref<64x128xf32, #tpu.memory_space<vmem>>, vector<1x128xf32>
    tpu.vector_store %arg10[%c30_207, %c0_208], %215 {strides = array<i32>} : memref<64x128xf32, #tpu.memory_space<vmem>>, vector<1x128xf32>,
    %217 = vector.extract_strided_slice %52 {offsets = [31, 0], sizes = [1, 64], strides = [1, 1]} : vector<64x64xbf16> to vector<1x64xbf16>
    %c31 = arith.constant 31 : index
    %c0_209 = arith.constant 0 : index
    %c0_210 = arith.constant 0 : index
    %218 = vector.load %arg8[%c31, %c0_209, %c0_210] : memref<64x64x128xbf16, #tpu.memory_space<vmem>>, vector<1x64x128xbf16>
    %219 = vector.shape_cast %218 : vector<1x64x128xbf16> to vector<64x128xbf16>
    %cst_211 = arith.constant dense<0.000000e+00> : vector<1x128xf32>
    %220 = tpu.matmul %217, %219, %cst_211 {dimension_numbers = #tpu.dot_dimension_numbers<[1], [0], [0], [1], [0, 0, 1, 1], [], []>} : vector<1x64xbf16>, vector<64x128xbf16>, vector<1x128xf32> -> vector<1x128xf32>
    %c31_212 = arith.constant 31 : index
    %c0_213 = arith.constant 0 : index
    %221 = vector.load %arg10[%c31_212, %c0_213] : memref<64x128xf32, #tpu.memory_space<vmem>>, vector<1x128xf32>
    tpu.vector_store %arg10[%c31_212, %c0_213], %220 {strides = array<i32>} : memref<64x128xf32, #tpu.memory_space<vmem>>, vector<1x128xf32>,
    %c1_i32_214 = arith.constant 1 : i32
    %c32_i32_215 = arith.constant 32 : i32
    %c0_i32_216 = arith.constant 0 : i32
    %c0_i32_217 = arith.constant 0 : i32
    %222 = tpu.memref_slice %arg6[%c32_i32_215, %c0_i32_216, %c0_i32_217] : memref<64x64x128xbf16, #tpu.memory_space<any>> -> memref<32x64x128xbf16, #tpu.memory_space<any>>
    %c32_i32_218 = arith.constant 32 : i32
    %c0_i32_219 = arith.constant 0 : i32
    %c0_i32_220 = arith.constant 0 : i32
    %223 = tpu.memref_slice %arg8[%c32_i32_218, %c0_i32_219, %c0_i32_220] : memref<64x64x128xbf16, #tpu.memory_space<vmem>> -> memref<32x64x128xbf16, #tpu.memory_space<vmem>>
    %224 = tpu.memref_slice %arg9[%c1_i32_214] : memref<2x!tpu.dma_semaphore, #tpu.memory_space<semaphore_mem>> -> memref<1x!tpu.dma_semaphore, #tpu.memory_space<semaphore_mem>>
    %225 = tpu.memref_squeeze %224 : memref<1x!tpu.dma_semaphore, #tpu.memory_space<semaphore_mem>> -> memref<!tpu.dma_semaphore, #tpu.memory_space<semaphore_mem>>
    tpu.wait_dma2 semaphore(%225 : memref<!tpu.dma_semaphore, #tpu.memory_space<semaphore_mem>>) src(%222 : memref<32x64x128xbf16, #tpu.memory_space<any>>) dst(%223 : memref<32x64x128xbf16, #tpu.memory_space<vmem>>)
    %226 = vector.extract_strided_slice %52 {offsets = [32, 0], sizes = [1, 64], strides = [1, 1]} : vector<64x64xbf16> to vector<1x64xbf16>
    %c32 = arith.constant 32 : index
    %c0_221 = arith.constant 0 : index
    %c0_222 = arith.constant 0 : index
    %227 = vector.load %arg8[%c32, %c0_221, %c0_222] : memref<64x64x128xbf16, #tpu.memory_space<vmem>>, vector<1x64x128xbf16>
    %228 = vector.shape_cast %227 : vector<1x64x128xbf16> to vector<64x128xbf16>
    %cst_223 = arith.constant dense<0.000000e+00> : vector<1x128xf32>
    %229 = tpu.matmul %226, %228, %cst_223 {dimension_numbers = #tpu.dot_dimension_numbers<[1], [0], [0], [1], [0, 0, 1, 1], [], []>} : vector<1x64xbf16>, vector<64x128xbf16>, vector<1x128xf32> -> vector<1x128xf32>
    %c32_224 = arith.constant 32 : index
    %c0_225 = arith.constant 0 : index
    %230 = vector.load %arg10[%c32_224, %c0_225] : memref<64x128xf32, #tpu.memory_space<vmem>>, vector<1x128xf32>
    tpu.vector_store %arg10[%c32_224, %c0_225], %229 {strides = array<i32>} : memref<64x128xf32, #tpu.memory_space<vmem>>, vector<1x128xf32>,
    %231 = vector.extract_strided_slice %52 {offsets = [33, 0], sizes = [1, 64], strides = [1, 1]} : vector<64x64xbf16> to vector<1x64xbf16>
    %c33 = arith.constant 33 : index
    %c0_226 = arith.constant 0 : index
    %c0_227 = arith.constant 0 : index
    %232 = vector.load %arg8[%c33, %c0_226, %c0_227] : memref<64x64x128xbf16, #tpu.memory_space<vmem>>, vector<1x64x128xbf16>
    %233 = vector.shape_cast %232 : vector<1x64x128xbf16> to vector<64x128xbf16>
    %cst_228 = arith.constant dense<0.000000e+00> : vector<1x128xf32>
    %234 = tpu.matmul %231, %233, %cst_228 {dimension_numbers = #tpu.dot_dimension_numbers<[1], [0], [0], [1], [0, 0, 1, 1], [], []>} : vector<1x64xbf16>, vector<64x128xbf16>, vector<1x128xf32> -> vector<1x128xf32>
    %c33_229 = arith.constant 33 : index
    %c0_230 = arith.constant 0 : index
    %235 = vector.load %arg10[%c33_229, %c0_230] : memref<64x128xf32, #tpu.memory_space<vmem>>, vector<1x128xf32>
    tpu.vector_store %arg10[%c33_229, %c0_230], %234 {strides = array<i32>} : memref<64x128xf32, #tpu.memory_space<vmem>>, vector<1x128xf32>,
    %236 = vector.extract_strided_slice %52 {offsets = [34, 0], sizes = [1, 64], strides = [1, 1]} : vector<64x64xbf16> to vector<1x64xbf16>
    %c34 = arith.constant 34 : index
    %c0_231 = arith.constant 0 : index
    %c0_232 = arith.constant 0 : index
    %237 = vector.load %arg8[%c34, %c0_231, %c0_232] : memref<64x64x128xbf16, #tpu.memory_space<vmem>>, vector<1x64x128xbf16>
    %238 = vector.shape_cast %237 : vector<1x64x128xbf16> to vector<64x128xbf16>
    %cst_233 = arith.constant dense<0.000000e+00> : vector<1x128xf32>
    %239 = tpu.matmul %236, %238, %cst_233 {dimension_numbers = #tpu.dot_dimension_numbers<[1], [0], [0], [1], [0, 0, 1, 1], [], []>} : vector<1x64xbf16>, vector<64x128xbf16>, vector<1x128xf32> -> vector<1x128xf32>
    %c34_234 = arith.constant 34 : index
    %c0_235 = arith.constant 0 : index
    %240 = vector.load %arg10[%c34_234, %c0_235] : memref<64x128xf32, #tpu.memory_space<vmem>>, vector<1x128xf32>
    tpu.vector_store %arg10[%c34_234, %c0_235], %239 {strides = array<i32>} : memref<64x128xf32, #tpu.memory_space<vmem>>, vector<1x128xf32>,
    %241 = vector.extract_strided_slice %52 {offsets = [35, 0], sizes = [1, 64], strides = [1, 1]} : vector<64x64xbf16> to vector<1x64xbf16>
    %c35 = arith.constant 35 : index
    %c0_236 = arith.constant 0 : index
    %c0_237 = arith.constant 0 : index
    %242 = vector.load %arg8[%c35, %c0_236, %c0_237] : memref<64x64x128xbf16, #tpu.memory_space<vmem>>, vector<1x64x128xbf16>
    %243 = vector.shape_cast %242 : vector<1x64x128xbf16> to vector<64x128xbf16>
    %cst_238 = arith.constant dense<0.000000e+00> : vector<1x128xf32>
    %244 = tpu.matmul %241, %243, %cst_238 {dimension_numbers = #tpu.dot_dimension_numbers<[1], [0], [0], [1], [0, 0, 1, 1], [], []>} : vector<1x64xbf16>, vector<64x128xbf16>, vector<1x128xf32> -> vector<1x128xf32>
    %c35_239 = arith.constant 35 : index
    %c0_240 = arith.constant 0 : index
    %245 = vector.load %arg10[%c35_239, %c0_240] : memref<64x128xf32, #tpu.memory_space<vmem>>, vector<1x128xf32>
    tpu.vector_store %arg10[%c35_239, %c0_240], %244 {strides = array<i32>} : memref<64x128xf32, #tpu.memory_space<vmem>>, vector<1x128xf32>,
    %246 = vector.extract_strided_slice %52 {offsets = [36, 0], sizes = [1, 64], strides = [1, 1]} : vector<64x64xbf16> to vector<1x64xbf16>
    %c36 = arith.constant 36 : index
    %c0_241 = arith.constant 0 : index
    %c0_242 = arith.constant 0 : index
    %247 = vector.load %arg8[%c36, %c0_241, %c0_242] : memref<64x64x128xbf16, #tpu.memory_space<vmem>>, vector<1x64x128xbf16>
    %248 = vector.shape_cast %247 : vector<1x64x128xbf16> to vector<64x128xbf16>
    %cst_243 = arith.constant dense<0.000000e+00> : vector<1x128xf32>
    %249 = tpu.matmul %246, %248, %cst_243 {dimension_numbers = #tpu.dot_dimension_numbers<[1], [0], [0], [1], [0, 0, 1, 1], [], []>} : vector<1x64xbf16>, vector<64x128xbf16>, vector<1x128xf32> -> vector<1x128xf32>
    %c36_244 = arith.constant 36 : index
    %c0_245 = arith.constant 0 : index
    %250 = vector.load %arg10[%c36_244, %c0_245] : memref<64x128xf32, #tpu.memory_space<vmem>>, vector<1x128xf32>
    tpu.vector_store %arg10[%c36_244, %c0_245], %249 {strides = array<i32>} : memref<64x128xf32, #tpu.memory_space<vmem>>, vector<1x128xf32>,
    %251 = vector.extract_strided_slice %52 {offsets = [37, 0], sizes = [1, 64], strides = [1, 1]} : vector<64x64xbf16> to vector<1x64xbf16>
    %c37 = arith.constant 37 : index
    %c0_246 = arith.constant 0 : index
    %c0_247 = arith.constant 0 : index
    %252 = vector.load %arg8[%c37, %c0_246, %c0_247] : memref<64x64x128xbf16, #tpu.memory_space<vmem>>, vector<1x64x128xbf16>
    %253 = vector.shape_cast %252 : vector<1x64x128xbf16> to vector<64x128xbf16>
    %cst_248 = arith.constant dense<0.000000e+00> : vector<1x128xf32>
    %254 = tpu.matmul %251, %253, %cst_248 {dimension_numbers = #tpu.dot_dimension_numbers<[1], [0], [0], [1], [0, 0, 1, 1], [], []>} : vector<1x64xbf16>, vector<64x128xbf16>, vector<1x128xf32> -> vector<1x128xf32>
    %c37_249 = arith.constant 37 : index
    %c0_250 = arith.constant 0 : index
    %255 = vector.load %arg10[%c37_249, %c0_250] : memref<64x128xf32, #tpu.memory_space<vmem>>, vector<1x128xf32>
    tpu.vector_store %arg10[%c37_249, %c0_250], %254 {strides = array<i32>} : memref<64x128xf32, #tpu.memory_space<vmem>>, vector<1x128xf32>,
    %256 = vector.extract_strided_slice %52 {offsets = [38, 0], sizes = [1, 64], strides = [1, 1]} : vector<64x64xbf16> to vector<1x64xbf16>
    %c38 = arith.constant 38 : index
    %c0_251 = arith.constant 0 : index
    %c0_252 = arith.constant 0 : index
    %257 = vector.load %arg8[%c38, %c0_251, %c0_252] : memref<64x64x128xbf16, #tpu.memory_space<vmem>>, vector<1x64x128xbf16>
    %258 = vector.shape_cast %257 : vector<1x64x128xbf16> to vector<64x128xbf16>
    %cst_253 = arith.constant dense<0.000000e+00> : vector<1x128xf32>
    %259 = tpu.matmul %256, %258, %cst_253 {dimension_numbers = #tpu.dot_dimension_numbers<[1], [0], [0], [1], [0, 0, 1, 1], [], []>} : vector<1x64xbf16>, vector<64x128xbf16>, vector<1x128xf32> -> vector<1x128xf32>
    %c38_254 = arith.constant 38 : index
    %c0_255 = arith.constant 0 : index
    %260 = vector.load %arg10[%c38_254, %c0_255] : memref<64x128xf32, #tpu.memory_space<vmem>>, vector<1x128xf32>
    tpu.vector_store %arg10[%c38_254, %c0_255], %259 {strides = array<i32>} : memref<64x128xf32, #tpu.memory_space<vmem>>, vector<1x128xf32>,
    %261 = vector.extract_strided_slice %52 {offsets = [39, 0], sizes = [1, 64], strides = [1, 1]} : vector<64x64xbf16> to vector<1x64xbf16>
    %c39 = arith.constant 39 : index
    %c0_256 = arith.constant 0 : index
    %c0_257 = arith.constant 0 : index
    %262 = vector.load %arg8[%c39, %c0_256, %c0_257] : memref<64x64x128xbf16, #tpu.memory_space<vmem>>, vector<1x64x128xbf16>
    %263 = vector.shape_cast %262 : vector<1x64x128xbf16> to vector<64x128xbf16>
    %cst_258 = arith.constant dense<0.000000e+00> : vector<1x128xf32>
    %264 = tpu.matmul %261, %263, %cst_258 {dimension_numbers = #tpu.dot_dimension_numbers<[1], [0], [0], [1], [0, 0, 1, 1], [], []>} : vector<1x64xbf16>, vector<64x128xbf16>, vector<1x128xf32> -> vector<1x128xf32>
    %c39_259 = arith.constant 39 : index
    %c0_260 = arith.constant 0 : index
    %265 = vector.load %arg10[%c39_259, %c0_260] : memref<64x128xf32, #tpu.memory_space<vmem>>, vector<1x128xf32>
    tpu.vector_store %arg10[%c39_259, %c0_260], %264 {strides = array<i32>} : memref<64x128xf32, #tpu.memory_space<vmem>>, vector<1x128xf32>,
    %266 = vector.extract_strided_slice %52 {offsets = [40, 0], sizes = [1, 64], strides = [1, 1]} : vector<64x64xbf16> to vector<1x64xbf16>
    %c40 = arith.constant 40 : index
    %c0_261 = arith.constant 0 : index
    %c0_262 = arith.constant 0 : index
    %267 = vector.load %arg8[%c40, %c0_261, %c0_262] : memref<64x64x128xbf16, #tpu.memory_space<vmem>>, vector<1x64x128xbf16>
    %268 = vector.shape_cast %267 : vector<1x64x128xbf16> to vector<64x128xbf16>
    %cst_263 = arith.constant dense<0.000000e+00> : vector<1x128xf32>
    %269 = tpu.matmul %266, %268, %cst_263 {dimension_numbers = #tpu.dot_dimension_numbers<[1], [0], [0], [1], [0, 0, 1, 1], [], []>} : vector<1x64xbf16>, vector<64x128xbf16>, vector<1x128xf32> -> vector<1x128xf32>
    %c40_264 = arith.constant 40 : index
    %c0_265 = arith.constant 0 : index
    %270 = vector.load %arg10[%c40_264, %c0_265] : memref<64x128xf32, #tpu.memory_space<vmem>>, vector<1x128xf32>
    tpu.vector_store %arg10[%c40_264, %c0_265], %269 {strides = array<i32>} : memref<64x128xf32, #tpu.memory_space<vmem>>, vector<1x128xf32>,
    %271 = vector.extract_strided_slice %52 {offsets = [41, 0], sizes = [1, 64], strides = [1, 1]} : vector<64x64xbf16> to vector<1x64xbf16>
    %c41 = arith.constant 41 : index
    %c0_266 = arith.constant 0 : index
    %c0_267 = arith.constant 0 : index
    %272 = vector.load %arg8[%c41, %c0_266, %c0_267] : memref<64x64x128xbf16, #tpu.memory_space<vmem>>, vector<1x64x128xbf16>
    %273 = vector.shape_cast %272 : vector<1x64x128xbf16> to vector<64x128xbf16>
    %cst_268 = arith.constant dense<0.000000e+00> : vector<1x128xf32>
    %274 = tpu.matmul %271, %273, %cst_268 {dimension_numbers = #tpu.dot_dimension_numbers<[1], [0], [0], [1], [0, 0, 1, 1], [], []>} : vector<1x64xbf16>, vector<64x128xbf16>, vector<1x128xf32> -> vector<1x128xf32>
    %c41_269 = arith.constant 41 : index
    %c0_270 = arith.constant 0 : index
    %275 = vector.load %arg10[%c41_269, %c0_270] : memref<64x128xf32, #tpu.memory_space<vmem>>, vector<1x128xf32>
    tpu.vector_store %arg10[%c41_269, %c0_270], %274 {strides = array<i32>} : memref<64x128xf32, #tpu.memory_space<vmem>>, vector<1x128xf32>,
    %276 = vector.extract_strided_slice %52 {offsets = [42, 0], sizes = [1, 64], strides = [1, 1]} : vector<64x64xbf16> to vector<1x64xbf16>
    %c42 = arith.constant 42 : index
    %c0_271 = arith.constant 0 : index
    %c0_272 = arith.constant 0 : index
    %277 = vector.load %arg8[%c42, %c0_271, %c0_272] : memref<64x64x128xbf16, #tpu.memory_space<vmem>>, vector<1x64x128xbf16>
    %278 = vector.shape_cast %277 : vector<1x64x128xbf16> to vector<64x128xbf16>
    %cst_273 = arith.constant dense<0.000000e+00> : vector<1x128xf32>
    %279 = tpu.matmul %276, %278, %cst_273 {dimension_numbers = #tpu.dot_dimension_numbers<[1], [0], [0], [1], [0, 0, 1, 1], [], []>} : vector<1x64xbf16>, vector<64x128xbf16>, vector<1x128xf32> -> vector<1x128xf32>
    %c42_274 = arith.constant 42 : index
    %c0_275 = arith.constant 0 : index
    %280 = vector.load %arg10[%c42_274, %c0_275] : memref<64x128xf32, #tpu.memory_space<vmem>>, vector<1x128xf32>
    tpu.vector_store %arg10[%c42_274, %c0_275], %279 {strides = array<i32>} : memref<64x128xf32, #tpu.memory_space<vmem>>, vector<1x128xf32>,
    %281 = vector.extract_strided_slice %52 {offsets = [43, 0], sizes = [1, 64], strides = [1, 1]} : vector<64x64xbf16> to vector<1x64xbf16>
    %c43 = arith.constant 43 : index
    %c0_276 = arith.constant 0 : index
    %c0_277 = arith.constant 0 : index
    %282 = vector.load %arg8[%c43, %c0_276, %c0_277] : memref<64x64x128xbf16, #tpu.memory_space<vmem>>, vector<1x64x128xbf16>
    %283 = vector.shape_cast %282 : vector<1x64x128xbf16> to vector<64x128xbf16>
    %cst_278 = arith.constant dense<0.000000e+00> : vector<1x128xf32>
    %284 = tpu.matmul %281, %283, %cst_278 {dimension_numbers = #tpu.dot_dimension_numbers<[1], [0], [0], [1], [0, 0, 1, 1], [], []>} : vector<1x64xbf16>, vector<64x128xbf16>, vector<1x128xf32> -> vector<1x128xf32>
    %c43_279 = arith.constant 43 : index
    %c0_280 = arith.constant 0 : index
    %285 = vector.load %arg10[%c43_279, %c0_280] : memref<64x128xf32, #tpu.memory_space<vmem>>, vector<1x128xf32>
    tpu.vector_store %arg10[%c43_279, %c0_280], %284 {strides = array<i32>} : memref<64x128xf32, #tpu.memory_space<vmem>>, vector<1x128xf32>,
    %286 = vector.extract_strided_slice %52 {offsets = [44, 0], sizes = [1, 64], strides = [1, 1]} : vector<64x64xbf16> to vector<1x64xbf16>
    %c44 = arith.constant 44 : index
    %c0_281 = arith.constant 0 : index
    %c0_282 = arith.constant 0 : index
    %287 = vector.load %arg8[%c44, %c0_281, %c0_282] : memref<64x64x128xbf16, #tpu.memory_space<vmem>>, vector<1x64x128xbf16>
    %288 = vector.shape_cast %287 : vector<1x64x128xbf16> to vector<64x128xbf16>
    %cst_283 = arith.constant dense<0.000000e+00> : vector<1x128xf32>
    %289 = tpu.matmul %286, %288, %cst_283 {dimension_numbers = #tpu.dot_dimension_numbers<[1], [0], [0], [1], [0, 0, 1, 1], [], []>} : vector<1x64xbf16>, vector<64x128xbf16>, vector<1x128xf32> -> vector<1x128xf32>
    %c44_284 = arith.constant 44 : index
    %c0_285 = arith.constant 0 : index
    %290 = vector.load %arg10[%c44_284, %c0_285] : memref<64x128xf32, #tpu.memory_space<vmem>>, vector<1x128xf32>
    tpu.vector_store %arg10[%c44_284, %c0_285], %289 {strides = array<i32>} : memref<64x128xf32, #tpu.memory_space<vmem>>, vector<1x128xf32>,
    %291 = vector.extract_strided_slice %52 {offsets = [45, 0], sizes = [1, 64], strides = [1, 1]} : vector<64x64xbf16> to vector<1x64xbf16>
    %c45 = arith.constant 45 : index
    %c0_286 = arith.constant 0 : index
    %c0_287 = arith.constant 0 : index
    %292 = vector.load %arg8[%c45, %c0_286, %c0_287] : memref<64x64x128xbf16, #tpu.memory_space<vmem>>, vector<1x64x128xbf16>
    %293 = vector.shape_cast %292 : vector<1x64x128xbf16> to vector<64x128xbf16>
    %cst_288 = arith.constant dense<0.000000e+00> : vector<1x128xf32>
    %294 = tpu.matmul %291, %293, %cst_288 {dimension_numbers = #tpu.dot_dimension_numbers<[1], [0], [0], [1], [0, 0, 1, 1], [], []>} : vector<1x64xbf16>, vector<64x128xbf16>, vector<1x128xf32> -> vector<1x128xf32>
    %c45_289 = arith.constant 45 : index
    %c0_290 = arith.constant 0 : index
    %295 = vector.load %arg10[%c45_289, %c0_290] : memref<64x128xf32, #tpu.memory_space<vmem>>, vector<1x128xf32>
    tpu.vector_store %arg10[%c45_289, %c0_290], %294 {strides = array<i32>} : memref<64x128xf32, #tpu.memory_space<vmem>>, vector<1x128xf32>,
    %296 = vector.extract_strided_slice %52 {offsets = [46, 0], sizes = [1, 64], strides = [1, 1]} : vector<64x64xbf16> to vector<1x64xbf16>
    %c46 = arith.constant 46 : index
    %c0_291 = arith.constant 0 : index
    %c0_292 = arith.constant 0 : index
    %297 = vector.load %arg8[%c46, %c0_291, %c0_292] : memref<64x64x128xbf16, #tpu.memory_space<vmem>>, vector<1x64x128xbf16>
    %298 = vector.shape_cast %297 : vector<1x64x128xbf16> to vector<64x128xbf16>
    %cst_293 = arith.constant dense<0.000000e+00> : vector<1x128xf32>
    %299 = tpu.matmul %296, %298, %cst_293 {dimension_numbers = #tpu.dot_dimension_numbers<[1], [0], [0], [1], [0, 0, 1, 1], [], []>} : vector<1x64xbf16>, vector<64x128xbf16>, vector<1x128xf32> -> vector<1x128xf32>
    %c46_294 = arith.constant 46 : index
    %c0_295 = arith.constant 0 : index
    %300 = vector.load %arg10[%c46_294, %c0_295] : memref<64x128xf32, #tpu.memory_space<vmem>>, vector<1x128xf32>
    tpu.vector_store %arg10[%c46_294, %c0_295], %299 {strides = array<i32>} : memref<64x128xf32, #tpu.memory_space<vmem>>, vector<1x128xf32>,
    %301 = vector.extract_strided_slice %52 {offsets = [47, 0], sizes = [1, 64], strides = [1, 1]} : vector<64x64xbf16> to vector<1x64xbf16>
    %c47 = arith.constant 47 : index
    %c0_296 = arith.constant 0 : index
    %c0_297 = arith.constant 0 : index
    %302 = vector.load %arg8[%c47, %c0_296, %c0_297] : memref<64x64x128xbf16, #tpu.memory_space<vmem>>, vector<1x64x128xbf16>
    %303 = vector.shape_cast %302 : vector<1x64x128xbf16> to vector<64x128xbf16>
    %cst_298 = arith.constant dense<0.000000e+00> : vector<1x128xf32>
    %304 = tpu.matmul %301, %303, %cst_298 {dimension_numbers = #tpu.dot_dimension_numbers<[1], [0], [0], [1], [0, 0, 1, 1], [], []>} : vector<1x64xbf16>, vector<64x128xbf16>, vector<1x128xf32> -> vector<1x128xf32>
    %c47_299 = arith.constant 47 : index
    %c0_300 = arith.constant 0 : index
    %305 = vector.load %arg10[%c47_299, %c0_300] : memref<64x128xf32, #tpu.memory_space<vmem>>, vector<1x128xf32>
    tpu.vector_store %arg10[%c47_299, %c0_300], %304 {strides = array<i32>} : memref<64x128xf32, #tpu.memory_space<vmem>>, vector<1x128xf32>,
    %306 = vector.extract_strided_slice %52 {offsets = [48, 0], sizes = [1, 64], strides = [1, 1]} : vector<64x64xbf16> to vector<1x64xbf16>
    %c48 = arith.constant 48 : index
    %c0_301 = arith.constant 0 : index
    %c0_302 = arith.constant 0 : index
    %307 = vector.load %arg8[%c48, %c0_301, %c0_302] : memref<64x64x128xbf16, #tpu.memory_space<vmem>>, vector<1x64x128xbf16>
    %308 = vector.shape_cast %307 : vector<1x64x128xbf16> to vector<64x128xbf16>
    %cst_303 = arith.constant dense<0.000000e+00> : vector<1x128xf32>
    %309 = tpu.matmul %306, %308, %cst_303 {dimension_numbers = #tpu.dot_dimension_numbers<[1], [0], [0], [1], [0, 0, 1, 1], [], []>} : vector<1x64xbf16>, vector<64x128xbf16>, vector<1x128xf32> -> vector<1x128xf32>
    %c48_304 = arith.constant 48 : index
    %c0_305 = arith.constant 0 : index
    %310 = vector.load %arg10[%c48_304, %c0_305] : memref<64x128xf32, #tpu.memory_space<vmem>>, vector<1x128xf32>
    tpu.vector_store %arg10[%c48_304, %c0_305], %309 {strides = array<i32>} : memref<64x128xf32, #tpu.memory_space<vmem>>, vector<1x128xf32>,
    %311 = vector.extract_strided_slice %52 {offsets = [49, 0], sizes = [1, 64], strides = [1, 1]} : vector<64x64xbf16> to vector<1x64xbf16>
    %c49 = arith.constant 49 : index
    %c0_306 = arith.constant 0 : index
    %c0_307 = arith.constant 0 : index
    %312 = vector.load %arg8[%c49, %c0_306, %c0_307] : memref<64x64x128xbf16, #tpu.memory_space<vmem>>, vector<1x64x128xbf16>
    %313 = vector.shape_cast %312 : vector<1x64x128xbf16> to vector<64x128xbf16>
    %cst_308 = arith.constant dense<0.000000e+00> : vector<1x128xf32>
    %314 = tpu.matmul %311, %313, %cst_308 {dimension_numbers = #tpu.dot_dimension_numbers<[1], [0], [0], [1], [0, 0, 1, 1], [], []>} : vector<1x64xbf16>, vector<64x128xbf16>, vector<1x128xf32> -> vector<1x128xf32>
    %c49_309 = arith.constant 49 : index
    %c0_310 = arith.constant 0 : index
    %315 = vector.load %arg10[%c49_309, %c0_310] : memref<64x128xf32, #tpu.memory_space<vmem>>, vector<1x128xf32>
    tpu.vector_store %arg10[%c49_309, %c0_310], %314 {strides = array<i32>} : memref<64x128xf32, #tpu.memory_space<vmem>>, vector<1x128xf32>,
    %316 = vector.extract_strided_slice %52 {offsets = [50, 0], sizes = [1, 64], strides = [1, 1]} : vector<64x64xbf16> to vector<1x64xbf16>
    %c50 = arith.constant 50 : index
    %c0_311 = arith.constant 0 : index
    %c0_312 = arith.constant 0 : index
    %317 = vector.load %arg8[%c50, %c0_311, %c0_312] : memref<64x64x128xbf16, #tpu.memory_space<vmem>>, vector<1x64x128xbf16>
    %318 = vector.shape_cast %317 : vector<1x64x128xbf16> to vector<64x128xbf16>
    %cst_313 = arith.constant dense<0.000000e+00> : vector<1x128xf32>
    %319 = tpu.matmul %316, %318, %cst_313 {dimension_numbers = #tpu.dot_dimension_numbers<[1], [0], [0], [1], [0, 0, 1, 1], [], []>} : vector<1x64xbf16>, vector<64x128xbf16>, vector<1x128xf32> -> vector<1x128xf32>
    %c50_314 = arith.constant 50 : index
    %c0_315 = arith.constant 0 : index
    %320 = vector.load %arg10[%c50_314, %c0_315] : memref<64x128xf32, #tpu.memory_space<vmem>>, vector<1x128xf32>
    tpu.vector_store %arg10[%c50_314, %c0_315], %319 {strides = array<i32>} : memref<64x128xf32, #tpu.memory_space<vmem>>, vector<1x128xf32>,
    %321 = vector.extract_strided_slice %52 {offsets = [51, 0], sizes = [1, 64], strides = [1, 1]} : vector<64x64xbf16> to vector<1x64xbf16>
    %c51 = arith.constant 51 : index
    %c0_316 = arith.constant 0 : index
    %c0_317 = arith.constant 0 : index
    %322 = vector.load %arg8[%c51, %c0_316, %c0_317] : memref<64x64x128xbf16, #tpu.memory_space<vmem>>, vector<1x64x128xbf16>
    %323 = vector.shape_cast %322 : vector<1x64x128xbf16> to vector<64x128xbf16>
    %cst_318 = arith.constant dense<0.000000e+00> : vector<1x128xf32>
    %324 = tpu.matmul %321, %323, %cst_318 {dimension_numbers = #tpu.dot_dimension_numbers<[1], [0], [0], [1], [0, 0, 1, 1], [], []>} : vector<1x64xbf16>, vector<64x128xbf16>, vector<1x128xf32> -> vector<1x128xf32>
    %c51_319 = arith.constant 51 : index
    %c0_320 = arith.constant 0 : index
    %325 = vector.load %arg10[%c51_319, %c0_320] : memref<64x128xf32, #tpu.memory_space<vmem>>, vector<1x128xf32>
    tpu.vector_store %arg10[%c51_319, %c0_320], %324 {strides = array<i32>} : memref<64x128xf32, #tpu.memory_space<vmem>>, vector<1x128xf32>,
    %326 = vector.extract_strided_slice %52 {offsets = [52, 0], sizes = [1, 64], strides = [1, 1]} : vector<64x64xbf16> to vector<1x64xbf16>
    %c52 = arith.constant 52 : index
    %c0_321 = arith.constant 0 : index
    %c0_322 = arith.constant 0 : index
    %327 = vector.load %arg8[%c52, %c0_321, %c0_322] : memref<64x64x128xbf16, #tpu.memory_space<vmem>>, vector<1x64x128xbf16>
    %328 = vector.shape_cast %327 : vector<1x64x128xbf16> to vector<64x128xbf16>
    %cst_323 = arith.constant dense<0.000000e+00> : vector<1x128xf32>
    %329 = tpu.matmul %326, %328, %cst_323 {dimension_numbers = #tpu.dot_dimension_numbers<[1], [0], [0], [1], [0, 0, 1, 1], [], []>} : vector<1x64xbf16>, vector<64x128xbf16>, vector<1x128xf32> -> vector<1x128xf32>
    %c52_324 = arith.constant 52 : index
    %c0_325 = arith.constant 0 : index
    %330 = vector.load %arg10[%c52_324, %c0_325] : memref<64x128xf32, #tpu.memory_space<vmem>>, vector<1x128xf32>
    tpu.vector_store %arg10[%c52_324, %c0_325], %329 {strides = array<i32>} : memref<64x128xf32, #tpu.memory_space<vmem>>, vector<1x128xf32>,
    %331 = vector.extract_strided_slice %52 {offsets = [53, 0], sizes = [1, 64], strides = [1, 1]} : vector<64x64xbf16> to vector<1x64xbf16>
    %c53 = arith.constant 53 : index
    %c0_326 = arith.constant 0 : index
    %c0_327 = arith.constant 0 : index
    %332 = vector.load %arg8[%c53, %c0_326, %c0_327] : memref<64x64x128xbf16, #tpu.memory_space<vmem>>, vector<1x64x128xbf16>
    %333 = vector.shape_cast %332 : vector<1x64x128xbf16> to vector<64x128xbf16>
    %cst_328 = arith.constant dense<0.000000e+00> : vector<1x128xf32>
    %334 = tpu.matmul %331, %333, %cst_328 {dimension_numbers = #tpu.dot_dimension_numbers<[1], [0], [0], [1], [0, 0, 1, 1], [], []>} : vector<1x64xbf16>, vector<64x128xbf16>, vector<1x128xf32> -> vector<1x128xf32>
    %c53_329 = arith.constant 53 : index
    %c0_330 = arith.constant 0 : index
    %335 = vector.load %arg10[%c53_329, %c0_330] : memref<64x128xf32, #tpu.memory_space<vmem>>, vector<1x128xf32>
    tpu.vector_store %arg10[%c53_329, %c0_330], %334 {strides = array<i32>} : memref<64x128xf32, #tpu.memory_space<vmem>>, vector<1x128xf32>,
    %336 = vector.extract_strided_slice %52 {offsets = [54, 0], sizes = [1, 64], strides = [1, 1]} : vector<64x64xbf16> to vector<1x64xbf16>
    %c54 = arith.constant 54 : index
    %c0_331 = arith.constant 0 : index
    %c0_332 = arith.constant 0 : index
    %337 = vector.load %arg8[%c54, %c0_331, %c0_332] : memref<64x64x128xbf16, #tpu.memory_space<vmem>>, vector<1x64x128xbf16>
    %338 = vector.shape_cast %337 : vector<1x64x128xbf16> to vector<64x128xbf16>
    %cst_333 = arith.constant dense<0.000000e+00> : vector<1x128xf32>
    %339 = tpu.matmul %336, %338, %cst_333 {dimension_numbers = #tpu.dot_dimension_numbers<[1], [0], [0], [1], [0, 0, 1, 1], [], []>} : vector<1x64xbf16>, vector<64x128xbf16>, vector<1x128xf32> -> vector<1x128xf32>
    %c54_334 = arith.constant 54 : index
    %c0_335 = arith.constant 0 : index
    %340 = vector.load %arg10[%c54_334, %c0_335] : memref<64x128xf32, #tpu.memory_space<vmem>>, vector<1x128xf32>
    tpu.vector_store %arg10[%c54_334, %c0_335], %339 {strides = array<i32>} : memref<64x128xf32, #tpu.memory_space<vmem>>, vector<1x128xf32>,
    %341 = vector.extract_strided_slice %52 {offsets = [55, 0], sizes = [1, 64], strides = [1, 1]} : vector<64x64xbf16> to vector<1x64xbf16>
    %c55 = arith.constant 55 : index
    %c0_336 = arith.constant 0 : index
    %c0_337 = arith.constant 0 : index
    %342 = vector.load %arg8[%c55, %c0_336, %c0_337] : memref<64x64x128xbf16, #tpu.memory_space<vmem>>, vector<1x64x128xbf16>
    %343 = vector.shape_cast %342 : vector<1x64x128xbf16> to vector<64x128xbf16>
    %cst_338 = arith.constant dense<0.000000e+00> : vector<1x128xf32>
    %344 = tpu.matmul %341, %343, %cst_338 {dimension_numbers = #tpu.dot_dimension_numbers<[1], [0], [0], [1], [0, 0, 1, 1], [], []>} : vector<1x64xbf16>, vector<64x128xbf16>, vector<1x128xf32> -> vector<1x128xf32>
    %c55_339 = arith.constant 55 : index
    %c0_340 = arith.constant 0 : index
    %345 = vector.load %arg10[%c55_339, %c0_340] : memref<64x128xf32, #tpu.memory_space<vmem>>, vector<1x128xf32>
    tpu.vector_store %arg10[%c55_339, %c0_340], %344 {strides = array<i32>} : memref<64x128xf32, #tpu.memory_space<vmem>>, vector<1x128xf32>,
    %346 = vector.extract_strided_slice %52 {offsets = [56, 0], sizes = [1, 64], strides = [1, 1]} : vector<64x64xbf16> to vector<1x64xbf16>
    %c56 = arith.constant 56 : index
    %c0_341 = arith.constant 0 : index
    %c0_342 = arith.constant 0 : index
    %347 = vector.load %arg8[%c56, %c0_341, %c0_342] : memref<64x64x128xbf16, #tpu.memory_space<vmem>>, vector<1x64x128xbf16>
    %348 = vector.shape_cast %347 : vector<1x64x128xbf16> to vector<64x128xbf16>
    %cst_343 = arith.constant dense<0.000000e+00> : vector<1x128xf32>
    %349 = tpu.matmul %346, %348, %cst_343 {dimension_numbers = #tpu.dot_dimension_numbers<[1], [0], [0], [1], [0, 0, 1, 1], [], []>} : vector<1x64xbf16>, vector<64x128xbf16>, vector<1x128xf32> -> vector<1x128xf32>
    %c56_344 = arith.constant 56 : index
    %c0_345 = arith.constant 0 : index
    %350 = vector.load %arg10[%c56_344, %c0_345] : memref<64x128xf32, #tpu.memory_space<vmem>>, vector<1x128xf32>
    tpu.vector_store %arg10[%c56_344, %c0_345], %349 {strides = array<i32>} : memref<64x128xf32, #tpu.memory_space<vmem>>, vector<1x128xf32>,
    %351 = vector.extract_strided_slice %52 {offsets = [57, 0], sizes = [1, 64], strides = [1, 1]} : vector<64x64xbf16> to vector<1x64xbf16>
    %c57 = arith.constant 57 : index
    %c0_346 = arith.constant 0 : index
    %c0_347 = arith.constant 0 : index
    %352 = vector.load %arg8[%c57, %c0_346, %c0_347] : memref<64x64x128xbf16, #tpu.memory_space<vmem>>, vector<1x64x128xbf16>
    %353 = vector.shape_cast %352 : vector<1x64x128xbf16> to vector<64x128xbf16>
    %cst_348 = arith.constant dense<0.000000e+00> : vector<1x128xf32>
    %354 = tpu.matmul %351, %353, %cst_348 {dimension_numbers = #tpu.dot_dimension_numbers<[1], [0], [0], [1], [0, 0, 1, 1], [], []>} : vector<1x64xbf16>, vector<64x128xbf16>, vector<1x128xf32> -> vector<1x128xf32>
    %c57_349 = arith.constant 57 : index
    %c0_350 = arith.constant 0 : index
    %355 = vector.load %arg10[%c57_349, %c0_350] : memref<64x128xf32, #tpu.memory_space<vmem>>, vector<1x128xf32>
    tpu.vector_store %arg10[%c57_349, %c0_350], %354 {strides = array<i32>} : memref<64x128xf32, #tpu.memory_space<vmem>>, vector<1x128xf32>,
    %356 = vector.extract_strided_slice %52 {offsets = [58, 0], sizes = [1, 64], strides = [1, 1]} : vector<64x64xbf16> to vector<1x64xbf16>
    %c58 = arith.constant 58 : index
    %c0_351 = arith.constant 0 : index
    %c0_352 = arith.constant 0 : index
    %357 = vector.load %arg8[%c58, %c0_351, %c0_352] : memref<64x64x128xbf16, #tpu.memory_space<vmem>>, vector<1x64x128xbf16>
    %358 = vector.shape_cast %357 : vector<1x64x128xbf16> to vector<64x128xbf16>
    %cst_353 = arith.constant dense<0.000000e+00> : vector<1x128xf32>
    %359 = tpu.matmul %356, %358, %cst_353 {dimension_numbers = #tpu.dot_dimension_numbers<[1], [0], [0], [1], [0, 0, 1, 1], [], []>} : vector<1x64xbf16>, vector<64x128xbf16>, vector<1x128xf32> -> vector<1x128xf32>
    %c58_354 = arith.constant 58 : index
    %c0_355 = arith.constant 0 : index
    %360 = vector.load %arg10[%c58_354, %c0_355] : memref<64x128xf32, #tpu.memory_space<vmem>>, vector<1x128xf32>
    tpu.vector_store %arg10[%c58_354, %c0_355], %359 {strides = array<i32>} : memref<64x128xf32, #tpu.memory_space<vmem>>, vector<1x128xf32>,
    %361 = vector.extract_strided_slice %52 {offsets = [59, 0], sizes = [1, 64], strides = [1, 1]} : vector<64x64xbf16> to vector<1x64xbf16>
    %c59 = arith.constant 59 : index
    %c0_356 = arith.constant 0 : index
    %c0_357 = arith.constant 0 : index
    %362 = vector.load %arg8[%c59, %c0_356, %c0_357] : memref<64x64x128xbf16, #tpu.memory_space<vmem>>, vector<1x64x128xbf16>
    %363 = vector.shape_cast %362 : vector<1x64x128xbf16> to vector<64x128xbf16>
    %cst_358 = arith.constant dense<0.000000e+00> : vector<1x128xf32>
    %364 = tpu.matmul %361, %363, %cst_358 {dimension_numbers = #tpu.dot_dimension_numbers<[1], [0], [0], [1], [0, 0, 1, 1], [], []>} : vector<1x64xbf16>, vector<64x128xbf16>, vector<1x128xf32> -> vector<1x128xf32>
    %c59_359 = arith.constant 59 : index
    %c0_360 = arith.constant 0 : index
    %365 = vector.load %arg10[%c59_359, %c0_360] : memref<64x128xf32, #tpu.memory_space<vmem>>, vector<1x128xf32>
    tpu.vector_store %arg10[%c59_359, %c0_360], %364 {strides = array<i32>} : memref<64x128xf32, #tpu.memory_space<vmem>>, vector<1x128xf32>,
    %366 = vector.extract_strided_slice %52 {offsets = [60, 0], sizes = [1, 64], strides = [1, 1]} : vector<64x64xbf16> to vector<1x64xbf16>
    %c60 = arith.constant 60 : index
    %c0_361 = arith.constant 0 : index
    %c0_362 = arith.constant 0 : index
    %367 = vector.load %arg8[%c60, %c0_361, %c0_362] : memref<64x64x128xbf16, #tpu.memory_space<vmem>>, vector<1x64x128xbf16>
    %368 = vector.shape_cast %367 : vector<1x64x128xbf16> to vector<64x128xbf16>
    %cst_363 = arith.constant dense<0.000000e+00> : vector<1x128xf32>
    %369 = tpu.matmul %366, %368, %cst_363 {dimension_numbers = #tpu.dot_dimension_numbers<[1], [0], [0], [1], [0, 0, 1, 1], [], []>} : vector<1x64xbf16>, vector<64x128xbf16>, vector<1x128xf32> -> vector<1x128xf32>
    %c60_364 = arith.constant 60 : index
    %c0_365 = arith.constant 0 : index
    %370 = vector.load %arg10[%c60_364, %c0_365] : memref<64x128xf32, #tpu.memory_space<vmem>>, vector<1x128xf32>
    tpu.vector_store %arg10[%c60_364, %c0_365], %369 {strides = array<i32>} : memref<64x128xf32, #tpu.memory_space<vmem>>, vector<1x128xf32>,
    %371 = vector.extract_strided_slice %52 {offsets = [61, 0], sizes = [1, 64], strides = [1, 1]} : vector<64x64xbf16> to vector<1x64xbf16>
    %c61 = arith.constant 61 : index
    %c0_366 = arith.constant 0 : index
    %c0_367 = arith.constant 0 : index
    %372 = vector.load %arg8[%c61, %c0_366, %c0_367] : memref<64x64x128xbf16, #tpu.memory_space<vmem>>, vector<1x64x128xbf16>
    %373 = vector.shape_cast %372 : vector<1x64x128xbf16> to vector<64x128xbf16>
    %cst_368 = arith.constant dense<0.000000e+00> : vector<1x128xf32>
    %374 = tpu.matmul %371, %373, %cst_368 {dimension_numbers = #tpu.dot_dimension_numbers<[1], [0], [0], [1], [0, 0, 1, 1], [], []>} : vector<1x64xbf16>, vector<64x128xbf16>, vector<1x128xf32> -> vector<1x128xf32>
    %c61_369 = arith.constant 61 : index
    %c0_370 = arith.constant 0 : index
    %375 = vector.load %arg10[%c61_369, %c0_370] : memref<64x128xf32, #tpu.memory_space<vmem>>, vector<1x128xf32>
    tpu.vector_store %arg10[%c61_369, %c0_370], %374 {strides = array<i32>} : memref<64x128xf32, #tpu.memory_space<vmem>>, vector<1x128xf32>,
    %376 = vector.extract_strided_slice %52 {offsets = [62, 0], sizes = [1, 64], strides = [1, 1]} : vector<64x64xbf16> to vector<1x64xbf16>
    %c62 = arith.constant 62 : index
    %c0_371 = arith.constant 0 : index
    %c0_372 = arith.constant 0 : index
    %377 = vector.load %arg8[%c62, %c0_371, %c0_372] : memref<64x64x128xbf16, #tpu.memory_space<vmem>>, vector<1x64x128xbf16>
    %378 = vector.shape_cast %377 : vector<1x64x128xbf16> to vector<64x128xbf16>
    %cst_373 = arith.constant dense<0.000000e+00> : vector<1x128xf32>
    %379 = tpu.matmul %376, %378, %cst_373 {dimension_numbers = #tpu.dot_dimension_numbers<[1], [0], [0], [1], [0, 0, 1, 1], [], []>} : vector<1x64xbf16>, vector<64x128xbf16>, vector<1x128xf32> -> vector<1x128xf32>
    %c62_374 = arith.constant 62 : index
    %c0_375 = arith.constant 0 : index
    %380 = vector.load %arg10[%c62_374, %c0_375] : memref<64x128xf32, #tpu.memory_space<vmem>>, vector<1x128xf32>
    tpu.vector_store %arg10[%c62_374, %c0_375], %379 {strides = array<i32>} : memref<64x128xf32, #tpu.memory_space<vmem>>, vector<1x128xf32>,
    %381 = vector.extract_strided_slice %52 {offsets = [63, 0], sizes = [1, 64], strides = [1, 1]} : vector<64x64xbf16> to vector<1x64xbf16>
    %c63 = arith.constant 63 : index
    %c0_376 = arith.constant 0 : index
    %c0_377 = arith.constant 0 : index
    %382 = vector.load %arg8[%c63, %c0_376, %c0_377] : memref<64x64x128xbf16, #tpu.memory_space<vmem>>, vector<1x64x128xbf16>
    %383 = vector.shape_cast %382 : vector<1x64x128xbf16> to vector<64x128xbf16>
    %cst_378 = arith.constant dense<0.000000e+00> : vector<1x128xf32>
    %384 = tpu.matmul %381, %383, %cst_378 {dimension_numbers = #tpu.dot_dimension_numbers<[1], [0], [0], [1], [0, 0, 1, 1], [], []>} : vector<1x64xbf16>, vector<64x128xbf16>, vector<1x128xf32> -> vector<1x128xf32>
    %c63_379 = arith.constant 63 : index
    %c0_380 = arith.constant 0 : index
    %385 = vector.load %arg10[%c63_379, %c0_380] : memref<64x128xf32, #tpu.memory_space<vmem>>, vector<1x128xf32>
    tpu.vector_store %arg10[%c63_379, %c0_380], %384 {strides = array<i32>} : memref<64x128xf32, #tpu.memory_space<vmem>>, vector<1x128xf32>,
    %c0_381 = arith.constant 0 : index
    %c0_382 = arith.constant 0 : index
    %386 = vector.load %arg10[%c0_381, %c0_382] : memref<64x128xf32, #tpu.memory_space<vmem>>, vector<64x128xf32>
    %cst_383 = arith.constant dense<0.000000e+00> : vector<128xf32>
    %387 = vector.multi_reduction <add>, %386, %cst_383 [0] : vector<64x128xf32> to vector<128xf32>
    %388 = vector.shape_cast %387 : vector<128xf32> to vector<1x128xf32>
    %389 = arith.addf %57, %388 : vector<1x128xf32>
    %390 = arith.negf %389 : vector<1x128xf32>
    %391 = math.exp %390 : vector<1x128xf32>
    %cst_384 = arith.constant 1.000000e+00 : f32
    %392 = vector.broadcast %cst_384 : f32 to vector<1x128xf32>
    %393 = arith.addf %392, %391 : vector<1x128xf32>
    %394 = arith.divf %392, %393 : vector<1x128xf32>
    %395 = math.tanh %389 : vector<1x128xf32>
    %396 = vector.extract_strided_slice %394 {offsets = [0, 0], sizes = [1, 32], strides = [1, 1]} : vector<1x128xf32> to vector<1x32xf32>
    %397 = vector.extract_strided_slice %394 {offsets = [0, 32], sizes = [1, 32], strides = [1, 1]} : vector<1x128xf32> to vector<1x32xf32>
    %398 = vector.extract_strided_slice %395 {offsets = [0, 64], sizes = [1, 32], strides = [1, 1]} : vector<1x128xf32> to vector<1x32xf32>
    %399 = vector.extract_strided_slice %394 {offsets = [0, 96], sizes = [1, 32], strides = [1, 1]} : vector<1x128xf32> to vector<1x32xf32>
    %c0_385 = arith.constant 0 : index
    %c0_386 = arith.constant 0 : index
    %400 = vector.load %arg4[%c0_385, %c0_386] : memref<1x32xf32, #tpu.memory_space<vmem>>, vector<1x32xf32>
    %401 = arith.mulf %397, %400 : vector<1x32xf32>
    %402 = arith.mulf %396, %398 : vector<1x32xf32>
    %403 = arith.addf %401, %402 : vector<1x32xf32>
    %404 = math.tanh %403 : vector<1x32xf32>
    %405 = arith.mulf %399, %404 : vector<1x32xf32>
    %c272 = arith.constant 272 : index
    %c0_387 = arith.constant 0 : index
    %406 = vector.load %arg5[%c272, %c0_387] : memref<376x128xf32, #tpu.memory_space<vmem>>, vector<32x64xf32>
    %c304 = arith.constant 304 : index
    %c0_388 = arith.constant 0 : index
    %407 = vector.load %arg5[%c304, %c0_388] : memref<376x128xf32, #tpu.memory_space<vmem>>, vector<1x64xf32>
    %cst_389 = arith.constant dense<0.000000e+00> : vector<1x64xf32>
    %408 = tpu.matmul %405, %406, %cst_389 {dimension_numbers = #tpu.dot_dimension_numbers<[1], [0], [0], [1], [0, 0, 1, 1], [], []>} : vector<1x32xf32>, vector<32x64xf32>, vector<1x64xf32> -> vector<1x64xf32>
    %409 = arith.addf %408, %407 : vector<1x64xf32>
    %410 = tpu.concatenate %405, %403, %409 in 1 : vector<1x32xf32>, vector<1x32xf32>, vector<1x64xf32> -> vector<1x128xf32>
    %cst_390 = arith.constant 0.000000e+00 : f32
    %411 = vector.broadcast %cst_390 : f32 to vector<7x128xf32>
    %412 = tpu.concatenate %410, %411 in 0 : vector<1x128xf32>, vector<7x128xf32> -> vector<8x128xf32>
    %c64_391 = arith.constant 64 : index
    %c0_392 = arith.constant 0 : index
    %413 = vector.load %arg7[%c64_391, %c0_392] : memref<72x128xf32, #tpu.memory_space<vmem>>, vector<8x128xf32>
    tpu.vector_store %arg7[%c64_391, %c0_392], %412 {strides = array<i32>} : memref<72x128xf32, #tpu.memory_space<vmem>>, vector<8x128xf32>,
    return
  }
}

</mosaic_0001>

<bundles_post_ra>
// kernel: savn_forward.1
= control target key start
LH: loop header
LB: loop body
LE: loop exit
PB: predicated region body
PF: predicated region fallthrough
CT: control target
= control target key end

     0   :  { %12 = vsyncpa [#allocation6], 0  ;;  %s5622_s24 = smov [#allocation5]   ;;  %s6446_s0 = inlined_call_operand.vmem [shape: f32[32,49], index: 0, kind: input, shape index: {}]   ;;  %s6447_s1 = inlined_call_operand.vmem [shape: f32[1,16], index: 1, kind: input, shape index: {}]   ;;  %s6448_s2 = inlined_call_operand.vmem [shape: f32[1,8], index: 2, kind: input, shape index: {}]   ;;  %s6449_s3 = inlined_call_operand.vmem [shape: f32[1,32], index: 3, kind: input, shape index: {}]   ;;  %s6450_s4 = inlined_call_operand.vmem [shape: f32[1,32], index: 4, kind: input, shape index: {}]   ;;  %s6451_s5 = inlined_call_operand.hbm [shape: f32[376,128], index: 5, kind: input, shape index: {}]   ;;  %s6452_s6 = inlined_call_operand.hbm [shape: bf16[64,64,128], index: 6, kind: input, shape index: {}]   ;;  %s6453_s7 = inlined_call_operand.vmem [shape: f32[72,128], index: 7, kind: output, shape index: {}]  }
   0x1   :  { %s28_s25 = sshll.u32 %s5622_s24, 4  ;;  %s5547_s28 = scalar_lea.hbm %s6451_s5, 6016  ;;  %s29_s25 = int_to_ptr.vmem [resolvable:$true] %s28_s25 }
   0x2   :  { %p5548_p0 = scmp.ne.s32.totalorder %s6451_s5, %s5547_s28  ;;  %p5551_p1 = scmp.lt.u32.totalorder %s5547_s28, %s6451_s5 }
   0x4   :  { %p5553_p2 = pnand %p5551_p1, %p5548_p0 }
   0x6   :  { %5556 = shalt.err (!%p5553_p2)
}
   0x7   :  { %s5557_s10 = scalar_lea.vmem %s29_s25, 6016  ;;  %p5562_p4 = scmp.lt.s32.totalorder %s29_s25, %s29_s25 }
   0x8   :  { %p5558_p3 = scmp.ne.s32.totalorder %s29_s25, %s5557_s10  ;;  %p5563_p5 = scmp.lt.s32.totalorder %s5557_s10, %s5557_s10 }
   0xa   :  { %p5564_p6 = por %p5563_p5, %p5562_p4 }
   0xc   :  { %p5565_p7 = pnand %p5564_p6, %p5558_p3 }
   0xe   :  { %5568 = shalt.err (!%p5565_p7)
}
   0xf   :  { %s5623_s11 = smov 128   ;;  %s5624_s12 = smov 8  }
  0x10   :  { %34 = dma.hbm_to_vmem [thread:$0]  %s6451_s5, 6016, %s29_s25, [#allocation6], %s5623_s11, %s5623_s11, %s5624_s12  }
  0x11   :  { %5616 = dma.done.wait [#allocation6], 6016  }
  0x12   :  { %5617 = vsyncadd [#allocation6], 4294961280  ;;  %v5625_v0 = vmov 0.0|0.0   ;;  %vm5626_vm0 = vmmov 0   ;;  %v5627_v1 = vmov 0.0   ;;  %v5628_v2 = vmov 10  }
  0x13   :  { %5492 = vmatprep.subr.bf16.mxu1 %v5625_v0  ;;  %4658 = vmatprep.mubr.msk.f32.mxu1 %vm5626_vm0, %v5627_v1  ;;  %v271_v3 = vld [vmem:[#allocation5 + $0xc0] sm:$0xff]  ;;  %v272_v4 = vld [vmem:[#allocation5 + $0xc8] sm:$0xff]  ;;  %vm124_vm1 = vcmask 261120   ;;  %v82_v8 = vld [vmem:[%s6446_s0 + $0x10] sm:$0xff]  ;;  %vm275_vm2 = vcmask 130048   ;;  %vm353_vm3 = vcmask 64512   ;;  %v452_v39 = vlaneseq }
  0x14   :  { %5535 = vset.pattern.permute.xlu0 %v5628_v2  ;;  %5536 = vset.pattern.permute.xlu1 %v5628_v2  ;;  %v5493_v5 = vpack.c.bf16 %v272_v4, %v271_v3  ;;  %v80_v6 = vld [vmem:[%s6446_s0] sm:$0xff]  ;;  %v81_v7 = vld [vmem:[%s6446_s0 + $0x8] sm:$0xff]  ;;  %v83_v9 = vld [vmem:[%s6446_s0 + $0x18] sm:$0xff]  ;;  %vm464_vm4 = vcmask 523264   ;;  %vm501_vm5 = vcmask 80896   ;;  %vm262_vm6 = vcmask 400384  }
  0x15   :  { %v274_v10 = vld [vmem:[%s6447_s1] sm:$0x1]  ;;  %v5484_v11 = vpack.c.bf16 %v81_v7, %v80_v6  ;;  %v64_v12 = vld [vmem:[#allocation5 + $0x138] sm:$0xff]  ;;  %v5488_v14 = vpack.c.bf16 %v83_v9, %v82_v8  ;;  %v5708_v16 = vld [vmem:[#allocation5 + $0x90] sm:$0xff]  ;;  %v453_v40 = vshrl.u32 %v452_v39, 7  ;;  %s5845_s18 = scalar_lea.hbm %s6452_s6, 16384 }
  0x16   :  { %5494 = vmatpush3.bf16.msra.mxu1 %v5493_v5  ;;  %v350_v13 = vld [vmem:[#allocation5 + $0xd8] sm:$0xff]  ;;  %4642 = vmatprep.mubr.msk.f32.mxu0 %vm124_vm1, %v64_v12  ;;  %v5706_v15 = vld [vmem:[#allocation5 + $0x80] sm:$0xff]  ;;  %v5717_v18 = vld [vmem:[#allocation5 + $0x88] sm:$0xff]  ;;  %s5630_s19 = smov [#allocation2]   ;;  %s5631_s21 = smov [#allocation2 + $0x400]  }
  0x17   :  { %4661 = vmatprep.subr.mxu1 %v5627_v1  ;;  %5485 = vmatprep.subr.bf16.mxu0 %v5484_v11  ;;  %v352_v17 = vld [vmem:[%s6448_s2] sm:$0x1]  ;;  %v5720_v20 = vld [vmem:[#allocation5 + $0x98] sm:$0xff]  ;;  %v66_v21 = vld [vmem:[#allocation5 + $0x148] sm:$0xff]  ;;  %v454_v45 = vsub.s32 0, %v453_v40  ;;  %s46_s20 = sshll.u32 %s5630_s19, 4  ;;  %p5570_p8 = scmp.ne.s32.totalorder %s6452_s6, %s5845_s18  ;;  %s5849_s20 = int_to_ptr.vmem [resolvable:$true] %s46_s20 }
  0x18   :  { %5487 = vmatpush3.bf16.msra.mxu0 %v5484_v11  ;;  %86 = vperm.xlu0 %5535, %v5706_v15   ;;  %v65_v19 = vld [vmem:[#allocation5 + $0x140] sm:$0xff]  ;;  %v67_v23 = vld [vmem:[#allocation5 + $0x150] sm:$0xff]  ;;  %v5730_v24 = vld [vmem:[#allocation5 + $0xa8] sm:$0xff]  ;;  %s60_s22 = sshll.u32 %s5631_s21, 4  ;;  %s5571_s24 = scalar_lea.hbm %s6452_s6, 32768  ;;  %s61_s22 = int_to_ptr.vmem [resolvable:$true] %s60_s22 }
  0x19   :  { %4659 = vmatmul.mubr.msk.f32.vlgmr.msra.gmra.mrb[0].mxu1 %vm275_vm2, %v274_v10  ;;  %5489 = vmatprep.subr.bf16.mxu0 %v5488_v14  ;;  %v5727_v22 = vld [vmem:[#allocation5 + $0xa0] sm:$0xff]  ;;  %v68_v25 = vld [vmem:[#allocation5 + $0x158] sm:$0xff]  ;;  %v5735_v26 = vld [vmem:[#allocation5 + $0xb0] sm:$0xff]  ;;  %p5572_p9 = scmp.lt.u32.totalorder %s5571_s24, %s5845_s18  ;;  %p5573_p10 = scmp.lt.u32.totalorder %s5845_s18, %s6452_s6 }
  0x1a   :  { %4662 = vmatpush3.msra.mxu1 %v350_v13  ;;  %4663 = vmatprep.mubr.msk.f32.mxu1 %vm5626_vm0, %v5627_v1  ;;  %v69_v27 = vld [vmem:[#allocation5 + $0x160] sm:$0xff]  ;;  %v5738_v28 = vld [vmem:[#allocation5 + $0xb8] sm:$0xff]  ;;  %v70_v29 = vld [vmem:[#allocation5 + $0x168] sm:$0xff] }
  0x1b   :  { %96 = vperm.xlu1 %5536, %v5708_v16   ;;  %5511 = vmatprep.subr.bf16.mxu1 %v5625_v0  ;;  %v71_v30 = vld [vmem:[#allocation5 + $0x170] sm:$0xff]  ;;  %v428_v31 = vld [vmem:[#allocation5] sm:$0xff]  ;;  %v731_v32 = vld [vmem:[#allocation5 + $0xe8] sm:$0xff]  ;;  %p5574_p11 = por %p5573_p10, %p5572_p9 }
  0x1c   :  { %5491 = vmatpush3.bf16.msra.mxu0 %v5488_v14  ;;  %91 = vperm.xlu0 %5535, %v5717_v18   ;;  %v732_v33 = vld [vmem:[#allocation5 + $0xf0] sm:$0xff]  ;;  %v733_v34 = vld [vmem:[#allocation5 + $0xf8] sm:$0xff]  ;;  %v734_v36 = vld [vmem:[#allocation5 + $0x100] sm:$0xff] }
  0x1d   :  { %4664 = vmatmul.mubr.msk.f32.vlgmr.msra.gmra.mrb[2].mxu1 %vm353_vm3, %v352_v17  ;;  %v5512_v35 = vpack.c.bf16 %v732_v33, %v731_v32  ;;  %v5515_v37 = vpack.c.bf16 %v734_v36, %v733_v34  ;;  %v736_v38 = vld [vmem:[%s6449_s3] sm:$0x1]  ;;  %v273_v41 = vld [vmem:[#allocation5 + $0xd0] sm:$0x1]  ;;  %v437_v50 = vld [vmem:[#allocation5 + $0x48] sm:$0xff]  ;;  %p5575_p12 = pnand %p5574_p11, %p5570_p8 }
  0x1e   :  { %4702 = vmatprep.mubr.msk.f32.mxu1 %vm5626_vm0, %v5627_v1  ;;  %v351_v47 = vld [vmem:[#allocation5 + $0xe0] sm:$0x1]  ;;  %v438_v58 = vld [vmem:[#allocation5 + $0x50] sm:$0xff]  ;;  %v439_v8 = vld [vmem:[#allocation5 + $0x58] sm:$0xff] }
  0x1f   :  { %4643 = vmatmul.mubr.msk.f32.vlgmr.msra.gmra.mrb[0].mxu0 %vm124_vm1, %v65_v19  ;;  %101 = vperm.xlu1 %5536, %v5720_v20   ;;  %v436_v51 = vld [vmem:[#allocation5 + $0x40] sm:$0xff]  ;;  %v442_v7 = vld [vmem:[#allocation5 + $0x70] sm:$0xff] }
  0x20   :  { %4645 = vmatprep.mubr.msk.f32.mxu0 %vm124_vm1, %v66_v21  ;;  %106 = vperm.xlu0 %5535, %v5727_v22   ;;  %v440_v57 = vld [vmem:[#allocation5 + $0x60] sm:$0xff] }
  0x21   :  { %5513 = vmatpush3.bf16.msra.mxu1 %v5512_v35 }
  0x22   :  { %5514 = vmatprep.subr.bf16.mxu1 %v5625_v0 }
  0x23   :  { %4646 = vmatmul.mubr.msk.f32.gmra.mrb[2].mxu0 %vm124_vm1, %v67_v23  ;;  %111 = vperm.xlu1 %5536, %v5730_v24   ;;  %v441_v23 = vld [vmem:[#allocation5 + $0x68] sm:$0xff] }
  0x24   :  { %4648 = vmatprep.mubr.msk.f32.mxu0 %vm124_vm1, %v68_v25  ;;  %116 = vperm.xlu0 %5535, %v5735_v26  }
  0x25   :  { %5516 = vmatpush3.bf16.msra.mxu1 %v5515_v37 }
  0x27   :  { %4649 = vmatmul.mubr.msk.f32.gmra.mrb[4].mxu0 %vm124_vm1, %v69_v27  ;;  %121 = vperm.xlu1 %5536, %v5738_v28  }
  0x28   :  { %4651 = vmatprep.mubr.msk.f32.mxu0 %vm124_vm1, %v70_v29  ;;  %4703 = vmatmul.mubr.msk.f32.vlgmr.msra.gmra.mrb[4].mxu1 %vm124_vm1, %v736_v38 }
  0x2b   :  { %4652 = vmatmul.mubr.msk.f32.gmra.mrb[6].mxu0 %vm124_vm1, %v71_v30 }
  0x2c   :  { %4682 = vmatprep.mubr.msk.f32.mxu0 %vm464_vm4, %v428_v31 }
  0x97   :  { %v87_v48 = vpop.permute.xlu0 %86 }
  0x9a   :  { %v97_v42 = vpop.permute.xlu1 %96 }
  0x9b   :  { %v92_v63 = vpop.permute.xlu0 %91 }
  0x9e   :  { %v102_v56 = vpop.permute.xlu1 %101 }
  0x9f   :  { %v107_v14 = vpop.permute.xlu0 %106 }
  0xa2   :  { %v112_v11 = vpop.permute.xlu1 %111 }
  0xec   :  { %v345_v43 = vpop.f32.mrb[0].mxu1 }
  0xed   :  { %v346_v44 = vadd.f32 %v345_v43, %v273_v41  ;;  %v4660_v46 = vpop.f32.mrb[1].mxu1  ;;  %v122_v41 = vpop.permute.xlu1 %121  ;;  %v443_v43 = vld [vmem:[#allocation5 + $0x78] sm:$0xff] }
  0xef   :  { %v349_v49 = vmax.f32 %v346_v44, 0.0 }
  0xf0   :  { %v423_v52 = vpop.f32.mrb[2].mxu1 }
  0xf1   :  { %v5751_v53 = vrot.slane %v349_v49, %v454_v45  ;;  %v424_v54 = vadd.f32 %v423_v52, %v351_v47  ;;  %v4665_v55 = vpop.f32.mrb[3].mxu1  ;;  %v117_v47 = vpop.permute.xlu0 %116 }
  0xf2   :  { %v4644_v62 = vpop.f32.mrb[0].mxu0 }
  0xf3   :  { %v457_v59 = vmul.f32 %v5751_v53, %v437_v50  ;;  %v456_v60 = vmul.f32 %v5751_v53, %v436_v51  ;;  %v427_v61 = vmax.f32 %v424_v54, 0.0  ;;  %v215_v2 = vpop.f32.mrb[1].mxu0  ;;  %v460_v5 = vmul.f32 %v5751_v53, %v440_v57 }
  0xf4   :  { %v458_v6 = vmul.f32 %v5751_v53, %v438_v58  ;;  %v462_v12 = vmul.f32 %v5751_v53, %v442_v7  ;;  %v459_v21 = vmul.f32 %v5751_v53, %v439_v8  ;;  %v221_v27 = vadd.f32 %v4644_v62, %v92_v63 }
  0xf5   :  { %v468_v3 = vsel %vm464_vm4, %v457_v59, 0.0  ;;  %v465_v4 = vsel %vm464_vm4, %v456_v60, 0.0  ;;  %v5759_v9 = vrot.slane %v427_v61, %v454_v45  ;;  %v477_v17 = vsel %vm464_vm4, %v460_v5, 0.0 }
  0xf6   :  { %469 = vadd.xlane.f32.xlu1 %v468_v3  ;;  %466 = vadd.xlane.f32.xlu0 %v465_v4  ;;  %v4647_v10 = vpop.f32.mrb[2].mxu0  ;;  %v471_v19 = vsel %vm464_vm4, %v458_v6, 0.0  ;;  %v216_v29 = vadd.f32 %v215_v2, %v87_v48  ;;  %v483_v32 = vsel %vm464_vm4, %v462_v12, 0.0  ;;  %v461_v33 = vmul.f32 %v5751_v53, %v441_v23  ;;  %v429_v12 = vld [vmem:[#allocation5 + $0x8] sm:$0xff]  ;;  %v432_v23 = vld [vmem:[#allocation5 + $0x20] sm:$0xff] }
  0xf7   :  { %v225_v13 = vpop.f32.mrb[3].mxu0  ;;  %v493_v25 = vmul.f32 %v5759_v9, %v5706_v15  ;;  %v231_v30 = vadd.f32 %v4647_v10, %v102_v56  ;;  %v474_v37 = vsel %vm464_vm4, %v459_v21, 0.0  ;;  %v255_v38 = vmax.f32 %v221_v27, 0.0  ;;  %v433_v27 = vld [vmem:[#allocation5 + $0x28] sm:$0xff] }
  0xf8   :  { %v226_v34 = vadd.f32 %v225_v13, %v97_v42  ;;  %v254_v39 = vmax.f32 %v216_v29, 0.0  ;;  %v495_v42 = vmul.f32 %v5759_v9, %v5708_v16  ;;  %v480_v56 = vsel %vm464_vm4, %v461_v33, 0.0  ;;  %v430_v13 = vld [vmem:[#allocation5 + $0x10] sm:$0xff] }
  0xf9   :  { %v257_v40 = vmax.f32 %v231_v30, 0.0  ;;  %v502_v48 = vsel %vm501_vm5, %v493_v25, 0.0  ;;  %264 = vst.msk [vmem:[%s6453_s7 + $0x8] sm:$0xff] %vm262_vm6, %v255_v38  ;;  %v463_v57 = vmul.f32 %v5751_v53, %v443_v43  ;;  %v497_v63 = vmul.f32 %v5759_v9, %v5727_v22  ;;  %v434_v29 = vld [vmem:[#allocation5 + $0x30] sm:$0xff] }
  0xfa   :  { %478 = vadd.xlane.f32.xlu1 %v477_v17  ;;  %472 = vadd.xlane.f32.xlu0 %v471_v19  ;;  %v4650_v31 = vpop.f32.mrb[4].mxu0  ;;  %v256_v44 = vmax.f32 %v226_v34, 0.0  ;;  %263 = vst.msk [vmem:[%s6453_s7] sm:$0xff] %vm262_vm6, %v254_v39  ;;  %v5495_v49 = vpack.c.bf16 %v255_v38, %v254_v39  ;;  %v508_v61 = vsel %vm501_vm5, %v495_v42, 0.0  ;;  %v494_v2 = vmul.f32 %v5759_v9, %v5717_v18  ;;  %v431_v19 = vld [vmem:[#allocation5 + $0x18] sm:$0xff] }
  0xfb   :  { %v241_v35 = vadd.f32 %v4650_v31, %v112_v11  ;;  %v235_v36 = vpop.f32.mrb[5].mxu0  ;;  %266 = vst.msk [vmem:[%s6453_s7 + $0x18] sm:$0xff] %vm262_vm6, %v257_v40  ;;  %v486_v53 = vsel %vm464_vm4, %v463_v57, 0.0  ;;  %v514_v4 = vsel %vm501_vm5, %v497_v63, 0.0  ;;  %v499_v6 = vmul.f32 %v5759_v9, %v5735_v26 }
  0xfc   :  { %v236_v46 = vadd.f32 %v235_v36, %v107_v14  ;;  %265 = vst.msk [vmem:[%s6453_s7 + $0x10] sm:$0xff] %vm262_vm6, %v256_v44  ;;  %v5499_v51 = vpack.c.bf16 %v257_v40, %v256_v44  ;;  %5496 = vmatprep.subr.bf16.mxu0 %v5495_v49  ;;  %v505_v5 = vsel %vm501_vm5, %v494_v2, 0.0  ;;  %v496_v7 = vmul.f32 %v5759_v9, %v5720_v20 }
  0xfd   :  { %v259_v45 = vmax.f32 %v241_v35, 0.0  ;;  %5498 = vmatpush3.bf16.msra.mxu0 %v5495_v49  ;;  %v520_v8 = vsel %vm501_vm5, %v499_v6, 0.0  ;;  %v498_v11 = vmul.f32 %v5759_v9, %v5730_v24  ;;  %v500_v17 = vmul.f32 %v5759_v9, %v5738_v28  ;;  %v435_v9 = vld [vmem:[#allocation5 + $0x38] sm:$0xff] }
  0xfe   :  { %484 = vadd.xlane.f32.xlu1 %v483_v32  ;;  %475 = vadd.xlane.f32.xlu0 %v474_v37  ;;  %v4653_v50 = vpop.f32.mrb[6].mxu0  ;;  %v258_v52 = vmax.f32 %v236_v46, 0.0  ;;  %v511_v10 = vsel %vm501_vm5, %v496_v7, 0.0  ;;  %v5629_v21 = vmov 11  }
  0xff   :  { %268 = vst.msk [vmem:[%s6453_s7 + $0x28] sm:$0xff] %vm262_vm6, %v259_v45  ;;  %v251_v54 = vadd.f32 %v4653_v50, %v122_v41  ;;  %v245_v55 = vpop.f32.mrb[7].mxu0  ;;  %5500 = vmatprep.subr.bf16.mxu0 %v5499_v51  ;;  %v517_v14 = vsel %vm501_vm5, %v498_v11, 0.0  ;;  %5537 = vset.pattern.permute.xlu1 %v5629_v21  ;;  %v523_v25 = vsel %vm501_vm5, %v500_v17, 0.0 }
 0x100   :  { %v246_v58 = vadd.f32 %v245_v55, %v117_v47  ;;  %267 = vst.msk [vmem:[%s6453_s7 + $0x20] sm:$0xff] %vm262_vm6, %v258_v52  ;;  %v5503_v59 = vpack.c.bf16 %v259_v45, %v258_v52  ;;  %5538 = vset.pattern.permute.xlu0 %v5629_v21 }
 0x101   :  { %v261_v60 = vmax.f32 %v251_v54, 0.0  ;;  %5502 = vmatpush3.bf16.msra.mxu0 %v5499_v51 }
 0x102   :  { %503 = vadd.xlane.f32.xlu1 %v502_v48  ;;  %481 = vadd.xlane.f32.xlu0 %v480_v56  ;;  %v260_v62 = vmax.f32 %v246_v58, 0.0 }
 0x103   :  { %270 = vst.msk [vmem:[%s6453_s7 + $0x38] sm:$0xff] %vm262_vm6, %v261_v60  ;;  %5504 = vmatprep.subr.bf16.mxu0 %v5503_v59 }
 0x104   :  { %269 = vst.msk [vmem:[%s6453_s7 + $0x30] sm:$0xff] %vm262_vm6, %v260_v62  ;;  %v5507_v3 = vpack.c.bf16 %v261_v60, %v260_v62  ;;  %v806_v60 = vpop.f32.mrb[4].mxu1 }
 0x105   :  { %5506 = vmatpush3.bf16.msra.mxu0 %v5503_v59 }
 0x106   :  { %509 = vadd.xlane.f32.xlu1 %v508_v61  ;;  %487 = vadd.xlane.f32.xlu0 %v486_v53 }
 0x107   :  { %5508 = vmatprep.subr.bf16.mxu0 %v5507_v3 }
 0x109   :  { %5510 = vmatpush3.bf16.msra.mxu0 %v5507_v3 }
 0x10a   :  { %515 = vadd.xlane.f32.xlu1 %v514_v4  ;;  %506 = vadd.xlane.f32.xlu0 %v505_v5 }
 0x10c   :  { %4683 = vmatmul.mubr.msk.f32.vlgmr.msra.gmra.mrb[8].mxu0 %vm464_vm4, %v429_v12 }
 0x10d   :  { %4685 = vmatprep.mubr.msk.f32.mxu0 %vm464_vm4, %v430_v13 }
 0x10e   :  { %521 = vadd.xlane.f32.xlu1 %v520_v8  ;;  %512 = vadd.xlane.f32.xlu0 %v511_v10 }
 0x110   :  { %4686 = vmatmul.mubr.msk.f32.gmra.mrb[10].mxu0 %vm464_vm4, %v431_v19 }
 0x111   :  { %4688 = vmatprep.mubr.msk.f32.mxu0 %vm464_vm4, %v432_v23 }
 0x112   :  { %518 = vadd.xlane.f32.xlu0 %v517_v14 }
 0x114   :  { %4689 = vmatmul.mubr.msk.f32.gmra.mrb[12].mxu0 %vm464_vm4, %v433_v27 }
 0x115   :  { %4691 = vmatprep.mubr.msk.f32.mxu0 %vm464_vm4, %v434_v29 }
 0x116   :  { %524 = vadd.xlane.f32.xlu0 %v523_v25 }
 0x118   :  { %4692 = vmatmul.mubr.msk.f32.gmra.mrb[14].mxu0 %vm464_vm4, %v435_v9 }
 0x183   :  { %v470_v30 = vpop.xlane.xlu1 %469  ;;  %v467_v31 = vpop.xlane.xlu0 %466 }
 0x187   :  { %v479_v32 = vpop.xlane.xlu1 %478  ;;  %v473_v33 = vpop.xlane.xlu0 %472 }
 0x18b   :  { %v485_v34 = vpop.xlane.xlu1 %484  ;;  %v476_v35 = vpop.xlane.xlu0 %475 }
 0x18f   :  { %v504_v36 = vpop.xlane.xlu1 %503  ;;  %v482_v37 = vpop.xlane.xlu0 %481 }
 0x190   :  { %v526_v38 = vadd.f32 %v504_v36, %v467_v31 }
 0x192   :  { %v534_v39 = vadd.f32 %v526_v38, %v5706_v15 }
 0x193   :  { %v510_v40 = vpop.xlane.xlu1 %509  ;;  %v488_v41 = vpop.xlane.xlu0 %487 }
 0x194   :  { %v528_v43 = vadd.f32 %v510_v40, %v473_v33  ;;  %544 = vperm.xlu1 %5537, %v534_v39  }
 0x196   :  { %v536_v44 = vadd.f32 %v528_v43, %v5708_v16 }
 0x197   :  { %v507_v45 = vpop.xlane.xlu0 %506  ;;  %v516_v48 = vpop.xlane.xlu1 %515 }
 0x198   :  { %v527_v46 = vadd.f32 %v507_v45, %v470_v30  ;;  %554 = vperm.xlu1 %5537, %v536_v44   ;;  %v530_v50 = vadd.f32 %v516_v48, %v479_v32 }
 0x19a   :  { %v535_v47 = vadd.f32 %v527_v46, %v5717_v18  ;;  %v538_v15 = vadd.f32 %v530_v50, %v5727_v22 }
 0x19b   :  { %v513_v42 = vpop.xlane.xlu0 %512  ;;  %v522_v55 = vpop.xlane.xlu1 %521 }
 0x19c   :  { %v529_v49 = vadd.f32 %v513_v42, %v476_v35  ;;  %549 = vperm.xlu0 %5538, %v535_v47   ;;  %v532_v16 = vadd.f32 %v522_v55, %v485_v34 }
 0x19e   :  { %v537_v51 = vadd.f32 %v529_v49, %v5720_v20  ;;  %v540_v18 = vadd.f32 %v532_v16, %v5735_v26  ;;  %v735_v20 = vld [vmem:[#allocation5 + $0x108] sm:$0x1] }
 0x19f   :  { %v519_v52 = vpop.xlane.xlu0 %518  ;;  %v5847_v22 = vadd.f32 %v806_v60, %v735_v20 }
 0x1a0   :  { %559 = vperm.xlu1 %5537, %v537_v51   ;;  %v531_v54 = vadd.f32 %v519_v52, %v482_v37 }
 0x1a2   :  { %v539_v56 = vadd.f32 %v531_v54, %v5730_v24  ;;  %v4704_v24 = vpop.f32.mrb[5].mxu1 }
 0x1a3   :  { %v525_v57 = vpop.xlane.xlu0 %524 }
 0x1a4   :  { %564 = vperm.xlu1 %5537, %v538_v15   ;;  %v533_v58 = vadd.f32 %v525_v57, %v488_v41 }
 0x1a6   :  { %v541_v59 = vadd.f32 %v533_v58, %v5738_v28 }
 0x1a8   :  { %569 = vperm.xlu1 %5537, %v539_v56  }
 0x1ac   :  { %574 = vperm.xlu1 %5537, %v540_v18  }
 0x1b0   :  { %579 = vperm.xlu1 %5537, %v541_v59  }
 0x1b1   :  { %5578 = shalt.err (!%p5575_p12)  }
 0x1b2   :  { %s5579_s28 = scalar_lea.vmem %s5849_s20, 16384  ;;  %s5583_s29 = scalar_lea.vmem %s5849_s20, 32768 }
 0x1b3   :  { %p5580_p13 = scmp.ne.s32.totalorder %s5849_s20, %s5579_s28  ;;  %p5584_p0 = scmp.lt.s32.totalorder %s5849_s20, %s5849_s20 }
 0x1b4   :  { %p5585_p1 = scmp.lt.s32.totalorder %s5583_s29, %s5579_s28 }
 0x1b6   :  { %p5586_p2 = por %p5585_p1, %p5584_p0 }
 0x1b8   :  { %p5587_p3 = pnand %p5586_p2, %p5580_p13 }
 0x1ba   :  { %5590 = shalt.err (!%p5587_p3)  }
 0x1bb   :  { %49 = dma.hbm_to_vmem [thread:$0]  %s6452_s6, 16384, %s5849_s20, [#allocation3] }
 0x1bc   :  { %p5592_p4 = scmp.ne.s32.totalorder %s5845_s18, %s5571_s24  ;;  %p5595_p5 = scmp.lt.u32.totalorder %s5571_s24, %s5571_s24 }
 0x1be   :  { %p5596_p6 = por %p5595_p5, %p5573_p10 }
 0x1c0   :  { %p5598_p7 = por %p5596_p6, %p5572_p9 }
 0x1c2   :  { %p5599_p8 = pnand %p5598_p7, %p5592_p4 }
 0x1c4   :  { %5602 = shalt.err (!%p5599_p8)  }
 0x1c5   :  { %s5603_s11 = scalar_lea.vmem %s61_s22, 16384  ;;  %p5608_p12 = scmp.lt.s32.totalorder %s61_s22, %s5849_s20 }
 0x1c6   :  { %p5604_p11 = scmp.ne.s32.totalorder %s61_s22, %s5603_s11  ;;  %p5609_p13 = scmp.lt.s32.totalorder %s5583_s29, %s5603_s11 }
 0x1c8   :  { %p5610_p0 = por %p5609_p13, %p5608_p12 }
 0x1ca   :  { %p5611_p1 = pnand %p5610_p0, %p5604_p11 }
 0x1cc   :  { %5614 = shalt.err (!%p5611_p1)  }
 0x1cd   :  { %63 = dma.hbm_to_vmem [thread:$0]  %s5845_s18, 16384, %s61_s22, [#allocation3 + $0x1] }
 0x1df   :  { %v4684_v26 = vpop.f32.mrb[8].mxu0 }
 0x1e0   :  { %v672_v28 = vpop.f32.mrb[9].mxu0 }
 0x1e3   :  { %v4687_v61 = vpop.f32.mrb[10].mxu0 }
 0x1e4   :  { %v682_v62 = vpop.f32.mrb[11].mxu0 }
 0x1e7   :  { %v4690_v53 = vpop.f32.mrb[12].mxu0 }
 0x1e8   :  { %v692_v63 = vpop.f32.mrb[13].mxu0 }
 0x1eb   :  { %v4693_v2 = vpop.f32.mrb[14].mxu0 }
 0x1ec   :  { %v702_v3 = vpop.f32.mrb[15].mxu0 }
 0x213   :  { %v545_v4 = vpop.permute.xlu1 %544 }
 0x214   :  { %v673_v5 = vadd.f32 %v672_v28, %v545_v4 }
 0x216   :  { %v711_v8 = vmax.f32 %v673_v5, 0.0 }
 0x217   :  { %v555_v6 = vpop.permute.xlu1 %554 }
 0x218   :  { %v683_v10 = vadd.f32 %v682_v62, %v555_v6  ;;  %v719_v14 = vsel %vm262_vm6, %v711_v8, 0.0 }
 0x21a   :  { %v713_v17 = vmax.f32 %v683_v10, 0.0 }
 0x21b   :  { %v550_v7 = vpop.permute.xlu0 %549 }
 0x21c   :  { %v678_v11 = vadd.f32 %v4684_v26, %v550_v7  ;;  %v721_v29 = vsel %vm262_vm6, %v713_v17, 0.0 }
 0x21e   :  { %v712_v12 = vmax.f32 %v678_v11, 0.0 }
 0x21f   :  { %v560_v13 = vpop.permute.xlu1 %559 }
 0x220   :  { %v720_v19 = vsel %vm262_vm6, %v712_v12, 0.0  ;;  %v688_v21 = vadd.f32 %v4687_v61, %v560_v13 }
 0x221   :  { %v5891_v23 = vpack.c.bf16 %v720_v19, %v719_v14 }
 0x222   :  { %v714_v25 = vmax.f32 %v688_v21, 0.0 }
 0x223   :  { %v565_v27 = vpop.permute.xlu1 %564 }
 0x224   :  { %v722_v9 = vsel %vm262_vm6, %v714_v25, 0.0  ;;  %v693_v30 = vadd.f32 %v692_v63, %v565_v27 }
 0x225   :  { %v5895_v31 = vpack.c.bf16 %v722_v9, %v721_v29 }
 0x226   :  { %v715_v33 = vmax.f32 %v693_v30, 0.0 }
 0x227   :  { %v570_v32 = vpop.permute.xlu1 %569 }
 0x228   :  { %v698_v34 = vadd.f32 %v4690_v53, %v570_v32  ;;  %v723_v37 = vsel %vm262_vm6, %v715_v33, 0.0 }
 0x22a   :  { %v716_v35 = vmax.f32 %v698_v34, 0.0 }
 0x22b   :  { %v575_v36 = vpop.permute.xlu1 %574 }
 0x22c   :  { %v724_v38 = vsel %vm262_vm6, %v716_v35, 0.0  ;;  %v703_v39 = vadd.f32 %v702_v3, %v575_v36 }
 0x22d   :  { %v5899_v40 = vpack.c.bf16 %v724_v38, %v723_v37 }
 0x22e   :  { %v717_v43 = vmax.f32 %v703_v39, 0.0 }
 0x22f   :  { %v580_v41 = vpop.permute.xlu1 %579 }
 0x230   :  { %v708_v44 = vadd.f32 %v4693_v2, %v580_v41  ;;  %v725_v46 = vsel %vm262_vm6, %v717_v43, 0.0 }
 0x232   :  { %v718_v45 = vmax.f32 %v708_v44, 0.0 }
 0x234   :  { %v726_v47 = vsel %vm262_vm6, %v718_v45, 0.0 }
 0x235   :  { %v5903_v48 = vpack.c.bf16 %v726_v47, %v725_v46 }
 0x236   :  { %5618 = dma.done.wait [#allocation3], 16384 }
 0x237   :  { %5619 = vsyncadd [#allocation3], 4294950912  ;;  %4705 = vmatprep.subr.bf16.mxu1 %v5627_v1  ;;  %4717 = vmatprep.subr.bf16.mxu0 %v5627_v1  ;;  %v816_v42 = vld [vmem:[#allocation2] sm:$0xff]  ;;  %v817_v50 = vld [vmem:[#allocation2 + $0x8] sm:$0xff]  ;;  %v5918_v16 = vshrl.u32 %v5891_v23, 16  ;;  %v921_v26 = vrot.slane %v5891_v23, 1 }
 0x238   :  { %4713 = vmatprep.mubr.msk.bf16.mxu1 %vm5626_vm0, %v5627_v1  ;;  %4725 = vmatprep.mubr.msk.bf16.mxu0 %vm5626_vm0, %v5627_v1  ;;  %v865_v49 = vld [vmem:[#allocation2 + $0x20] sm:$0xff]  ;;  %v866_v51 = vld [vmem:[#allocation2 + $0x28] sm:$0xff]  ;;  %v818_v52 = vld [vmem:[#allocation2 + $0x10] sm:$0xff]  ;;  %v1021_v6 = vrot.slane %v5891_v23, 2  ;;  %v1121_v21 = vrot.slane %v5891_v23, 3  ;;  %v1221_v36 = vrot.slane %v5891_v23, 4 }
 0x239   :  { %4706 = vmatpush3.bf16.msra.mxu1 %v816_v42  ;;  %4718 = vmatpush3.bf16.msra.mxu0 %v865_v49  ;;  %v867_v15 = vld [vmem:[#allocation2 + $0x30] sm:$0xff]  ;;  %v819_v54 = vld [vmem:[#allocation2 + $0x18] sm:$0xff]  ;;  %v916_v56 = vld [vmem:[#allocation2 + $0x40] sm:$0xff]  ;;  %v971_v28 = vrot.slane %v5918_v16, 1  ;;  %v1071_v7 = vrot.slane %v5918_v16, 2  ;;  %v1171_v25 = vrot.slane %v5918_v16, 3 }
 0x23a   :  { %4707 = vmatprep.subr.bf16.mxu1 %v5627_v1  ;;  %4719 = vmatprep.subr.bf16.mxu0 %v5627_v1  ;;  %v868_v55 = vld [vmem:[#allocation2 + $0x38] sm:$0xff]  ;;  %v967_v57 = vld [vmem:[#allocation2 + $0x60] sm:$0xff]  ;;  %v917_v18 = vld [vmem:[#allocation2 + $0x48] sm:$0xff]  ;;  %v1271_v37 = vrot.slane %v5918_v16, 4  ;;  %v1321_v42 = vrot.slane %v5891_v23, 5  ;;  %v1371_v49 = vrot.slane %v5918_v16, 5 }
 0x23b   :  { %v968_v58 = vld [vmem:[#allocation2 + $0x68] sm:$0xff]  ;;  %v918_v59 = vld [vmem:[#allocation2 + $0x50] sm:$0xff]  ;;  %v919_v60 = vld [vmem:[#allocation2 + $0x58] sm:$0xff] }
 0x23c   :  { %v969_v20 = vld [vmem:[#allocation2 + $0x70] sm:$0xff]  ;;  %v970_v24 = vld [vmem:[#allocation2 + $0x78] sm:$0xff]  ;;  %v1017_v61 = vld [vmem:[#allocation2 + $0x80] sm:$0xff] }
 0x23d   :  { %4708 = vmatpush3.bf16.msra.mxu1 %v817_v50  ;;  %4720 = vmatpush3.bf16.msra.mxu0 %v866_v51  ;;  %v1067_v62 = vld [vmem:[#allocation2 + $0xa0] sm:$0xff]  ;;  %v1018_v53 = vld [vmem:[#allocation2 + $0x88] sm:$0xff]  ;;  %v1019_v2 = vld [vmem:[#allocation2 + $0x90] sm:$0xff] }
 0x23e   :  { %4709 = vmatprep.subr.bf16.mxu1 %v5627_v1  ;;  %4721 = vmatprep.subr.bf16.mxu0 %v5627_v1  ;;  %v1068_v63 = vld [vmem:[#allocation2 + $0xa8] sm:$0xff]  ;;  %v1069_v3 = vld [vmem:[#allocation2 + $0xb0] sm:$0xff]  ;;  %v1020_v4 = vld [vmem:[#allocation2 + $0x98] sm:$0xff] }
 0x23f   :  { %v1070_v5 = vld [vmem:[#allocation2 + $0xb8] sm:$0xff]  ;;  %v1117_v8 = vld [vmem:[#allocation2 + $0xc0] sm:$0xff]  ;;  %v1118_v11 = vld [vmem:[#allocation2 + $0xc8] sm:$0xff] }
 0x240   :  { %v1167_v10 = vld [vmem:[#allocation2 + $0xe0] sm:$0xff]  ;;  %v1168_v12 = vld [vmem:[#allocation2 + $0xe8] sm:$0xff]  ;;  %v1119_v13 = vld [vmem:[#allocation2 + $0xd0] sm:$0xff] }
 0x241   :  { %4710 = vmatpush3.bf16.msra.mxu1 %v818_v52  ;;  %4722 = vmatpush3.bf16.msra.mxu0 %v867_v15  ;;  %v1169_v14 = vld [vmem:[#allocation2 + $0xf0] sm:$0xff]  ;;  %v1120_v17 = vld [vmem:[#allocation2 + $0xd8] sm:$0xff]  ;;  %v1217_v27 = vld [vmem:[#allocation2 + $0x100] sm:$0xff] }
 0x242   :  { %4711 = vmatprep.subr.bf16.mxu1 %v5627_v1  ;;  %4723 = vmatprep.subr.bf16.mxu0 %v5627_v1  ;;  %v1170_v19 = vld [vmem:[#allocation2 + $0xf8] sm:$0xff]  ;;  %v1267_v29 = vld [vmem:[#allocation2 + $0x120] sm:$0xff]  ;;  %v1218_v9 = vld [vmem:[#allocation2 + $0x108] sm:$0xff] }
 0x243   :  { %v1268_v30 = vld [vmem:[#allocation2 + $0x128] sm:$0xff]  ;;  %v1219_v32 = vld [vmem:[#allocation2 + $0x110] sm:$0xff]  ;;  %v1220_v34 = vld [vmem:[#allocation2 + $0x118] sm:$0xff] }
 0x244   :  { %v1269_v33 = vld [vmem:[#allocation2 + $0x130] sm:$0xff]  ;;  %v1270_v35 = vld [vmem:[#allocation2 + $0x138] sm:$0xff]  ;;  %v1317_v38 = vld [vmem:[#allocation2 + $0x140] sm:$0xff] }
 0x245   :  { %4712 = vmatpush3.bf16.msra.mxu1 %v819_v54  ;;  %4724 = vmatpush3.bf16.msra.mxu0 %v868_v55  ;;  %v1367_v39 = vld [vmem:[#allocation2 + $0x160] sm:$0xff]  ;;  %v1318_v41 = vld [vmem:[#allocation2 + $0x148] sm:$0xff]  ;;  %v1319_v44 = vld [vmem:[#allocation2 + $0x150] sm:$0xff] }
 0x246   :  { %4729 = vmatprep.subr.bf16.mxu1 %v5627_v1  ;;  %4741 = vmatprep.subr.bf16.mxu0 %v5627_v1  ;;  %v1368_v43 = vld [vmem:[#allocation2 + $0x168] sm:$0xff]  ;;  %v1369_v45 = vld [vmem:[#allocation2 + $0x170] sm:$0xff]  ;;  %v1320_v46 = vld [vmem:[#allocation2 + $0x158] sm:$0xff] }
 0x247   :  { %v1370_v47 = vld [vmem:[#allocation2 + $0x178] sm:$0xff]  ;;  %v1417_v50 = vld [vmem:[#allocation2 + $0x180] sm:$0xff]  ;;  %v1418_v52 = vld [vmem:[#allocation2 + $0x188] sm:$0xff] }
 0x248   :  { %4714 = vmatmul.mubr.msk.bf16.vlgmr.msra.gmra.mrb[8].mxu1 %vm464_vm4, %v5891_v23  ;;  %4726 = vmatmul.mubr.msk.bf16.vlgmr.msra.gmra.mrb[16].mxu0 %vm464_vm4, %v5918_v16  ;;  %v1467_v51 = vld [vmem:[#allocation2 + $0x1a0] sm:$0xff]  ;;  %v1468_v15 = vld [vmem:[#allocation2 + $0x1a8] sm:$0xff]  ;;  %v1419_v54 = vld [vmem:[#allocation2 + $0x190] sm:$0xff] }
 0x249   :  { %4730 = vmatpush3.bf16.msra.mxu1 %v916_v56  ;;  %4742 = vmatpush3.bf16.msra.mxu0 %v967_v57  ;;  %v1469_v55 = vld [vmem:[#allocation2 + $0x1b0] sm:$0xff]  ;;  %v1420_v56 = vld [vmem:[#allocation2 + $0x198] sm:$0xff] }
 0x24a   :  { %4731 = vmatprep.subr.bf16.mxu1 %v5627_v1  ;;  %4743 = vmatprep.subr.bf16.mxu0 %v5627_v1  ;;  %v1470_v57 = vld [vmem:[#allocation2 + $0x1b8] sm:$0xff] }
 0x24b   :  { %4737 = vmatprep.mubr.msk.bf16.mxu1 %vm5626_vm0, %v5627_v1  ;;  %4749 = vmatprep.mubr.msk.bf16.mxu0 %vm5626_vm0, %v5627_v1 }
 0x24d   :  { %4732 = vmatpush3.bf16.msra.mxu1 %v917_v18  ;;  %4744 = vmatpush3.bf16.msra.mxu0 %v968_v58  ;;  %v1421_v18 = vrot.slane %v5891_v23, 6  ;;  %v1471_v58 = vrot.slane %v5918_v16, 6 }
 0x24e   :  { %4733 = vmatprep.subr.bf16.mxu1 %v5627_v1  ;;  %4745 = vmatprep.subr.bf16.mxu0 %v5627_v1 }
 0x251   :  { %4734 = vmatpush3.bf16.msra.mxu1 %v918_v59  ;;  %4746 = vmatpush3.bf16.msra.mxu0 %v969_v20  ;;  %v1517_v59 = vld [vmem:[#allocation2 + $0x1c0] sm:$0xff] }
 0x252   :  { %4735 = vmatprep.subr.bf16.mxu1 %v5627_v1  ;;  %4747 = vmatprep.subr.bf16.mxu0 %v5627_v1  ;;  %v1567_v20 = vld [vmem:[#allocation2 + $0x1e0] sm:$0xff] }
 0x255   :  { %4736 = vmatpush3.bf16.msra.mxu1 %v919_v60  ;;  %4748 = vmatpush3.bf16.msra.mxu0 %v970_v24  ;;  %v1518_v60 = vld [vmem:[#allocation2 + $0x1c8] sm:$0xff] }
 0x256   :  { %4753 = vmatprep.subr.bf16.mxu1 %v5627_v1  ;;  %4765 = vmatprep.subr.bf16.mxu0 %v5627_v1  ;;  %v1568_v24 = vld [vmem:[#allocation2 + $0x1e8] sm:$0xff] }
 0x258   :  { %4738 = vmatmul.mubr.msk.bf16.vlgmr.msra.gmra.mrb[12].mxu1 %vm464_vm4, %v921_v26  ;;  %4750 = vmatmul.mubr.msk.bf16.vlgmr.msra.gmra.mrb[20].mxu0 %vm464_vm4, %v971_v28  ;;  %v1519_v26 = vld [vmem:[#allocation2 + $0x1d0] sm:$0xff] }
 0x259   :  { %4754 = vmatpush3.bf16.msra.mxu1 %v1017_v61  ;;  %4766 = vmatpush3.bf16.msra.mxu0 %v1067_v62  ;;  %v1569_v28 = vld [vmem:[#allocation2 + $0x1f0] sm:$0xff]  ;;  %v1520_v61 = vld [vmem:[#allocation2 + $0x1d8] sm:$0xff] }
 0x25a   :  { %4755 = vmatprep.subr.bf16.mxu1 %v5627_v1  ;;  %4767 = vmatprep.subr.bf16.mxu0 %v5627_v1  ;;  %v1570_v62 = vld [vmem:[#allocation2 + $0x1f8] sm:$0xff] }
 0x25b   :  { %4761 = vmatprep.mubr.msk.bf16.mxu1 %vm5626_vm0, %v5627_v1  ;;  %4773 = vmatprep.mubr.msk.bf16.mxu0 %vm5626_vm0, %v5627_v1 }
 0x25d   :  { %4756 = vmatpush3.bf16.msra.mxu1 %v1018_v53  ;;  %4768 = vmatpush3.bf16.msra.mxu0 %v1068_v63  ;;  %v1521_v53 = vrot.slane %v5891_v23, 7  ;;  %v1571_v63 = vrot.slane %v5918_v16, 7  ;;  %v1618_v23 = vld [vmem:[#allocation2 + $0x208] sm:$0xff] }
 0x25e   :  { %4757 = vmatprep.subr.bf16.mxu1 %v5627_v1  ;;  %4769 = vmatprep.subr.bf16.mxu0 %v5627_v1  ;;  %v1667_v16 = vld [vmem:[#allocation2 + $0x228] sm:$0xff] }
 0x261   :  { %4758 = vmatpush3.bf16.msra.mxu1 %v1019_v2  ;;  %4770 = vmatpush3.bf16.msra.mxu0 %v1069_v3  ;;  %v1617_v2 = vld [vmem:[#allocation2 + $0x200] sm:$0xff] }
 0x262   :  { %4759 = vmatprep.subr.bf16.mxu1 %v5627_v1  ;;  %4771 = vmatprep.subr.bf16.mxu0 %v5627_v1  ;;  %v1666_v3 = vld [vmem:[#allocation2 + $0x220] sm:$0xff] }
 0x265   :  { %4760 = vmatpush3.bf16.msra.mxu1 %v1020_v4  ;;  %4772 = vmatpush3.bf16.msra.mxu0 %v1070_v5  ;;  %v1619_v4 = vld [vmem:[#allocation2 + $0x210] sm:$0xff] }
 0x266   :  { %4777 = vmatprep.subr.bf16.mxu1 %v5627_v1  ;;  %4789 = vmatprep.subr.bf16.mxu0 %v5627_v1  ;;  %v1668_v5 = vld [vmem:[#allocation2 + $0x230] sm:$0xff] }
 0x268   :  { %4762 = vmatmul.mubr.msk.bf16.vlgmr.msra.gmra.mrb[16].mxu1 %vm464_vm4, %v1021_v6  ;;  %4774 = vmatmul.mubr.msk.bf16.vlgmr.msra.gmra.mrb[24].mxu0 %vm464_vm4, %v1071_v7  ;;  %v1620_v6 = vld [vmem:[#allocation2 + $0x218] sm:$0xff] }
 0x269   :  { %4778 = vmatpush3.bf16.msra.mxu1 %v1117_v8  ;;  %4790 = vmatpush3.bf16.msra.mxu0 %v1167_v10  ;;  %v1669_v7 = vld [vmem:[#allocation2 + $0x238] sm:$0xff]  ;;  %v6049_v8 = vshrl.u32 %v5895_v31, 16  ;;  %v1717_v10 = vld [vmem:[#allocation2 + $0x240] sm:$0xff] }
 0x26a   :  { %4779 = vmatprep.subr.bf16.mxu1 %v5627_v1  ;;  %4791 = vmatprep.subr.bf16.mxu0 %v5627_v1 }
 0x26b   :  { %4785 = vmatprep.mubr.msk.bf16.mxu1 %vm5626_vm0, %v5627_v1  ;;  %4797 = vmatprep.mubr.msk.bf16.mxu0 %vm5626_vm0, %v5627_v1 }
 0x26d   :  { %4780 = vmatpush3.bf16.msra.mxu1 %v1118_v11  ;;  %4792 = vmatpush3.bf16.msra.mxu0 %v1168_v12  ;;  %v1768_v11 = vld [vmem:[#allocation2 + $0x260] sm:$0xff]  ;;  %v1718_v12 = vld [vmem:[#allocation2 + $0x248] sm:$0xff] }
 0x26e   :  { %4781 = vmatprep.subr.bf16.mxu1 %v5627_v1  ;;  %4793 = vmatprep.subr.bf16.mxu0 %v5627_v1 }
 0x271   :  { %4782 = vmatpush3.bf16.msra.mxu1 %v1119_v13  ;;  %4794 = vmatpush3.bf16.msra.mxu0 %v1169_v14  ;;  %v1769_v13 = vld [vmem:[#allocation2 + $0x268] sm:$0xff]  ;;  %v1719_v14 = vld [vmem:[#allocation2 + $0x250] sm:$0xff] }
 0x272   :  { %4783 = vmatprep.subr.bf16.mxu1 %v5627_v1  ;;  %4795 = vmatprep.subr.bf16.mxu0 %v5627_v1 }
 0x275   :  { %4784 = vmatpush3.bf16.msra.mxu1 %v1120_v17  ;;  %4796 = vmatpush3.bf16.msra.mxu0 %v1170_v19  ;;  %v1770_v17 = vld [vmem:[#allocation2 + $0x270] sm:$0xff]  ;;  %v1720_v19 = vld [vmem:[#allocation2 + $0x258] sm:$0xff] }
 0x276   :  { %4801 = vmatprep.subr.bf16.mxu1 %v5627_v1  ;;  %4813 = vmatprep.subr.bf16.mxu0 %v5627_v1 }
 0x278   :  { %4786 = vmatmul.mubr.msk.bf16.vlgmr.msra.gmra.mrb[20].mxu1 %vm464_vm4, %v1121_v21  ;;  %4798 = vmatmul.mubr.msk.bf16.vlgmr.msra.gmra.mrb[28].mxu0 %vm464_vm4, %v1171_v25  ;;  %v1771_v21 = vld [vmem:[#allocation2 + $0x278] sm:$0xff]  ;;  %v1722_v25 = vrot.slane %v5895_v31, 1 }
 0x279   :  { %4802 = vmatpush3.bf16.msra.mxu1 %v1217_v27  ;;  %4814 = vmatpush3.bf16.msra.mxu0 %v1267_v29  ;;  %v1772_v27 = vrot.slane %v6049_v8, 1  ;;  %v1818_v29 = vld [vmem:[#allocation2 + $0x280] sm:$0xff] }
 0x27a   :  { %4803 = vmatprep.subr.bf16.mxu1 %v5627_v1  ;;  %4815 = vmatprep.subr.bf16.mxu0 %v5627_v1 }
 0x27b   :  { %4809 = vmatprep.mubr.msk.bf16.mxu1 %vm5626_vm0, %v5627_v1  ;;  %4821 = vmatprep.mubr.msk.bf16.mxu0 %vm5626_vm0, %v5627_v1 }
 0x27d   :  { %4804 = vmatpush3.bf16.msra.mxu1 %v1218_v9  ;;  %4816 = vmatpush3.bf16.msra.mxu0 %v1268_v30  ;;  %v1868_v9 = vld [vmem:[#allocation2 + $0x2a0] sm:$0xff]  ;;  %v1819_v30 = vld [vmem:[#allocation2 + $0x288] sm:$0xff] }
 0x27e   :  { %4805 = vmatprep.subr.bf16.mxu1 %v5627_v1  ;;  %4817 = vmatprep.subr.bf16.mxu0 %v5627_v1 }
 0x281   :  { %4806 = vmatpush3.bf16.msra.mxu1 %v1219_v32  ;;  %4818 = vmatpush3.bf16.msra.mxu0 %v1269_v33  ;;  %v1869_v32 = vld [vmem:[#allocation2 + $0x2a8] sm:$0xff]  ;;  %v1820_v33 = vld [vmem:[#allocation2 + $0x290] sm:$0xff] }
 0x282   :  { %4807 = vmatprep.subr.bf16.mxu1 %v5627_v1  ;;  %4819 = vmatprep.subr.bf16.mxu0 %v5627_v1 }
 0x285   :  { %4808 = vmatpush3.bf16.msra.mxu1 %v1220_v34  ;;  %4820 = vmatpush3.bf16.msra.mxu0 %v1270_v35  ;;  %v1870_v34 = vld [vmem:[#allocation2 + $0x2b0] sm:$0xff]  ;;  %v1821_v35 = vld [vmem:[#allocation2 + $0x298] sm:$0xff] }
 0x286   :  { %4825 = vmatprep.subr.bf16.mxu1 %v5627_v1  ;;  %4837 = vmatprep.subr.bf16.mxu0 %v5627_v1 }
 0x288   :  { %4810 = vmatmul.mubr.msk.bf16.vlgmr.msra.gmra.mrb[24].mxu1 %vm464_vm4, %v1221_v36  ;;  %4822 = vmatmul.mubr.msk.bf16.vlgmr.msra.gmra.mrb[32].mxu0 %vm464_vm4, %v1271_v37  ;;  %v1871_v36 = vld [vmem:[#allocation2 + $0x2b8] sm:$0xff]  ;;  %v1822_v37 = vrot.slane %v5895_v31, 2 }
 0x289   :  { %4826 = vmatpush3.bf16.msra.mxu1 %v1317_v38  ;;  %4838 = vmatpush3.bf16.msra.mxu0 %v1367_v39  ;;  %v1872_v38 = vrot.slane %v6049_v8, 2  ;;  %v1918_v39 = vld [vmem:[#allocation2 + $0x2c0] sm:$0xff] }
 0x28a   :  { %4827 = vmatprep.subr.bf16.mxu1 %v5627_v1  ;;  %4839 = vmatprep.subr.bf16.mxu0 %v5627_v1 }
 0x28b   :  { %4833 = vmatprep.mubr.msk.bf16.mxu1 %vm5626_vm0, %v5627_v1  ;;  %4845 = vmatprep.mubr.msk.bf16.mxu0 %vm5626_vm0, %v5627_v1 }
 0x28d   :  { %4828 = vmatpush3.bf16.msra.mxu1 %v1318_v41  ;;  %4840 = vmatpush3.bf16.msra.mxu0 %v1368_v43  ;;  %v1968_v41 = vld [vmem:[#allocation2 + $0x2e0] sm:$0xff]  ;;  %v1919_v43 = vld [vmem:[#allocation2 + $0x2c8] sm:$0xff] }
 0x28e   :  { %4829 = vmatprep.subr.bf16.mxu1 %v5627_v1  ;;  %4841 = vmatprep.subr.bf16.mxu0 %v5627_v1 }
 0x291   :  { %4830 = vmatpush3.bf16.msra.mxu1 %v1319_v44  ;;  %4842 = vmatpush3.bf16.msra.mxu0 %v1369_v45  ;;  %v1969_v44 = vld [vmem:[#allocation2 + $0x2e8] sm:$0xff]  ;;  %v1920_v45 = vld [vmem:[#allocation2 + $0x2d0] sm:$0xff] }
 0x292   :  { %4831 = vmatprep.subr.bf16.mxu1 %v5627_v1  ;;  %4843 = vmatprep.subr.bf16.mxu0 %v5627_v1 }
 0x295   :  { %4832 = vmatpush3.bf16.msra.mxu1 %v1320_v46  ;;  %4844 = vmatpush3.bf16.msra.mxu0 %v1370_v47  ;;  %v1970_v46 = vld [vmem:[#allocation2 + $0x2f0] sm:$0xff]  ;;  %v1921_v47 = vld [vmem:[#allocation2 + $0x2d8] sm:$0xff] }
 0x296   :  { %4849 = vmatprep.subr.bf16.mxu1 %v5627_v1  ;;  %4861 = vmatprep.subr.bf16.mxu0 %v5627_v1 }
 0x298   :  { %4834 = vmatmul.mubr.msk.bf16.vlgmr.msra.gmra.mrb[28].mxu1 %vm464_vm4, %v1321_v42  ;;  %4846 = vmatmul.mubr.msk.bf16.vlgmr.msra.gmra.mrb[36].mxu0 %vm464_vm4, %v1371_v49  ;;  %v1971_v42 = vld [vmem:[#allocation2 + $0x2f8] sm:$0xff]  ;;  %v1922_v49 = vrot.slane %v5895_v31, 3 }
 0x299   :  { %4850 = vmatpush3.bf16.msra.mxu1 %v1417_v50  ;;  %4862 = vmatpush3.bf16.msra.mxu0 %v1467_v51  ;;  %v1972_v50 = vrot.slane %v6049_v8, 3  ;;  %v2018_v51 = vld [vmem:[#allocation2 + $0x300] sm:$0xff] }
 0x29a   :  { %4851 = vmatprep.subr.bf16.mxu1 %v5627_v1  ;;  %4863 = vmatprep.subr.bf16.mxu0 %v5627_v1 }
 0x29b   :  { %4857 = vmatprep.mubr.msk.bf16.mxu1 %vm5626_vm0, %v5627_v1  ;;  %4869 = vmatprep.mubr.msk.bf16.mxu0 %vm5626_vm0, %v5627_v1 }
 0x29d   :  { %4852 = vmatpush3.bf16.msra.mxu1 %v1418_v52  ;;  %4864 = vmatpush3.bf16.msra.mxu0 %v1468_v15  ;;  %v2068_v52 = vld [vmem:[#allocation2 + $0x320] sm:$0xff]  ;;  %v2019_v15 = vld [vmem:[#allocation2 + $0x308] sm:$0xff] }
 0x29e   :  { %4853 = vmatprep.subr.bf16.mxu1 %v5627_v1  ;;  %4865 = vmatprep.subr.bf16.mxu0 %v5627_v1 }
 0x2a1   :  { %4854 = vmatpush3.bf16.msra.mxu1 %v1419_v54  ;;  %4866 = vmatpush3.bf16.msra.mxu0 %v1469_v55  ;;  %v2069_v54 = vld [vmem:[#allocation2 + $0x328] sm:$0xff]  ;;  %v2020_v55 = vld [vmem:[#allocation2 + $0x310] sm:$0xff] }
 0x2a2   :  { %4855 = vmatprep.subr.bf16.mxu1 %v5627_v1  ;;  %4867 = vmatprep.subr.bf16.mxu0 %v5627_v1 }
 0x2a5   :  { %4856 = vmatpush3.bf16.msra.mxu1 %v1420_v56  ;;  %4868 = vmatpush3.bf16.msra.mxu0 %v1470_v57  ;;  %v2070_v56 = vld [vmem:[#allocation2 + $0x330] sm:$0xff]  ;;  %v2021_v57 = vld [vmem:[#allocation2 + $0x318] sm:$0xff] }
 0x2a6   :  { %4873 = vmatprep.subr.bf16.mxu1 %v5627_v1  ;;  %4885 = vmatprep.subr.bf16.mxu0 %v5627_v1 }
 0x2a8   :  { %4858 = vmatmul.mubr.msk.bf16.vlgmr.msra.gmra.mrb[32].mxu1 %vm464_vm4, %v1421_v18  ;;  %4870 = vmatmul.mubr.msk.bf16.vlgmr.msra.gmra.mrb[40].mxu0 %vm464_vm4, %v1471_v58  ;;  %v2071_v18 = vld [vmem:[#allocation2 + $0x338] sm:$0xff]  ;;  %v2022_v58 = vrot.slane %v5895_v31, 4 }
 0x2a9   :  { %4874 = vmatpush3.bf16.msra.mxu1 %v1517_v59  ;;  %4886 = vmatpush3.bf16.msra.mxu0 %v1567_v20  ;;  %v2072_v59 = vrot.slane %v6049_v8, 4  ;;  %v2118_v20 = vld [vmem:[#allocation2 + $0x340] sm:$0xff] }
 0x2aa   :  { %4875 = vmatprep.subr.bf16.mxu1 %v5627_v1  ;;  %4887 = vmatprep.subr.bf16.mxu0 %v5627_v1 }
 0x2ab   :  { %4881 = vmatprep.mubr.msk.bf16.mxu1 %vm5626_vm0, %v5627_v1  ;;  %4893 = vmatprep.mubr.msk.bf16.mxu0 %vm5626_vm0, %v5627_v1 }
 0x2ad   :  { %4876 = vmatpush3.bf16.msra.mxu1 %v1518_v60  ;;  %4888 = vmatpush3.bf16.msra.mxu0 %v1568_v24  ;;  %v2168_v60 = vld [vmem:[#allocation2 + $0x360] sm:$0xff]  ;;  %v2119_v24 = vld [vmem:[#allocation2 + $0x348] sm:$0xff] }
 0x2ae   :  { %4877 = vmatprep.subr.bf16.mxu1 %v5627_v1  ;;  %4889 = vmatprep.subr.bf16.mxu0 %v5627_v1 }
 0x2b1   :  { %4878 = vmatpush3.bf16.msra.mxu1 %v1519_v26  ;;  %4890 = vmatpush3.bf16.msra.mxu0 %v1569_v28  ;;  %v2169_v26 = vld [vmem:[#allocation2 + $0x368] sm:$0xff]  ;;  %v2120_v28 = vld [vmem:[#allocation2 + $0x350] sm:$0xff] }
 0x2b2   :  { %4879 = vmatprep.subr.bf16.mxu1 %v5627_v1  ;;  %4891 = vmatprep.subr.bf16.mxu0 %v5627_v1 }
 0x2b5   :  { %4880 = vmatpush3.bf16.msra.mxu1 %v1520_v61  ;;  %4892 = vmatpush3.bf16.msra.mxu0 %v1570_v62  ;;  %v2170_v61 = vld [vmem:[#allocation2 + $0x370] sm:$0xff]  ;;  %v2121_v62 = vld [vmem:[#allocation2 + $0x358] sm:$0xff] }
 0x2b6   :  { %4897 = vmatprep.subr.bf16.mxu1 %v5627_v1  ;;  %4909 = vmatprep.subr.bf16.mxu0 %v5627_v1 }
 0x2b8   :  { %4882 = vmatmul.mubr.msk.bf16.vlgmr.msra.gmra.mrb[36].mxu1 %vm464_vm4, %v1521_v53  ;;  %4894 = vmatmul.mubr.msk.bf16.vlgmr.msra.gmra.mrb[44].mxu0 %vm464_vm4, %v1571_v63  ;;  %v2171_v53 = vld [vmem:[#allocation2 + $0x378] sm:$0xff]  ;;  %v2122_v63 = vrot.slane %v5895_v31, 5 }
 0x2b9   :  { %4898 = vmatpush3.bf16.msra.mxu1 %v1617_v2  ;;  %4910 = vmatpush3.bf16.msra.mxu0 %v1666_v3  ;;  %v2172_v2 = vrot.slane %v6049_v8, 5  ;;  %v2218_v3 = vld [vmem:[#allocation2 + $0x380] sm:$0xff] }
 0x2ba   :  { %4899 = vmatprep.subr.bf16.mxu1 %v5627_v1  ;;  %4911 = vmatprep.subr.bf16.mxu0 %v5627_v1 }
 0x2bb   :  { %4905 = vmatprep.mubr.msk.bf16.mxu1 %vm5626_vm0, %v5627_v1  ;;  %4917 = vmatprep.mubr.msk.bf16.mxu0 %vm5626_vm0, %v5627_v1 }
 0x2bd   :  { %4900 = vmatpush3.bf16.msra.mxu1 %v1618_v23  ;;  %4912 = vmatpush3.bf16.msra.mxu0 %v1667_v16  ;;  %v2268_v23 = vld [vmem:[#allocation2 + $0x3a0] sm:$0xff]  ;;  %v2219_v16 = vld [vmem:[#allocation2 + $0x388] sm:$0xff] }
 0x2be   :  { %4901 = vmatprep.subr.bf16.mxu1 %v5627_v1  ;;  %4913 = vmatprep.subr.bf16.mxu0 %v5627_v1 }
 0x2c1   :  { %4902 = vmatpush3.bf16.msra.mxu1 %v1619_v4  ;;  %4914 = vmatpush3.bf16.msra.mxu0 %v1668_v5  ;;  %v2269_v4 = vld [vmem:[#allocation2 + $0x3a8] sm:$0xff] }
 0x2c2   :  { %4903 = vmatprep.subr.bf16.mxu1 %v5627_v1  ;;  %4915 = vmatprep.subr.bf16.mxu0 %v5627_v1 }
 0x2c5   :  { %4904 = vmatpush3.bf16.msra.mxu1 %v1620_v6  ;;  %4916 = vmatpush3.bf16.msra.mxu0 %v1669_v7 }
 0x2c6   :  { %4921 = vmatprep.subr.bf16.mxu1 %v5627_v1  ;;  %4933 = vmatprep.subr.bf16.mxu0 %v5627_v1 }
 0x2c8   :  { %4906 = vmatmul.mubr.msk.bf16.vlgmr.msra.gmra.mrb[40].mxu1 %vm464_vm4, %v5895_v31  ;;  %4918 = vmatmul.mubr.msk.bf16.vlgmr.msra.gmra.mrb[48].mxu0 %vm464_vm4, %v6049_v8 }
 0x2c9   :  { %4922 = vmatpush3.bf16.msra.mxu1 %v1717_v10  ;;  %4934 = vmatpush3.bf16.msra.mxu0 %v1768_v11 }
 0x2ca   :  { %4923 = vmatprep.subr.bf16.mxu1 %v5627_v1  ;;  %4935 = vmatprep.subr.bf16.mxu0 %v5627_v1 }
 0x2cb   :  { %4929 = vmatprep.mubr.msk.bf16.mxu1 %vm5626_vm0, %v5627_v1  ;;  %4941 = vmatprep.mubr.msk.bf16.mxu0 %vm5626_vm0, %v5627_v1 }
 0x2cd   :  { %4924 = vmatpush3.bf16.msra.mxu1 %v1718_v12  ;;  %4936 = vmatpush3.bf16.msra.mxu0 %v1769_v13 }
 0x2ce   :  { %4925 = vmatprep.subr.bf16.mxu1 %v5627_v1  ;;  %4937 = vmatprep.subr.bf16.mxu0 %v5627_v1 }
 0x2d1   :  { %4926 = vmatpush3.bf16.msra.mxu1 %v1719_v14  ;;  %4938 = vmatpush3.bf16.msra.mxu0 %v1770_v17  ;;  %v2220_v17 = vld [vmem:[#allocation2 + $0x390] sm:$0xff] }
 0x2d2   :  { %4927 = vmatprep.subr.bf16.mxu1 %v5627_v1  ;;  %4939 = vmatprep.subr.bf16.mxu0 %v5627_v1 }
 0x2d5   :  { %4928 = vmatpush3.bf16.msra.mxu1 %v1720_v19  ;;  %4940 = vmatpush3.bf16.msra.mxu0 %v1771_v21  ;;  %v2270_v19 = vld [vmem:[#allocation2 + $0x3b0] sm:$0xff]  ;;  %v2221_v21 = vld [vmem:[#allocation2 + $0x398] sm:$0xff] }
 0x2d6   :  { %4945 = vmatprep.subr.bf16.mxu1 %v5627_v1  ;;  %4957 = vmatprep.subr.bf16.mxu0 %v5627_v1 }
 0x2d8   :  { %4930 = vmatmul.mubr.msk.bf16.vlgmr.msra.gmra.mrb[44].mxu1 %vm464_vm4, %v1722_v25  ;;  %4942 = vmatmul.mubr.msk.bf16.vlgmr.msra.gmra.mrb[52].mxu0 %vm464_vm4, %v1772_v27  ;;  %v2271_v25 = vld [vmem:[#allocation2 + $0x3b8] sm:$0xff]  ;;  %v2222_v27 = vrot.slane %v5895_v31, 6 }
 0x2d9   :  { %4946 = vmatpush3.bf16.msra.mxu1 %v1818_v29  ;;  %4958 = vmatpush3.bf16.msra.mxu0 %v1868_v9  ;;  %v2272_v29 = vrot.slane %v6049_v8, 6  ;;  %v2318_v9 = vld [vmem:[#allocation2 + $0x3c0] sm:$0xff] }
 0x2da   :  { %4947 = vmatprep.subr.bf16.mxu1 %v5627_v1  ;;  %4959 = vmatprep.subr.bf16.mxu0 %v5627_v1 }
 0x2db   :  { %4953 = vmatprep.mubr.msk.bf16.mxu1 %vm5626_vm0, %v5627_v1  ;;  %4965 = vmatprep.mubr.msk.bf16.mxu0 %vm5626_vm0, %v5627_v1 }
 0x2dd   :  { %4948 = vmatpush3.bf16.msra.mxu1 %v1819_v30  ;;  %4960 = vmatpush3.bf16.msra.mxu0 %v1869_v32  ;;  %v2368_v30 = vld [vmem:[#allocation2 + $0x3e0] sm:$0xff]  ;;  %v2319_v32 = vld [vmem:[#allocation2 + $0x3c8] sm:$0xff] }
 0x2de   :  { %4949 = vmatprep.subr.bf16.mxu1 %v5627_v1  ;;  %4961 = vmatprep.subr.bf16.mxu0 %v5627_v1 }
 0x2e1   :  { %4950 = vmatpush3.bf16.msra.mxu1 %v1820_v33  ;;  %4962 = vmatpush3.bf16.msra.mxu0 %v1870_v34  ;;  %v2369_v33 = vld [vmem:[#allocation2 + $0x3e8] sm:$0xff] }
 0x2e2   :  { %4951 = vmatprep.subr.bf16.mxu1 %v5627_v1  ;;  %4963 = vmatprep.subr.bf16.mxu0 %v5627_v1 }
 0x2e5   :  { %4952 = vmatpush3.bf16.msra.mxu1 %v1821_v35  ;;  %4964 = vmatpush3.bf16.msra.mxu0 %v1871_v36 }
 0x2e6   :  { %4969 = vmatprep.subr.bf16.mxu1 %v5627_v1  ;;  %4981 = vmatprep.subr.bf16.mxu0 %v5627_v1 }
 0x2e8   :  { %4954 = vmatmul.mubr.msk.bf16.vlgmr.msra.gmra.mrb[48].mxu1 %vm464_vm4, %v1822_v37  ;;  %4966 = vmatmul.mubr.msk.bf16.vlgmr.msra.gmra.mrb[56].mxu0 %vm464_vm4, %v1872_v38 }
 0x2e9   :  { %4970 = vmatpush3.bf16.msra.mxu1 %v1918_v39  ;;  %4982 = vmatpush3.bf16.msra.mxu0 %v1968_v41 }
 0x2ea   :  { %4971 = vmatprep.subr.bf16.mxu1 %v5627_v1  ;;  %4983 = vmatprep.subr.bf16.mxu0 %v5627_v1 }
 0x2eb   :  { %4977 = vmatprep.mubr.msk.bf16.mxu1 %vm5626_vm0, %v5627_v1  ;;  %4989 = vmatprep.mubr.msk.bf16.mxu0 %vm5626_vm0, %v5627_v1 }
 0x2ed   :  { %4972 = vmatpush3.bf16.msra.mxu1 %v1919_v43  ;;  %4984 = vmatpush3.bf16.msra.mxu0 %v1969_v44  ;;  %v2320_v44 = vld [vmem:[#allocation2 + $0x3d0] sm:$0xff] }
 0x2ee   :  { %4973 = vmatprep.subr.bf16.mxu1 %v5627_v1  ;;  %4985 = vmatprep.subr.bf16.mxu0 %v5627_v1 }
 0x2f1   :  { %4974 = vmatpush3.bf16.msra.mxu1 %v1920_v45  ;;  %4986 = vmatpush3.bf16.msra.mxu0 %v1970_v46  ;;  %v2370_v45 = vld [vmem:[#allocation2 + $0x3f0] sm:$0xff]  ;;  %v2321_v46 = vld [vmem:[#allocation2 + $0x3d8] sm:$0xff] }
 0x2f2   :  { %4975 = vmatprep.subr.bf16.mxu1 %v5627_v1  ;;  %4987 = vmatprep.subr.bf16.mxu0 %v5627_v1 }
 0x2f5   :  { %4976 = vmatpush3.bf16.msra.mxu1 %v1921_v47  ;;  %4988 = vmatpush3.bf16.msra.mxu0 %v1971_v42  ;;  %v2371_v47 = vld [vmem:[#allocation2 + $0x3f8] sm:$0xff]  ;;  %v2322_v42 = vrot.slane %v5895_v31, 7 }
 0x2f6   :  { %4993 = vmatprep.subr.bf16.mxu1 %v5627_v1  ;;  %5005 = vmatprep.subr.bf16.mxu0 %v5627_v1 }
 0x2f8   :  { %4978 = vmatmul.mubr.msk.bf16.vlgmr.msra.gmra.mrb[52].mxu1 %vm464_vm4, %v1922_v49  ;;  %4990 = vmatmul.mubr.msk.bf16.vlgmr.msra.gmra.mrb[60].mxu0 %vm464_vm4, %v1972_v50  ;;  %v2372_v49 = vrot.slane %v6049_v8, 7 }
 0x2f9   :  { %4994 = vmatpush3.bf16.msra.mxu1 %v2018_v51  ;;  %5006 = vmatpush3.bf16.msra.mxu0 %v2068_v52 }
 0x2fa   :  { %4995 = vmatprep.subr.bf16.mxu1 %v5627_v1  ;;  %5007 = vmatprep.subr.bf16.mxu0 %v5627_v1 }
 0x2fb   :  { %5001 = vmatprep.mubr.msk.bf16.mxu1 %vm5626_vm0, %v5627_v1  ;;  %5013 = vmatprep.mubr.msk.bf16.mxu0 %vm5626_vm0, %v5627_v1 }
 0x2fd   :  { %4996 = vmatpush3.bf16.msra.mxu1 %v2019_v15  ;;  %5008 = vmatpush3.bf16.msra.mxu0 %v2069_v54 }
 0x2fe   :  { %4997 = vmatprep.subr.bf16.mxu1 %v5627_v1  ;;  %5009 = vmatprep.subr.bf16.mxu0 %v5627_v1 }
 0x301   :  { %4998 = vmatpush3.bf16.msra.mxu1 %v2020_v55  ;;  %5010 = vmatpush3.bf16.msra.mxu0 %v2070_v56 }
 0x302   :  { %4999 = vmatprep.subr.bf16.mxu1 %v5627_v1  ;;  %5011 = vmatprep.subr.bf16.mxu0 %v5627_v1 }
 0x305   :  { %5000 = vmatpush3.bf16.msra.mxu1 %v2021_v57  ;;  %5012 = vmatpush3.bf16.msra.mxu0 %v2071_v18 }
 0x306   :  { %5017 = vmatprep.subr.bf16.mxu1 %v5627_v1  ;;  %5029 = vmatprep.subr.bf16.mxu0 %v5627_v1 }
 0x308   :  { %5002 = vmatmul.mubr.msk.bf16.vlgmr.msra.gmra.mrb[56].mxu1 %vm464_vm4, %v2022_v58  ;;  %5014 = vmatmul.mubr.msk.bf16.vlgmr.msra.gmra.mrb[64].mxu0 %vm464_vm4, %v2072_v59 }
 0x309   :  { %5018 = vmatpush3.bf16.msra.mxu1 %v2118_v20  ;;  %5030 = vmatpush3.bf16.msra.mxu0 %v2168_v60 }
 0x30a   :  { %5019 = vmatprep.subr.bf16.mxu1 %v5627_v1  ;;  %5031 = vmatprep.subr.bf16.mxu0 %v5627_v1 }
 0x30b   :  { %5025 = vmatprep.mubr.msk.bf16.mxu1 %vm5626_vm0, %v5627_v1  ;;  %5037 = vmatprep.mubr.msk.bf16.mxu0 %vm5626_vm0, %v5627_v1 }
 0x30d   :  { %5020 = vmatpush3.bf16.msra.mxu1 %v2119_v24  ;;  %5032 = vmatpush3.bf16.msra.mxu0 %v2169_v26 }
 0x30e   :  { %5021 = vmatprep.subr.bf16.mxu1 %v5627_v1  ;;  %5033 = vmatprep.subr.bf16.mxu0 %v5627_v1 }
 0x311   :  { %5022 = vmatpush3.bf16.msra.mxu1 %v2120_v28  ;;  %5034 = vmatpush3.bf16.msra.mxu0 %v2170_v61 }
 0x312   :  { %5023 = vmatprep.subr.bf16.mxu1 %v5627_v1  ;;  %5035 = vmatprep.subr.bf16.mxu0 %v5627_v1 }
 0x315   :  { %5024 = vmatpush3.bf16.msra.mxu1 %v2121_v62  ;;  %5036 = vmatpush3.bf16.msra.mxu0 %v2171_v53 }
 0x316   :  { %5041 = vmatprep.subr.bf16.mxu1 %v5627_v1  ;;  %5053 = vmatprep.subr.bf16.mxu0 %v5627_v1 }
 0x318   :  { %5026 = vmatmul.mubr.msk.bf16.vlgmr.msra.gmra.mrb[60].mxu1 %vm464_vm4, %v2122_v63  ;;  %5038 = vmatmul.mubr.msk.bf16.vlgmr.msra.gmra.mrb[68].mxu0 %vm464_vm4, %v2172_v2 }
 0x319   :  { %5042 = vmatpush3.bf16.msra.mxu1 %v2218_v3  ;;  %5054 = vmatpush3.bf16.msra.mxu0 %v2268_v23 }
 0x31a   :  { %5043 = vmatprep.subr.bf16.mxu1 %v5627_v1  ;;  %5055 = vmatprep.subr.bf16.mxu0 %v5627_v1 }
 0x31b   :  { %v857_v5 = vpop.f32.mrb[8].mxu1  ;;  %v908_v6 = vpop.f32.mrb[16].mxu0  ;;  %5049 = vmatprep.mubr.msk.bf16.mxu1 %vm5626_vm0, %v5627_v1  ;;  %5061 = vmatprep.mubr.msk.bf16.mxu0 %vm5626_vm0, %v5627_v1 }
 0x31c   :  { %863 = vst [vmem:[#allocation4] sm:$0x1] %v857_v5  ;;  %914 = vst [vmem:[#allocation4 + $0x1] sm:$0x1] %v908_v6  ;;  %v4715_v7 = vpop.f32.mrb[9].mxu1  ;;  %v4727_v10 = vpop.f32.mrb[17].mxu0 }
 0x31d   :  { %v860_v11 = vpop.f32.mrb[10].mxu1  ;;  %v911_v12 = vpop.f32.mrb[18].mxu0  ;;  %5044 = vmatpush3.bf16.msra.mxu1 %v2219_v16  ;;  %5056 = vmatpush3.bf16.msra.mxu0 %v2269_v4 }
 0x31e   :  { %v4716_v13 = vpop.f32.mrb[11].mxu1  ;;  %v4728_v14 = vpop.f32.mrb[19].mxu0  ;;  %5045 = vmatprep.subr.bf16.mxu1 %v5627_v1  ;;  %5057 = vmatprep.subr.bf16.mxu0 %v5627_v1 }
 0x321   :  { %5046 = vmatpush3.bf16.msra.mxu1 %v2220_v17  ;;  %5058 = vmatpush3.bf16.msra.mxu0 %v2270_v19 }
 0x322   :  { %5047 = vmatprep.subr.bf16.mxu1 %v5627_v1  ;;  %5059 = vmatprep.subr.bf16.mxu0 %v5627_v1 }
 0x325   :  { %5048 = vmatpush3.bf16.msra.mxu1 %v2221_v21  ;;  %5060 = vmatpush3.bf16.msra.mxu0 %v2271_v25 }
 0x326   :  { %5065 = vmatprep.subr.bf16.mxu1 %v5627_v1  ;;  %5077 = vmatprep.subr.bf16.mxu0 %v5627_v1 }
 0x328   :  { %5050 = vmatmul.mubr.msk.bf16.vlgmr.msra.gmra.mrb[64].mxu1 %vm464_vm4, %v2222_v27  ;;  %5062 = vmatmul.mubr.msk.bf16.vlgmr.msra.gmra.mrb[72].mxu0 %vm464_vm4, %v2272_v29 }
 0x329   :  { %5066 = vmatpush3.bf16.msra.mxu1 %v2318_v9  ;;  %5078 = vmatpush3.bf16.msra.mxu0 %v2368_v30 }
 0x32a   :  { %5067 = vmatprep.subr.bf16.mxu1 %v5627_v1  ;;  %5079 = vmatprep.subr.bf16.mxu0 %v5627_v1 }
 0x32b   :  { %v959_v34 = vpop.f32.mrb[12].mxu1  ;;  %v1009_v35 = vpop.f32.mrb[20].mxu0  ;;  %5073 = vmatprep.mubr.msk.bf16.mxu1 %vm5626_vm0, %v5627_v1  ;;  %5085 = vmatprep.mubr.msk.bf16.mxu0 %vm5626_vm0, %v5627_v1 }
 0x32c   :  { %965 = vst [vmem:[#allocation4 + $0x2] sm:$0x1] %v959_v34  ;;  %1015 = vst [vmem:[#allocation4 + $0x3] sm:$0x1] %v1009_v35  ;;  %v4739_v36 = vpop.f32.mrb[13].mxu1  ;;  %v4751_v37 = vpop.f32.mrb[21].mxu0 }
 0x32d   :  { %v962_v38 = vpop.f32.mrb[14].mxu1  ;;  %v1012_v39 = vpop.f32.mrb[22].mxu0  ;;  %5068 = vmatpush3.bf16.msra.mxu1 %v2319_v32  ;;  %5080 = vmatpush3.bf16.msra.mxu0 %v2369_v33 }
 0x32e   :  { %v4740_v41 = vpop.f32.mrb[15].mxu1  ;;  %v4752_v43 = vpop.f32.mrb[23].mxu0  ;;  %5069 = vmatprep.subr.bf16.mxu1 %v5627_v1  ;;  %5081 = vmatprep.subr.bf16.mxu0 %v5627_v1 }
 0x331   :  { %5070 = vmatpush3.bf16.msra.mxu1 %v2320_v44  ;;  %5082 = vmatpush3.bf16.msra.mxu0 %v2370_v45 }
 0x332   :  { %5071 = vmatprep.subr.bf16.mxu1 %v5627_v1  ;;  %5083 = vmatprep.subr.bf16.mxu0 %v5627_v1 }
 0x335   :  { %5072 = vmatpush3.bf16.msra.mxu1 %v2321_v46  ;;  %5084 = vmatpush3.bf16.msra.mxu0 %v2371_v47 }
 0x338   :  { %5074 = vmatmul.mubr.msk.bf16.vlgmr.msra.gmra.mrb[68].mxu1 %vm464_vm4, %v2322_v42  ;;  %5086 = vmatmul.mubr.msk.bf16.vlgmr.msra.gmra.mrb[76].mxu0 %vm464_vm4, %v2372_v49 }
 0x33b   :  { %v1059_v50 = vpop.f32.mrb[16].mxu1  ;;  %v1109_v51 = vpop.f32.mrb[24].mxu0 }
 0x33c   :  { %1065 = vst [vmem:[#allocation4 + $0x4] sm:$0x1] %v1059_v50  ;;  %1115 = vst [vmem:[#allocation4 + $0x5] sm:$0x1] %v1109_v51  ;;  %v4763_v52 = vpop.f32.mrb[17].mxu1  ;;  %v4775_v15 = vpop.f32.mrb[25].mxu0 }
 0x33d   :  { %v1062_v54 = vpop.f32.mrb[18].mxu1  ;;  %v1112_v55 = vpop.f32.mrb[26].mxu0 }
 0x33e   :  { %v4764_v56 = vpop.f32.mrb[19].mxu1  ;;  %v4776_v57 = vpop.f32.mrb[27].mxu0 }
 0x34b   :  { %v1159_v18 = vpop.f32.mrb[20].mxu1  ;;  %v1209_v31 = vpop.f32.mrb[28].mxu0 }
 0x34c   :  { %1165 = vst [vmem:[#allocation4 + $0x6] sm:$0x1] %v1159_v18  ;;  %1215 = vst [vmem:[#allocation4 + $0x7] sm:$0x1] %v1209_v31  ;;  %v4787_v8 = vpop.f32.mrb[21].mxu1  ;;  %v4799_v58 = vpop.f32.mrb[29].mxu0 }
 0x34d   :  { %v1162_v59 = vpop.f32.mrb[22].mxu1  ;;  %v1212_v20 = vpop.f32.mrb[30].mxu0 }
 0x34e   :  { %v4788_v60 = vpop.f32.mrb[23].mxu1  ;;  %v4800_v24 = vpop.f32.mrb[31].mxu0 }
 0x35b   :  { %v1259_v26 = vpop.f32.mrb[24].mxu1  ;;  %v1309_v28 = vpop.f32.mrb[32].mxu0 }
 0x35c   :  { %1265 = vst [vmem:[#allocation4 + $0x8] sm:$0x1] %v1259_v26  ;;  %1315 = vst [vmem:[#allocation4 + $0x9] sm:$0x1] %v1309_v28  ;;  %v4811_v61 = vpop.f32.mrb[25].mxu1  ;;  %v4823_v62 = vpop.f32.mrb[33].mxu0 }
 0x35d   :  { %v1262_v53 = vpop.f32.mrb[26].mxu1  ;;  %v1312_v63 = vpop.f32.mrb[34].mxu0 }
 0x35e   :  { %v4812_v2 = vpop.f32.mrb[27].mxu1  ;;  %v4824_v3 = vpop.f32.mrb[35].mxu0 }
 0x36b   :  { %v1359_v23 = vpop.f32.mrb[28].mxu1  ;;  %v1409_v16 = vpop.f32.mrb[36].mxu0 }
 0x36c   :  { %1365 = vst [vmem:[#allocation4 + $0xa] sm:$0x1] %v1359_v23  ;;  %1415 = vst [vmem:[#allocation4 + $0xb] sm:$0x1] %v1409_v16  ;;  %v4835_v4 = vpop.f32.mrb[29].mxu1  ;;  %v4847_v5 = vpop.f32.mrb[37].mxu0 }
 0x36d   :  { %v1362_v6 = vpop.f32.mrb[30].mxu1  ;;  %v1412_v7 = vpop.f32.mrb[38].mxu0 }
 0x36e   :  { %v4836_v10 = vpop.f32.mrb[31].mxu1  ;;  %v4848_v11 = vpop.f32.mrb[39].mxu0 }
 0x37b   :  { %v1459_v12 = vpop.f32.mrb[32].mxu1  ;;  %v1509_v13 = vpop.f32.mrb[40].mxu0 }
 0x37c   :  { %1465 = vst [vmem:[#allocation4 + $0xc] sm:$0x1] %v1459_v12  ;;  %1515 = vst [vmem:[#allocation4 + $0xd] sm:$0x1] %v1509_v13  ;;  %v4859_v14 = vpop.f32.mrb[33].mxu1  ;;  %v4871_v17 = vpop.f32.mrb[41].mxu0 }
 0x37d   :  { %v1462_v19 = vpop.f32.mrb[34].mxu1  ;;  %v1512_v21 = vpop.f32.mrb[42].mxu0 }
 0x37e   :  { %v4860_v25 = vpop.f32.mrb[35].mxu1  ;;  %v4872_v27 = vpop.f32.mrb[43].mxu0 }
 0x38b   :  { %v1559_v29 = vpop.f32.mrb[36].mxu1  ;;  %v1609_v9 = vpop.f32.mrb[44].mxu0 }
 0x38c   :  { %1565 = vst [vmem:[#allocation4 + $0xe] sm:$0x1] %v1559_v29  ;;  %1615 = vst [vmem:[#allocation4 + $0xf] sm:$0x1] %v1609_v9  ;;  %v4883_v30 = vpop.f32.mrb[37].mxu1  ;;  %v4895_v32 = vpop.f32.mrb[45].mxu0 }
 0x38d   :  { %v1562_v33 = vpop.f32.mrb[38].mxu1  ;;  %v1612_v34 = vpop.f32.mrb[46].mxu0 }
 0x38e   :  { %v4884_v35 = vpop.f32.mrb[39].mxu1  ;;  %v4896_v36 = vpop.f32.mrb[47].mxu0 }
 0x39b   :  { %v1658_v37 = vpop.f32.mrb[40].mxu1  ;;  %v1709_v38 = vpop.f32.mrb[48].mxu0 }
 0x39c   :  { %1664 = vst [vmem:[#allocation4 + $0x10] sm:$0x1] %v1658_v37  ;;  %1715 = vst [vmem:[#allocation4 + $0x11] sm:$0x1] %v1709_v38  ;;  %v4907_v39 = vpop.f32.mrb[41].mxu1  ;;  %v4919_v41 = vpop.f32.mrb[49].mxu0 }
 0x39d   :  { %v1661_v43 = vpop.f32.mrb[42].mxu1  ;;  %v1712_v44 = vpop.f32.mrb[50].mxu0 }
 0x39e   :  { %v4908_v45 = vpop.f32.mrb[43].mxu1  ;;  %v4920_v46 = vpop.f32.mrb[51].mxu0 }
 0x3ab   :  { %v1760_v47 = vpop.f32.mrb[44].mxu1  ;;  %v1810_v42 = vpop.f32.mrb[52].mxu0 }
 0x3ac   :  { %1766 = vst [vmem:[#allocation4 + $0x12] sm:$0x1] %v1760_v47  ;;  %1816 = vst [vmem:[#allocation4 + $0x13] sm:$0x1] %v1810_v42  ;;  %v4931_v49 = vpop.f32.mrb[45].mxu1  ;;  %v4943_v50 = vpop.f32.mrb[53].mxu0 }
 0x3ad   :  { %v1763_v51 = vpop.f32.mrb[46].mxu1  ;;  %v1813_v52 = vpop.f32.mrb[54].mxu0 }
 0x3ae   :  { %v4932_v15 = vpop.f32.mrb[47].mxu1  ;;  %v4944_v54 = vpop.f32.mrb[55].mxu0 }
 0x3bb   :  { %v1860_v55 = vpop.f32.mrb[48].mxu1  ;;  %v1910_v56 = vpop.f32.mrb[56].mxu0 }
 0x3bc   :  { %1866 = vst [vmem:[#allocation4 + $0x14] sm:$0x1] %v1860_v55  ;;  %1916 = vst [vmem:[#allocation4 + $0x15] sm:$0x1] %v1910_v56  ;;  %v4955_v57 = vpop.f32.mrb[49].mxu1  ;;  %v4967_v18 = vpop.f32.mrb[57].mxu0 }
 0x3bd   :  { %v1863_v31 = vpop.f32.mrb[50].mxu1  ;;  %v1913_v8 = vpop.f32.mrb[58].mxu0 }
 0x3be   :  { %v4956_v58 = vpop.f32.mrb[51].mxu1  ;;  %v4968_v59 = vpop.f32.mrb[59].mxu0 }
 0x3cb   :  { %v1960_v20 = vpop.f32.mrb[52].mxu1  ;;  %v2010_v60 = vpop.f32.mrb[60].mxu0 }
 0x3cc   :  { %1966 = vst [vmem:[#allocation4 + $0x16] sm:$0x1] %v1960_v20  ;;  %2016 = vst [vmem:[#allocation4 + $0x17] sm:$0x1] %v2010_v60  ;;  %v4979_v24 = vpop.f32.mrb[53].mxu1  ;;  %v4991_v26 = vpop.f32.mrb[61].mxu0 }
 0x3cd   :  { %v1963_v28 = vpop.f32.mrb[54].mxu1  ;;  %v2013_v61 = vpop.f32.mrb[62].mxu0 }
 0x3ce   :  { %v4980_v62 = vpop.f32.mrb[55].mxu1  ;;  %v4992_v53 = vpop.f32.mrb[63].mxu0 }
 0x3db   :  { %v2060_v63 = vpop.f32.mrb[56].mxu1  ;;  %v2110_v2 = vpop.f32.mrb[64].mxu0 }
 0x3dc   :  { %2066 = vst [vmem:[#allocation4 + $0x18] sm:$0x1] %v2060_v63  ;;  %2116 = vst [vmem:[#allocation4 + $0x19] sm:$0x1] %v2110_v2  ;;  %v5003_v3 = vpop.f32.mrb[57].mxu1  ;;  %v5015_v23 = vpop.f32.mrb[65].mxu0 }
 0x3dd   :  { %v2063_v16 = vpop.f32.mrb[58].mxu1  ;;  %v2113_v4 = vpop.f32.mrb[66].mxu0 }
 0x3de   :  { %v5004_v5 = vpop.f32.mrb[59].mxu1  ;;  %v5016_v6 = vpop.f32.mrb[67].mxu0 }
 0x3eb   :  { %v2160_v7 = vpop.f32.mrb[60].mxu1  ;;  %v2210_v10 = vpop.f32.mrb[68].mxu0 }
 0x3ec   :  { %2166 = vst [vmem:[#allocation4 + $0x1a] sm:$0x1] %v2160_v7  ;;  %2216 = vst [vmem:[#allocation4 + $0x1b] sm:$0x1] %v2210_v10  ;;  %v5027_v11 = vpop.f32.mrb[61].mxu1  ;;  %v5039_v12 = vpop.f32.mrb[69].mxu0 }
 0x3ed   :  { %v2163_v13 = vpop.f32.mrb[62].mxu1  ;;  %v2213_v14 = vpop.f32.mrb[70].mxu0 }
 0x3ee   :  { %v5028_v17 = vpop.f32.mrb[63].mxu1  ;;  %v5040_v19 = vpop.f32.mrb[71].mxu0 }
 0x3fb   :  { %v2260_v21 = vpop.f32.mrb[64].mxu1  ;;  %v2310_v25 = vpop.f32.mrb[72].mxu0 }
 0x3fc   :  { %2266 = vst [vmem:[#allocation4 + $0x1c] sm:$0x1] %v2260_v21  ;;  %2316 = vst [vmem:[#allocation4 + $0x1d] sm:$0x1] %v2310_v25  ;;  %v5051_v27 = vpop.f32.mrb[65].mxu1  ;;  %v5063_v29 = vpop.f32.mrb[73].mxu0 }
 0x3fd   :  { %v2263_v9 = vpop.f32.mrb[66].mxu1  ;;  %v2313_v30 = vpop.f32.mrb[74].mxu0 }
 0x3fe   :  { %v5052_v32 = vpop.f32.mrb[67].mxu1  ;;  %v5064_v33 = vpop.f32.mrb[75].mxu0 }
 0x40b   :  { %v2360_v34 = vpop.f32.mrb[68].mxu1  ;;  %v2410_v35 = vpop.f32.mrb[76].mxu0 }
 0x40c   :  { %2366 = vst [vmem:[#allocation4 + $0x1e] sm:$0x1] %v2360_v34  ;;  %2416 = vst [vmem:[#allocation4 + $0x1f] sm:$0x1] %v2410_v35  ;;  %v5075_v36 = vpop.f32.mrb[69].mxu1  ;;  %v5087_v37 = vpop.f32.mrb[77].mxu0 }
 0x40d   :  { %v2363_v38 = vpop.f32.mrb[70].mxu1  ;;  %v2413_v39 = vpop.f32.mrb[78].mxu0 }
 0x40e   :  { %v5076_v41 = vpop.f32.mrb[71].mxu1  ;;  %v5088_v43 = vpop.f32.mrb[79].mxu0 }
 0x40f   :  { %5620 = dma.done.wait [#allocation3 + $0x1], 16384 }
 0x410   :  { %5621 = vsyncadd [#allocation3 + $0x1], 4294950912  ;;  %5089 = vmatprep.subr.bf16.mxu1 %v5627_v1  ;;  %5101 = vmatprep.subr.bf16.mxu0 %v5627_v1  ;;  %v2419_v44 = vld [vmem:[#allocation2 + $0x400] sm:$0xff]  ;;  %v2420_v46 = vld [vmem:[#allocation2 + $0x408] sm:$0xff]  ;;  %v6180_v52 = vshrl.u32 %v5899_v40, 16  ;;  %v2524_v58 = vrot.slane %v5899_v40, 1 }
 0x411   :  { %5097 = vmatprep.mubr.msk.bf16.mxu1 %vm5626_vm0, %v5627_v1  ;;  %5109 = vmatprep.mubr.msk.bf16.mxu0 %vm5626_vm0, %v5627_v1  ;;  %v2468_v45 = vld [vmem:[#allocation2 + $0x420] sm:$0xff]  ;;  %v2469_v47 = vld [vmem:[#allocation2 + $0x428] sm:$0xff]  ;;  %v2421_v42 = vld [vmem:[#allocation2 + $0x410] sm:$0xff]  ;;  %v2624_v63 = vrot.slane %v5899_v40, 2  ;;  %v2724_v11 = vrot.slane %v5899_v40, 3  ;;  %v2824_v9 = vrot.slane %v5899_v40, 4 }
 0x412   :  { %5090 = vmatpush3.bf16.msra.mxu1 %v2419_v44  ;;  %5102 = vmatpush3.bf16.msra.mxu0 %v2468_v45  ;;  %v2470_v49 = vld [vmem:[#allocation2 + $0x430] sm:$0xff]  ;;  %v2422_v50 = vld [vmem:[#allocation2 + $0x418] sm:$0xff]  ;;  %v2519_v15 = vld [vmem:[#allocation2 + $0x440] sm:$0xff]  ;;  %v2574_v59 = vrot.slane %v6180_v52, 1  ;;  %v2674_v2 = vrot.slane %v6180_v52, 2  ;;  %v2774_v12 = vrot.slane %v6180_v52, 3 }
 0x413   :  { %5091 = vmatprep.subr.bf16.mxu1 %v5627_v1  ;;  %5103 = vmatprep.subr.bf16.mxu0 %v5627_v1  ;;  %v2471_v51 = vld [vmem:[#allocation2 + $0x438] sm:$0xff]  ;;  %v2570_v54 = vld [vmem:[#allocation2 + $0x460] sm:$0xff]  ;;  %v2520_v55 = vld [vmem:[#allocation2 + $0x448] sm:$0xff]  ;;  %v2874_v30 = vrot.slane %v6180_v52, 4  ;;  %v2924_v41 = vrot.slane %v5899_v40, 5  ;;  %v2974_v43 = vrot.slane %v6180_v52, 5 }
 0x414   :  { %v2571_v56 = vld [vmem:[#allocation2 + $0x468] sm:$0xff]  ;;  %v2521_v57 = vld [vmem:[#allocation2 + $0x450] sm:$0xff]  ;;  %v2522_v31 = vld [vmem:[#allocation2 + $0x458] sm:$0xff]  ;;  %s5632_s6 = smov 64   ;;  %s5633_s14 = smov 32   ;;  %vm4162_vm7 = vcmask 1040384  }
 0x415   :  { %v2572_v18 = vld [vmem:[#allocation2 + $0x470] sm:$0xff]  ;;  %v2573_v8 = vld [vmem:[#allocation2 + $0x478] sm:$0xff]  ;;  %v2620_v20 = vld [vmem:[#allocation2 + $0x480] sm:$0xff] }
 0x416   :  { %5092 = vmatpush3.bf16.msra.mxu1 %v2420_v46  ;;  %5104 = vmatpush3.bf16.msra.mxu0 %v2469_v47  ;;  %v2670_v60 = vld [vmem:[#allocation2 + $0x4a0] sm:$0xff]  ;;  %v2621_v24 = vld [vmem:[#allocation2 + $0x488] sm:$0xff]  ;;  %v2622_v28 = vld [vmem:[#allocation2 + $0x490] sm:$0xff] }
 0x417   :  { %5093 = vmatprep.subr.bf16.mxu1 %v5627_v1  ;;  %5105 = vmatprep.subr.bf16.mxu0 %v5627_v1  ;;  %v2671_v26 = vld [vmem:[#allocation2 + $0x4a8] sm:$0xff]  ;;  %v2672_v61 = vld [vmem:[#allocation2 + $0x4b0] sm:$0xff]  ;;  %v2623_v62 = vld [vmem:[#allocation2 + $0x498] sm:$0xff] }
 0x418   :  { %v2673_v53 = vld [vmem:[#allocation2 + $0x4b8] sm:$0xff]  ;;  %v2720_v3 = vld [vmem:[#allocation2 + $0x4c0] sm:$0xff]  ;;  %v2721_v16 = vld [vmem:[#allocation2 + $0x4c8] sm:$0xff] }
 0x419   :  { %v2770_v23 = vld [vmem:[#allocation2 + $0x4e0] sm:$0xff]  ;;  %v2771_v4 = vld [vmem:[#allocation2 + $0x4e8] sm:$0xff]  ;;  %v2722_v5 = vld [vmem:[#allocation2 + $0x4d0] sm:$0xff] }
 0x41a   :  { %5094 = vmatpush3.bf16.msra.mxu1 %v2421_v42  ;;  %5106 = vmatpush3.bf16.msra.mxu0 %v2470_v49  ;;  %v2772_v6 = vld [vmem:[#allocation2 + $0x4f0] sm:$0xff]  ;;  %v2723_v7 = vld [vmem:[#allocation2 + $0x4d8] sm:$0xff]  ;;  %v2820_v13 = vld [vmem:[#allocation2 + $0x500] sm:$0xff] }
 0x41b   :  { %5095 = vmatprep.subr.bf16.mxu1 %v5627_v1  ;;  %5107 = vmatprep.subr.bf16.mxu0 %v5627_v1  ;;  %v2773_v10 = vld [vmem:[#allocation2 + $0x4f8] sm:$0xff]  ;;  %v2870_v14 = vld [vmem:[#allocation2 + $0x520] sm:$0xff]  ;;  %v2821_v17 = vld [vmem:[#allocation2 + $0x508] sm:$0xff] }
 0x41c   :  { %v2871_v19 = vld [vmem:[#allocation2 + $0x528] sm:$0xff]  ;;  %v2822_v21 = vld [vmem:[#allocation2 + $0x510] sm:$0xff]  ;;  %v2823_v27 = vld [vmem:[#allocation2 + $0x518] sm:$0xff] }
 0x41d   :  { %v2872_v25 = vld [vmem:[#allocation2 + $0x530] sm:$0xff]  ;;  %v2873_v29 = vld [vmem:[#allocation2 + $0x538] sm:$0xff]  ;;  %v2920_v32 = vld [vmem:[#allocation2 + $0x540] sm:$0xff] }
 0x41e   :  { %5096 = vmatpush3.bf16.msra.mxu1 %v2422_v50  ;;  %5108 = vmatpush3.bf16.msra.mxu0 %v2471_v51  ;;  %v2970_v33 = vld [vmem:[#allocation2 + $0x560] sm:$0xff]  ;;  %v2921_v34 = vld [vmem:[#allocation2 + $0x548] sm:$0xff]  ;;  %v2922_v36 = vld [vmem:[#allocation2 + $0x550] sm:$0xff] }
 0x41f   :  { %5113 = vmatprep.subr.bf16.mxu1 %v5627_v1  ;;  %5125 = vmatprep.subr.bf16.mxu0 %v5627_v1  ;;  %v2971_v35 = vld [vmem:[#allocation2 + $0x568] sm:$0xff]  ;;  %v2972_v37 = vld [vmem:[#allocation2 + $0x570] sm:$0xff]  ;;  %v2923_v38 = vld [vmem:[#allocation2 + $0x558] sm:$0xff] }
 0x420   :  { %v2973_v39 = vld [vmem:[#allocation2 + $0x578] sm:$0xff]  ;;  %v3020_v44 = vld [vmem:[#allocation2 + $0x580] sm:$0xff]  ;;  %v3021_v46 = vld [vmem:[#allocation2 + $0x588] sm:$0xff] }
 0x421   :  { %5098 = vmatmul.mubr.msk.bf16.vlgmr.msra.gmra.mrb[72].mxu1 %vm464_vm4, %v5899_v40  ;;  %5110 = vmatmul.mubr.msk.bf16.vlgmr.msra.gmra.mrb[80].mxu0 %vm464_vm4, %v6180_v52  ;;  %v3070_v45 = vld [vmem:[#allocation2 + $0x5a0] sm:$0xff]  ;;  %v3071_v47 = vld [vmem:[#allocation2 + $0x5a8] sm:$0xff]  ;;  %v3022_v42 = vld [vmem:[#allocation2 + $0x590] sm:$0xff] }
 0x422   :  { %5114 = vmatpush3.bf16.msra.mxu1 %v2519_v15  ;;  %5126 = vmatpush3.bf16.msra.mxu0 %v2570_v54  ;;  %v3072_v49 = vld [vmem:[#allocation2 + $0x5b0] sm:$0xff]  ;;  %v3023_v50 = vld [vmem:[#allocation2 + $0x598] sm:$0xff]  ;;  %v3024_v15 = vrot.slane %v5899_v40, 6  ;;  %v3074_v54 = vrot.slane %v6180_v52, 6 }
 0x423   :  { %5115 = vmatprep.subr.bf16.mxu1 %v5627_v1  ;;  %5127 = vmatprep.subr.bf16.mxu0 %v5627_v1  ;;  %v3073_v51 = vld [vmem:[#allocation2 + $0x5b8] sm:$0xff] }
 0x424   :  { %5121 = vmatprep.mubr.msk.bf16.mxu1 %vm5626_vm0, %v5627_v1  ;;  %5133 = vmatprep.mubr.msk.bf16.mxu0 %vm5626_vm0, %v5627_v1 }
 0x426   :  { %5116 = vmatpush3.bf16.msra.mxu1 %v2520_v55  ;;  %5128 = vmatpush3.bf16.msra.mxu0 %v2571_v56  ;;  %v3120_v55 = vld [vmem:[#allocation2 + $0x5c0] sm:$0xff] }
 0x427   :  { %5117 = vmatprep.subr.bf16.mxu1 %v5627_v1  ;;  %5129 = vmatprep.subr.bf16.mxu0 %v5627_v1  ;;  %v3170_v56 = vld [vmem:[#allocation2 + $0x5e0] sm:$0xff] }
 0x42a   :  { %5118 = vmatpush3.bf16.msra.mxu1 %v2521_v57  ;;  %5130 = vmatpush3.bf16.msra.mxu0 %v2572_v18  ;;  %v3121_v57 = vld [vmem:[#allocation2 + $0x5c8] sm:$0xff] }
 0x42b   :  { %5119 = vmatprep.subr.bf16.mxu1 %v5627_v1  ;;  %5131 = vmatprep.subr.bf16.mxu0 %v5627_v1  ;;  %v3171_v18 = vld [vmem:[#allocation2 + $0x5e8] sm:$0xff] }
 0x42e   :  { %5120 = vmatpush3.bf16.msra.mxu1 %v2522_v31  ;;  %5132 = vmatpush3.bf16.msra.mxu0 %v2573_v8  ;;  %v3122_v31 = vld [vmem:[#allocation2 + $0x5d0] sm:$0xff] }
 0x42f   :  { %5137 = vmatprep.subr.bf16.mxu1 %v5627_v1  ;;  %5149 = vmatprep.subr.bf16.mxu0 %v5627_v1  ;;  %v3172_v8 = vld [vmem:[#allocation2 + $0x5f0] sm:$0xff] }
 0x431   :  { %5122 = vmatmul.mubr.msk.bf16.vlgmr.msra.gmra.mrb[76].mxu1 %vm464_vm4, %v2524_v58  ;;  %5134 = vmatmul.mubr.msk.bf16.vlgmr.msra.gmra.mrb[84].mxu0 %vm464_vm4, %v2574_v59  ;;  %v3123_v58 = vld [vmem:[#allocation2 + $0x5d8] sm:$0xff] }
 0x432   :  { %5138 = vmatpush3.bf16.msra.mxu1 %v2620_v20  ;;  %5150 = vmatpush3.bf16.msra.mxu0 %v2670_v60  ;;  %v3173_v59 = vld [vmem:[#allocation2 + $0x5f8] sm:$0xff]  ;;  %v3124_v20 = vrot.slane %v5899_v40, 7  ;;  %v3174_v60 = vrot.slane %v6180_v52, 7  ;;  %v3221_v40 = vld [vmem:[#allocation2 + $0x608] sm:$0xff] }
 0x433   :  { %5139 = vmatprep.subr.bf16.mxu1 %v5627_v1  ;;  %5151 = vmatprep.subr.bf16.mxu0 %v5627_v1  ;;  %v3270_v52 = vld [vmem:[#allocation2 + $0x628] sm:$0xff] }
 0x434   :  { %5145 = vmatprep.mubr.msk.bf16.mxu1 %vm5626_vm0, %v5627_v1  ;;  %5157 = vmatprep.mubr.msk.bf16.mxu0 %vm5626_vm0, %v5627_v1 }
 0x436   :  { %5140 = vmatpush3.bf16.msra.mxu1 %v2621_v24  ;;  %5152 = vmatpush3.bf16.msra.mxu0 %v2671_v26  ;;  %v3220_v24 = vld [vmem:[#allocation2 + $0x600] sm:$0xff] }
 0x437   :  { %5141 = vmatprep.subr.bf16.mxu1 %v5627_v1  ;;  %5153 = vmatprep.subr.bf16.mxu0 %v5627_v1  ;;  %v3269_v26 = vld [vmem:[#allocation2 + $0x620] sm:$0xff] }
 0x43a   :  { %5142 = vmatpush3.bf16.msra.mxu1 %v2622_v28  ;;  %5154 = vmatpush3.bf16.msra.mxu0 %v2672_v61  ;;  %v3222_v28 = vld [vmem:[#allocation2 + $0x610] sm:$0xff] }
 0x43b   :  { %5143 = vmatprep.subr.bf16.mxu1 %v5627_v1  ;;  %5155 = vmatprep.subr.bf16.mxu0 %v5627_v1  ;;  %v3271_v61 = vld [vmem:[#allocation2 + $0x630] sm:$0xff] }
 0x43e   :  { %5144 = vmatpush3.bf16.msra.mxu1 %v2623_v62  ;;  %5156 = vmatpush3.bf16.msra.mxu0 %v2673_v53  ;;  %v3223_v62 = vld [vmem:[#allocation2 + $0x618] sm:$0xff] }
 0x43f   :  { %5161 = vmatprep.subr.bf16.mxu1 %v5627_v1  ;;  %5173 = vmatprep.subr.bf16.mxu0 %v5627_v1  ;;  %v3272_v53 = vld [vmem:[#allocation2 + $0x638] sm:$0xff] }
 0x441   :  { %5146 = vmatmul.mubr.msk.bf16.vlgmr.msra.gmra.mrb[80].mxu1 %vm464_vm4, %v2624_v63  ;;  %5158 = vmatmul.mubr.msk.bf16.vlgmr.msra.gmra.mrb[88].mxu0 %vm464_vm4, %v2674_v2  ;;  %v6311_v63 = vshrl.u32 %v5903_v48, 16  ;;  %v3320_v2 = vld [vmem:[#allocation2 + $0x640] sm:$0xff] }
 0x442   :  { %5162 = vmatpush3.bf16.msra.mxu1 %v2720_v3  ;;  %5174 = vmatpush3.bf16.msra.mxu0 %v2770_v23  ;;  %v3371_v3 = vld [vmem:[#allocation2 + $0x660] sm:$0xff]  ;;  %v3321_v23 = vld [vmem:[#allocation2 + $0x648] sm:$0xff] }
 0x443   :  { %5163 = vmatprep.subr.bf16.mxu1 %v5627_v1  ;;  %5175 = vmatprep.subr.bf16.mxu0 %v5627_v1 }
 0x444   :  { %5169 = vmatprep.mubr.msk.bf16.mxu1 %vm5626_vm0, %v5627_v1  ;;  %5181 = vmatprep.mubr.msk.bf16.mxu0 %vm5626_vm0, %v5627_v1 }
 0x446   :  { %5164 = vmatpush3.bf16.msra.mxu1 %v2721_v16  ;;  %5176 = vmatpush3.bf16.msra.mxu0 %v2771_v4  ;;  %v3372_v16 = vld [vmem:[#allocation2 + $0x668] sm:$0xff]  ;;  %v3322_v4 = vld [vmem:[#allocation2 + $0x650] sm:$0xff] }
 0x447   :  { %5165 = vmatprep.subr.bf16.mxu1 %v5627_v1  ;;  %5177 = vmatprep.subr.bf16.mxu0 %v5627_v1 }
 0x44a   :  { %5166 = vmatpush3.bf16.msra.mxu1 %v2722_v5  ;;  %5178 = vmatpush3.bf16.msra.mxu0 %v2772_v6  ;;  %v3373_v5 = vld [vmem:[#allocation2 + $0x670] sm:$0xff]  ;;  %v3323_v6 = vld [vmem:[#allocation2 + $0x658] sm:$0xff] }
 0x44b   :  { %5167 = vmatprep.subr.bf16.mxu1 %v5627_v1  ;;  %5179 = vmatprep.subr.bf16.mxu0 %v5627_v1 }
 0x44e   :  { %5168 = vmatpush3.bf16.msra.mxu1 %v2723_v7  ;;  %5180 = vmatpush3.bf16.msra.mxu0 %v2773_v10  ;;  %v3374_v7 = vld [vmem:[#allocation2 + $0x678] sm:$0xff]  ;;  %v3325_v10 = vrot.slane %v5903_v48, 1 }
 0x44f   :  { %5185 = vmatprep.subr.bf16.mxu1 %v5627_v1  ;;  %5197 = vmatprep.subr.bf16.mxu0 %v5627_v1 }
 0x451   :  { %5170 = vmatmul.mubr.msk.bf16.vlgmr.msra.gmra.mrb[84].mxu1 %vm464_vm4, %v2724_v11  ;;  %5182 = vmatmul.mubr.msk.bf16.vlgmr.msra.gmra.mrb[92].mxu0 %vm464_vm4, %v2774_v12  ;;  %v3375_v11 = vrot.slane %v6311_v63, 1  ;;  %v3421_v12 = vld [vmem:[#allocation2 + $0x680] sm:$0xff] }
 0x452   :  { %5186 = vmatpush3.bf16.msra.mxu1 %v2820_v13  ;;  %5198 = vmatpush3.bf16.msra.mxu0 %v2870_v14  ;;  %v3471_v13 = vld [vmem:[#allocation2 + $0x6a0] sm:$0xff]  ;;  %v3422_v14 = vld [vmem:[#allocation2 + $0x688] sm:$0xff] }
 0x453   :  { %5187 = vmatprep.subr.bf16.mxu1 %v5627_v1  ;;  %5199 = vmatprep.subr.bf16.mxu0 %v5627_v1 }
 0x454   :  { %5193 = vmatprep.mubr.msk.bf16.mxu1 %vm5626_vm0, %v5627_v1  ;;  %5205 = vmatprep.mubr.msk.bf16.mxu0 %vm5626_vm0, %v5627_v1 }
 0x456   :  { %5188 = vmatpush3.bf16.msra.mxu1 %v2821_v17  ;;  %5200 = vmatpush3.bf16.msra.mxu0 %v2871_v19  ;;  %v3472_v17 = vld [vmem:[#allocation2 + $0x6a8] sm:$0xff]  ;;  %v3423_v19 = vld [vmem:[#allocation2 + $0x690] sm:$0xff] }
 0x457   :  { %5189 = vmatprep.subr.bf16.mxu1 %v5627_v1  ;;  %5201 = vmatprep.subr.bf16.mxu0 %v5627_v1 }
 0x45a   :  { %5190 = vmatpush3.bf16.msra.mxu1 %v2822_v21  ;;  %5202 = vmatpush3.bf16.msra.mxu0 %v2872_v25  ;;  %v3473_v21 = vld [vmem:[#allocation2 + $0x6b0] sm:$0xff]  ;;  %v3424_v25 = vld [vmem:[#allocation2 + $0x698] sm:$0xff] }
 0x45b   :  { %5191 = vmatprep.subr.bf16.mxu1 %v5627_v1  ;;  %5203 = vmatprep.subr.bf16.mxu0 %v5627_v1 }
 0x45e   :  { %5192 = vmatpush3.bf16.msra.mxu1 %v2823_v27  ;;  %5204 = vmatpush3.bf16.msra.mxu0 %v2873_v29  ;;  %v3474_v27 = vld [vmem:[#allocation2 + $0x6b8] sm:$0xff]  ;;  %v3425_v29 = vrot.slane %v5903_v48, 2 }
 0x45f   :  { %5209 = vmatprep.subr.bf16.mxu1 %v5627_v1  ;;  %5221 = vmatprep.subr.bf16.mxu0 %v5627_v1 }
 0x461   :  { %5194 = vmatmul.mubr.msk.bf16.vlgmr.msra.gmra.mrb[88].mxu1 %vm464_vm4, %v2824_v9  ;;  %5206 = vmatmul.mubr.msk.bf16.vlgmr.msra.gmra.mrb[96].mxu0 %vm464_vm4, %v2874_v30  ;;  %v3475_v9 = vrot.slane %v6311_v63, 2  ;;  %v3521_v30 = vld [vmem:[#allocation2 + $0x6c0] sm:$0xff] }
 0x462   :  { %5210 = vmatpush3.bf16.msra.mxu1 %v2920_v32  ;;  %5222 = vmatpush3.bf16.msra.mxu0 %v2970_v33  ;;  %v3571_v32 = vld [vmem:[#allocation2 + $0x6e0] sm:$0xff]  ;;  %v3522_v33 = vld [vmem:[#allocation2 + $0x6c8] sm:$0xff] }
 0x463   :  { %5211 = vmatprep.subr.bf16.mxu1 %v5627_v1  ;;  %5223 = vmatprep.subr.bf16.mxu0 %v5627_v1 }
 0x464   :  { %5217 = vmatprep.mubr.msk.bf16.mxu1 %vm5626_vm0, %v5627_v1  ;;  %5229 = vmatprep.mubr.msk.bf16.mxu0 %vm5626_vm0, %v5627_v1 }
 0x466   :  { %5212 = vmatpush3.bf16.msra.mxu1 %v2921_v34  ;;  %5224 = vmatpush3.bf16.msra.mxu0 %v2971_v35  ;;  %v3572_v34 = vld [vmem:[#allocation2 + $0x6e8] sm:$0xff]  ;;  %v3523_v35 = vld [vmem:[#allocation2 + $0x6d0] sm:$0xff] }
 0x467   :  { %5213 = vmatprep.subr.bf16.mxu1 %v5627_v1  ;;  %5225 = vmatprep.subr.bf16.mxu0 %v5627_v1 }
 0x46a   :  { %5214 = vmatpush3.bf16.msra.mxu1 %v2922_v36  ;;  %5226 = vmatpush3.bf16.msra.mxu0 %v2972_v37  ;;  %v3573_v36 = vld [vmem:[#allocation2 + $0x6f0] sm:$0xff]  ;;  %v3524_v37 = vld [vmem:[#allocation2 + $0x6d8] sm:$0xff] }
 0x46b   :  { %5215 = vmatprep.subr.bf16.mxu1 %v5627_v1  ;;  %5227 = vmatprep.subr.bf16.mxu0 %v5627_v1 }
 0x46e   :  { %5216 = vmatpush3.bf16.msra.mxu1 %v2923_v38  ;;  %5228 = vmatpush3.bf16.msra.mxu0 %v2973_v39  ;;  %v3574_v38 = vld [vmem:[#allocation2 + $0x6f8] sm:$0xff]  ;;  %v3525_v39 = vrot.slane %v5903_v48, 3 }
 0x46f   :  { %5233 = vmatprep.subr.bf16.mxu1 %v5627_v1  ;;  %5245 = vmatprep.subr.bf16.mxu0 %v5627_v1 }
 0x471   :  { %5218 = vmatmul.mubr.msk.bf16.vlgmr.msra.gmra.mrb[92].mxu1 %vm464_vm4, %v2924_v41  ;;  %5230 = vmatmul.mubr.msk.bf16.vlgmr.msra.gmra.mrb[100].mxu0 %vm464_vm4, %v2974_v43  ;;  %v3575_v41 = vrot.slane %v6311_v63, 3  ;;  %v3621_v43 = vld [vmem:[#allocation2 + $0x700] sm:$0xff] }
 0x472   :  { %5234 = vmatpush3.bf16.msra.mxu1 %v3020_v44  ;;  %5246 = vmatpush3.bf16.msra.mxu0 %v3070_v45  ;;  %v3671_v44 = vld [vmem:[#allocation2 + $0x720] sm:$0xff]  ;;  %v3622_v45 = vld [vmem:[#allocation2 + $0x708] sm:$0xff] }
 0x473   :  { %5235 = vmatprep.subr.bf16.mxu1 %v5627_v1  ;;  %5247 = vmatprep.subr.bf16.mxu0 %v5627_v1 }
 0x474   :  { %5241 = vmatprep.mubr.msk.bf16.mxu1 %vm5626_vm0, %v5627_v1  ;;  %5253 = vmatprep.mubr.msk.bf16.mxu0 %vm5626_vm0, %v5627_v1 }
 0x476   :  { %5236 = vmatpush3.bf16.msra.mxu1 %v3021_v46  ;;  %5248 = vmatpush3.bf16.msra.mxu0 %v3071_v47  ;;  %v3672_v46 = vld [vmem:[#allocation2 + $0x728] sm:$0xff]  ;;  %v3623_v47 = vld [vmem:[#allocation2 + $0x710] sm:$0xff] }
 0x477   :  { %5237 = vmatprep.subr.bf16.mxu1 %v5627_v1  ;;  %5249 = vmatprep.subr.bf16.mxu0 %v5627_v1 }
 0x47a   :  { %5238 = vmatpush3.bf16.msra.mxu1 %v3022_v42  ;;  %5250 = vmatpush3.bf16.msra.mxu0 %v3072_v49  ;;  %v3673_v42 = vld [vmem:[#allocation2 + $0x730] sm:$0xff]  ;;  %v3624_v49 = vld [vmem:[#allocation2 + $0x718] sm:$0xff] }
 0x47b   :  { %5239 = vmatprep.subr.bf16.mxu1 %v5627_v1  ;;  %5251 = vmatprep.subr.bf16.mxu0 %v5627_v1 }
 0x47e   :  { %5240 = vmatpush3.bf16.msra.mxu1 %v3023_v50  ;;  %5252 = vmatpush3.bf16.msra.mxu0 %v3073_v51  ;;  %v3674_v50 = vld [vmem:[#allocation2 + $0x738] sm:$0xff]  ;;  %v3625_v51 = vrot.slane %v5903_v48, 4 }
 0x47f   :  { %5257 = vmatprep.subr.bf16.mxu1 %v5627_v1  ;;  %5269 = vmatprep.subr.bf16.mxu0 %v5627_v1 }
 0x481   :  { %5242 = vmatmul.mubr.msk.bf16.vlgmr.msra.gmra.mrb[96].mxu1 %vm464_vm4, %v3024_v15  ;;  %5254 = vmatmul.mubr.msk.bf16.vlgmr.msra.gmra.mrb[104].mxu0 %vm464_vm4, %v3074_v54  ;;  %v3675_v15 = vrot.slane %v6311_v63, 4  ;;  %v3721_v54 = vld [vmem:[#allocation2 + $0x740] sm:$0xff] }
 0x482   :  { %5258 = vmatpush3.bf16.msra.mxu1 %v3120_v55  ;;  %5270 = vmatpush3.bf16.msra.mxu0 %v3170_v56  ;;  %v3771_v55 = vld [vmem:[#allocation2 + $0x760] sm:$0xff]  ;;  %v3722_v56 = vld [vmem:[#allocation2 + $0x748] sm:$0xff] }
 0x483   :  { %5259 = vmatprep.subr.bf16.mxu1 %v5627_v1  ;;  %5271 = vmatprep.subr.bf16.mxu0 %v5627_v1 }
 0x484   :  { %5265 = vmatprep.mubr.msk.bf16.mxu1 %vm5626_vm0, %v5627_v1  ;;  %5277 = vmatprep.mubr.msk.bf16.mxu0 %vm5626_vm0, %v5627_v1 }
 0x486   :  { %5260 = vmatpush3.bf16.msra.mxu1 %v3121_v57  ;;  %5272 = vmatpush3.bf16.msra.mxu0 %v3171_v18  ;;  %v3772_v57 = vld [vmem:[#allocation2 + $0x768] sm:$0xff]  ;;  %v3723_v18 = vld [vmem:[#allocation2 + $0x750] sm:$0xff] }
 0x487   :  { %5261 = vmatprep.subr.bf16.mxu1 %v5627_v1  ;;  %5273 = vmatprep.subr.bf16.mxu0 %v5627_v1 }
 0x48a   :  { %5262 = vmatpush3.bf16.msra.mxu1 %v3122_v31  ;;  %5274 = vmatpush3.bf16.msra.mxu0 %v3172_v8  ;;  %v3773_v31 = vld [vmem:[#allocation2 + $0x770] sm:$0xff]  ;;  %v3724_v8 = vld [vmem:[#allocation2 + $0x758] sm:$0xff] }
 0x48b   :  { %5263 = vmatprep.subr.bf16.mxu1 %v5627_v1  ;;  %5275 = vmatprep.subr.bf16.mxu0 %v5627_v1 }
 0x48e   :  { %5264 = vmatpush3.bf16.msra.mxu1 %v3123_v58  ;;  %5276 = vmatpush3.bf16.msra.mxu0 %v3173_v59  ;;  %v3774_v58 = vld [vmem:[#allocation2 + $0x778] sm:$0xff]  ;;  %v3725_v59 = vrot.slane %v5903_v48, 5 }
 0x48f   :  { %5281 = vmatprep.subr.bf16.mxu1 %v5627_v1  ;;  %5293 = vmatprep.subr.bf16.mxu0 %v5627_v1 }
 0x491   :  { %5266 = vmatmul.mubr.msk.bf16.vlgmr.msra.gmra.mrb[100].mxu1 %vm464_vm4, %v3124_v20  ;;  %5278 = vmatmul.mubr.msk.bf16.vlgmr.msra.gmra.mrb[108].mxu0 %vm464_vm4, %v3174_v60  ;;  %v3775_v20 = vrot.slane %v6311_v63, 5  ;;  %v3821_v60 = vld [vmem:[#allocation2 + $0x780] sm:$0xff] }
 0x492   :  { %5282 = vmatpush3.bf16.msra.mxu1 %v3220_v24  ;;  %5294 = vmatpush3.bf16.msra.mxu0 %v3269_v26  ;;  %v3871_v24 = vld [vmem:[#allocation2 + $0x7a0] sm:$0xff]  ;;  %v3822_v26 = vld [vmem:[#allocation2 + $0x788] sm:$0xff] }
 0x493   :  { %5283 = vmatprep.subr.bf16.mxu1 %v5627_v1  ;;  %5295 = vmatprep.subr.bf16.mxu0 %v5627_v1 }
 0x494   :  { %5289 = vmatprep.mubr.msk.bf16.mxu1 %vm5626_vm0, %v5627_v1  ;;  %5301 = vmatprep.mubr.msk.bf16.mxu0 %vm5626_vm0, %v5627_v1 }
 0x496   :  { %5284 = vmatpush3.bf16.msra.mxu1 %v3221_v40  ;;  %5296 = vmatpush3.bf16.msra.mxu0 %v3270_v52  ;;  %v3872_v40 = vld [vmem:[#allocation2 + $0x7a8] sm:$0xff] }
 0x497   :  { %5285 = vmatprep.subr.bf16.mxu1 %v5627_v1  ;;  %5297 = vmatprep.subr.bf16.mxu0 %v5627_v1 }
 0x49a   :  { %5286 = vmatpush3.bf16.msra.mxu1 %v3222_v28  ;;  %5298 = vmatpush3.bf16.msra.mxu0 %v3271_v61 }
 0x49b   :  { %5287 = vmatprep.subr.bf16.mxu1 %v5627_v1  ;;  %5299 = vmatprep.subr.bf16.mxu0 %v5627_v1 }
 0x49e   :  { %5288 = vmatpush3.bf16.msra.mxu1 %v3223_v62  ;;  %5300 = vmatpush3.bf16.msra.mxu0 %v3272_v53 }
 0x49f   :  { %5305 = vmatprep.subr.bf16.mxu1 %v5627_v1  ;;  %5317 = vmatprep.subr.bf16.mxu0 %v5627_v1 }
 0x4a1   :  { %5290 = vmatmul.mubr.msk.bf16.vlgmr.msra.gmra.mrb[104].mxu1 %vm464_vm4, %v5903_v48  ;;  %5302 = vmatmul.mubr.msk.bf16.vlgmr.msra.gmra.mrb[112].mxu0 %vm464_vm4, %v6311_v63 }
 0x4a2   :  { %5306 = vmatpush3.bf16.msra.mxu1 %v3320_v2  ;;  %5318 = vmatpush3.bf16.msra.mxu0 %v3371_v3 }
 0x4a3   :  { %5307 = vmatprep.subr.bf16.mxu1 %v5627_v1  ;;  %5319 = vmatprep.subr.bf16.mxu0 %v5627_v1 }
 0x4a4   :  { %5313 = vmatprep.mubr.msk.bf16.mxu1 %vm5626_vm0, %v5627_v1  ;;  %5325 = vmatprep.mubr.msk.bf16.mxu0 %vm5626_vm0, %v5627_v1 }
 0x4a6   :  { %5308 = vmatpush3.bf16.msra.mxu1 %v3321_v23  ;;  %5320 = vmatpush3.bf16.msra.mxu0 %v3372_v16  ;;  %v3823_v16 = vld [vmem:[#allocation2 + $0x790] sm:$0xff] }
 0x4a7   :  { %5309 = vmatprep.subr.bf16.mxu1 %v5627_v1  ;;  %5321 = vmatprep.subr.bf16.mxu0 %v5627_v1 }
 0x4aa   :  { %5310 = vmatpush3.bf16.msra.mxu1 %v3322_v4  ;;  %5322 = vmatpush3.bf16.msra.mxu0 %v3373_v5  ;;  %v3873_v4 = vld [vmem:[#allocation2 + $0x7b0] sm:$0xff]  ;;  %v3824_v5 = vld [vmem:[#allocation2 + $0x798] sm:$0xff] }
 0x4ab   :  { %5311 = vmatprep.subr.bf16.mxu1 %v5627_v1  ;;  %5323 = vmatprep.subr.bf16.mxu0 %v5627_v1 }
 0x4ae   :  { %5312 = vmatpush3.bf16.msra.mxu1 %v3323_v6  ;;  %5324 = vmatpush3.bf16.msra.mxu0 %v3374_v7  ;;  %v3874_v6 = vld [vmem:[#allocation2 + $0x7b8] sm:$0xff]  ;;  %v3825_v7 = vrot.slane %v5903_v48, 6 }
 0x4af   :  { %5329 = vmatprep.subr.bf16.mxu1 %v5627_v1  ;;  %5341 = vmatprep.subr.bf16.mxu0 %v5627_v1 }
 0x4b1   :  { %5314 = vmatmul.mubr.msk.bf16.vlgmr.msra.gmra.mrb[108].mxu1 %vm464_vm4, %v3325_v10  ;;  %5326 = vmatmul.mubr.msk.bf16.vlgmr.msra.gmra.mrb[116].mxu0 %vm464_vm4, %v3375_v11  ;;  %v3875_v10 = vrot.slane %v6311_v63, 6  ;;  %v3921_v11 = vld [vmem:[#allocation2 + $0x7c0] sm:$0xff] }
 0x4b2   :  { %5330 = vmatpush3.bf16.msra.mxu1 %v3421_v12  ;;  %5342 = vmatpush3.bf16.msra.mxu0 %v3471_v13  ;;  %v3971_v12 = vld [vmem:[#allocation2 + $0x7e0] sm:$0xff]  ;;  %v3922_v13 = vld [vmem:[#allocation2 + $0x7c8] sm:$0xff] }
 0x4b3   :  { %5331 = vmatprep.subr.bf16.mxu1 %v5627_v1  ;;  %5343 = vmatprep.subr.bf16.mxu0 %v5627_v1 }
 0x4b4   :  { %5337 = vmatprep.mubr.msk.bf16.mxu1 %vm5626_vm0, %v5627_v1  ;;  %5349 = vmatprep.mubr.msk.bf16.mxu0 %vm5626_vm0, %v5627_v1 }
 0x4b6   :  { %5332 = vmatpush3.bf16.msra.mxu1 %v3422_v14  ;;  %5344 = vmatpush3.bf16.msra.mxu0 %v3472_v17  ;;  %v3972_v14 = vld [vmem:[#allocation2 + $0x7e8] sm:$0xff] }
 0x4b7   :  { %5333 = vmatprep.subr.bf16.mxu1 %v5627_v1  ;;  %5345 = vmatprep.subr.bf16.mxu0 %v5627_v1 }
 0x4ba   :  { %5334 = vmatpush3.bf16.msra.mxu1 %v3423_v19  ;;  %5346 = vmatpush3.bf16.msra.mxu0 %v3473_v21 }
 0x4bb   :  { %5335 = vmatprep.subr.bf16.mxu1 %v5627_v1  ;;  %5347 = vmatprep.subr.bf16.mxu0 %v5627_v1 }
 0x4be   :  { %5336 = vmatpush3.bf16.msra.mxu1 %v3424_v25  ;;  %5348 = vmatpush3.bf16.msra.mxu0 %v3474_v27 }
 0x4bf   :  { %5353 = vmatprep.subr.bf16.mxu1 %v5627_v1  ;;  %5365 = vmatprep.subr.bf16.mxu0 %v5627_v1 }
 0x4c1   :  { %5338 = vmatmul.mubr.msk.bf16.vlgmr.msra.gmra.mrb[112].mxu1 %vm464_vm4, %v3425_v29  ;;  %5350 = vmatmul.mubr.msk.bf16.vlgmr.msra.gmra.mrb[120].mxu0 %vm464_vm4, %v3475_v9 }
 0x4c2   :  { %5354 = vmatpush3.bf16.msra.mxu1 %v3521_v30  ;;  %5366 = vmatpush3.bf16.msra.mxu0 %v3571_v32  ;;  %v3923_v32 = vld [vmem:[#allocation2 + $0x7d0] sm:$0xff] }
 0x4c3   :  { %5355 = vmatprep.subr.bf16.mxu1 %v5627_v1  ;;  %5367 = vmatprep.subr.bf16.mxu0 %v5627_v1 }
 0x4c4   :  { %5361 = vmatprep.mubr.msk.bf16.mxu1 %vm5626_vm0, %v5627_v1  ;;  %5373 = vmatprep.mubr.msk.bf16.mxu0 %vm5626_vm0, %v5627_v1 }
 0x4c6   :  { %5356 = vmatpush3.bf16.msra.mxu1 %v3522_v33  ;;  %5368 = vmatpush3.bf16.msra.mxu0 %v3572_v34  ;;  %v3973_v33 = vld [vmem:[#allocation2 + $0x7f0] sm:$0xff]  ;;  %v3924_v34 = vld [vmem:[#allocation2 + $0x7d8] sm:$0xff] }
 0x4c7   :  { %5357 = vmatprep.subr.bf16.mxu1 %v5627_v1  ;;  %5369 = vmatprep.subr.bf16.mxu0 %v5627_v1 }
 0x4ca   :  { %5358 = vmatpush3.bf16.msra.mxu1 %v3523_v35  ;;  %5370 = vmatpush3.bf16.msra.mxu0 %v3573_v36  ;;  %v3974_v35 = vld [vmem:[#allocation2 + $0x7f8] sm:$0xff]  ;;  %v3925_v36 = vrot.slane %v5903_v48, 7 }
 0x4cb   :  { %5359 = vmatprep.subr.bf16.mxu1 %v5627_v1  ;;  %5371 = vmatprep.subr.bf16.mxu0 %v5627_v1 }
 0x4ce   :  { %5360 = vmatpush3.bf16.msra.mxu1 %v3524_v37  ;;  %5372 = vmatpush3.bf16.msra.mxu0 %v3574_v38  ;;  %v3975_v37 = vrot.slane %v6311_v63, 7 }
 0x4cf   :  { %5377 = vmatprep.subr.bf16.mxu1 %v5627_v1  ;;  %5389 = vmatprep.subr.bf16.mxu0 %v5627_v1 }
 0x4d1   :  { %5362 = vmatmul.mubr.msk.bf16.vlgmr.msra.gmra.mrb[116].mxu1 %vm464_vm4, %v3525_v39  ;;  %5374 = vmatmul.mubr.msk.bf16.vlgmr.msra.gmra.mrb[124].mxu0 %vm464_vm4, %v3575_v41 }
 0x4d2   :  { %5378 = vmatpush3.bf16.msra.mxu1 %v3621_v43  ;;  %5390 = vmatpush3.bf16.msra.mxu0 %v3671_v44 }
 0x4d3   :  { %5379 = vmatprep.subr.bf16.mxu1 %v5627_v1  ;;  %5391 = vmatprep.subr.bf16.mxu0 %v5627_v1 }
 0x4d4   :  { %5385 = vmatprep.mubr.msk.bf16.mxu1 %vm5626_vm0, %v5627_v1  ;;  %5397 = vmatprep.mubr.msk.bf16.mxu0 %vm5626_vm0, %v5627_v1 }
 0x4d6   :  { %5380 = vmatpush3.bf16.msra.mxu1 %v3622_v45  ;;  %5392 = vmatpush3.bf16.msra.mxu0 %v3672_v46 }
 0x4d7   :  { %5381 = vmatprep.subr.bf16.mxu1 %v5627_v1  ;;  %5393 = vmatprep.subr.bf16.mxu0 %v5627_v1 }
 0x4da   :  { %5382 = vmatpush3.bf16.msra.mxu1 %v3623_v47  ;;  %5394 = vmatpush3.bf16.msra.mxu0 %v3673_v42 }
 0x4db   :  { %5383 = vmatprep.subr.bf16.mxu1 %v5627_v1  ;;  %5395 = vmatprep.subr.bf16.mxu0 %v5627_v1 }
 0x4de   :  { %5384 = vmatpush3.bf16.msra.mxu1 %v3624_v49  ;;  %5396 = vmatpush3.bf16.msra.mxu0 %v3674_v50 }
 0x4df   :  { %5401 = vmatprep.subr.bf16.mxu1 %v5627_v1  ;;  %5413 = vmatprep.subr.bf16.mxu0 %v5627_v1 }
 0x4e1   :  { %5386 = vmatmul.mubr.msk.bf16.vlgmr.msra.gmra.mrb[120].mxu1 %vm464_vm4, %v3625_v51  ;;  %5398 = vmatmul.mubr.msk.bf16.vlgmr.msra.gmra.mrb[128].mxu0 %vm464_vm4, %v3675_v15 }
 0x4e2   :  { %5402 = vmatpush3.bf16.msra.mxu1 %v3721_v54  ;;  %5414 = vmatpush3.bf16.msra.mxu0 %v3771_v55 }
 0x4e3   :  { %5403 = vmatprep.subr.bf16.mxu1 %v5627_v1  ;;  %5415 = vmatprep.subr.bf16.mxu0 %v5627_v1 }
 0x4e4   :  { %5409 = vmatprep.mubr.msk.bf16.mxu1 %vm5626_vm0, %v5627_v1  ;;  %5421 = vmatprep.mubr.msk.bf16.mxu0 %vm5626_vm0, %v5627_v1 }
 0x4e6   :  { %5404 = vmatpush3.bf16.msra.mxu1 %v3722_v56  ;;  %5416 = vmatpush3.bf16.msra.mxu0 %v3772_v57 }
 0x4e7   :  { %5405 = vmatprep.subr.bf16.mxu1 %v5627_v1  ;;  %5417 = vmatprep.subr.bf16.mxu0 %v5627_v1 }
 0x4ea   :  { %5406 = vmatpush3.bf16.msra.mxu1 %v3723_v18  ;;  %5418 = vmatpush3.bf16.msra.mxu0 %v3773_v31 }
 0x4eb   :  { %5407 = vmatprep.subr.bf16.mxu1 %v5627_v1  ;;  %5419 = vmatprep.subr.bf16.mxu0 %v5627_v1 }
 0x4ee   :  { %5408 = vmatpush3.bf16.msra.mxu1 %v3724_v8  ;;  %5420 = vmatpush3.bf16.msra.mxu0 %v3774_v58 }
 0x4ef   :  { %5425 = vmatprep.subr.bf16.mxu1 %v5627_v1  ;;  %5437 = vmatprep.subr.bf16.mxu0 %v5627_v1 }
 0x4f1   :  { %5410 = vmatmul.mubr.msk.bf16.vlgmr.msra.gmra.mrb[124].mxu1 %vm464_vm4, %v3725_v59  ;;  %5422 = vmatmul.mubr.msk.bf16.vlgmr.msra.gmra.mrb[132].mxu0 %vm464_vm4, %v3775_v20 }
 0x4f2   :  { %5426 = vmatpush3.bf16.msra.mxu1 %v3821_v60  ;;  %5438 = vmatpush3.bf16.msra.mxu0 %v3871_v24 }
 0x4f3   :  { %5427 = vmatprep.subr.bf16.mxu1 %v5627_v1  ;;  %5439 = vmatprep.subr.bf16.mxu0 %v5627_v1 }
 0x4f4   :  { %v2460_v52 = vpop.f32.mrb[72].mxu1  ;;  %v2511_v28 = vpop.f32.mrb[80].mxu0  ;;  %5433 = vmatprep.mubr.msk.bf16.mxu1 %vm5626_vm0, %v5627_v1  ;;  %5445 = vmatprep.mubr.msk.bf16.mxu0 %vm5626_vm0, %v5627_v1 }
 0x4f5   :  { %2466 = vst [vmem:[#allocation4 + $0x20] sm:$0x1] %v2460_v52  ;;  %2517 = vst [vmem:[#allocation4 + $0x21] sm:$0x1] %v2511_v28  ;;  %v5099_v61 = vpop.f32.mrb[73].mxu1  ;;  %v5111_v62 = vpop.f32.mrb[81].mxu0 }
 0x4f6   :  { %v2463_v53 = vpop.f32.mrb[74].mxu1  ;;  %v2514_v2 = vpop.f32.mrb[82].mxu0  ;;  %5428 = vmatpush3.bf16.msra.mxu1 %v3822_v26  ;;  %5440 = vmatpush3.bf16.msra.mxu0 %v3872_v40 }
 0x4f7   :  { %v5100_v3 = vpop.f32.mrb[75].mxu1  ;;  %v5112_v23 = vpop.f32.mrb[83].mxu0  ;;  %5429 = vmatprep.subr.bf16.mxu1 %v5627_v1  ;;  %5441 = vmatprep.subr.bf16.mxu0 %v5627_v1 }
 0x4fa   :  { %5430 = vmatpush3.bf16.msra.mxu1 %v3823_v16  ;;  %5442 = vmatpush3.bf16.msra.mxu0 %v3873_v4 }
 0x4fb   :  { %5431 = vmatprep.subr.bf16.mxu1 %v5627_v1  ;;  %5443 = vmatprep.subr.bf16.mxu0 %v5627_v1 }
 0x4fe   :  { %5432 = vmatpush3.bf16.msra.mxu1 %v3824_v5  ;;  %5444 = vmatpush3.bf16.msra.mxu0 %v3874_v6 }
 0x4ff   :  { %5449 = vmatprep.subr.bf16.mxu1 %v5627_v1  ;;  %5461 = vmatprep.subr.bf16.mxu0 %v5627_v1 }
 0x501   :  { %5434 = vmatmul.mubr.msk.bf16.vlgmr.msra.gmra.mrb[128].mxu1 %vm464_vm4, %v3825_v7  ;;  %5446 = vmatmul.mubr.msk.bf16.vlgmr.msra.gmra.mrb[136].mxu0 %vm464_vm4, %v3875_v10 }
 0x502   :  { %5450 = vmatpush3.bf16.msra.mxu1 %v3921_v11  ;;  %5462 = vmatpush3.bf16.msra.mxu0 %v3971_v12 }
 0x503   :  { %5451 = vmatprep.subr.bf16.mxu1 %v5627_v1  ;;  %5463 = vmatprep.subr.bf16.mxu0 %v5627_v1 }
 0x504   :  { %v2562_v17 = vpop.f32.mrb[76].mxu1  ;;  %v2612_v19 = vpop.f32.mrb[84].mxu0  ;;  %5457 = vmatprep.mubr.msk.bf16.mxu1 %vm5626_vm0, %v5627_v1  ;;  %5469 = vmatprep.mubr.msk.bf16.mxu0 %vm5626_vm0, %v5627_v1 }
 0x505   :  { %2568 = vst [vmem:[#allocation4 + $0x22] sm:$0x1] %v2562_v17  ;;  %2618 = vst [vmem:[#allocation4 + $0x23] sm:$0x1] %v2612_v19  ;;  %v5123_v21 = vpop.f32.mrb[77].mxu1  ;;  %v5135_v25 = vpop.f32.mrb[85].mxu0 }
 0x506   :  { %v2565_v27 = vpop.f32.mrb[78].mxu1  ;;  %v2615_v29 = vpop.f32.mrb[86].mxu0  ;;  %5452 = vmatpush3.bf16.msra.mxu1 %v3922_v13  ;;  %5464 = vmatpush3.bf16.msra.mxu0 %v3972_v14 }
 0x507   :  { %v5124_v9 = vpop.f32.mrb[79].mxu1  ;;  %v5136_v30 = vpop.f32.mrb[87].mxu0  ;;  %5453 = vmatprep.subr.bf16.mxu1 %v5627_v1  ;;  %5465 = vmatprep.subr.bf16.mxu0 %v5627_v1 }
 0x50a   :  { %5454 = vmatpush3.bf16.msra.mxu1 %v3923_v32  ;;  %5466 = vmatpush3.bf16.msra.mxu0 %v3973_v33 }
 0x50b   :  { %5455 = vmatprep.subr.bf16.mxu1 %v5627_v1  ;;  %5467 = vmatprep.subr.bf16.mxu0 %v5627_v1 }
 0x50e   :  { %5456 = vmatpush3.bf16.msra.mxu1 %v3924_v34  ;;  %5468 = vmatpush3.bf16.msra.mxu0 %v3974_v35 }
 0x50f   :  { %5517 = vmatprep.subr.bf16.mxu1 %v5625_v0 }
 0x511   :  { %5458 = vmatmul.mubr.msk.bf16.vlgmr.msra.gmra.mrb[132].mxu1 %vm464_vm4, %v3925_v36  ;;  %5470 = vmatmul.mubr.msk.bf16.vlgmr.msra.gmra.mrb[140].mxu0 %vm464_vm4, %v3975_v37 }
 0x512   :  { %5481 = vmatprep.mubr.msk.f32.mxu1 %vm5626_vm0, %v5627_v1 }
 0x514   :  { %v2662_v38 = vpop.f32.mrb[80].mxu1  ;;  %v2712_v39 = vpop.f32.mrb[88].mxu0 }
 0x515   :  { %2668 = vst [vmem:[#allocation4 + $0x24] sm:$0x1] %v2662_v38  ;;  %2718 = vst [vmem:[#allocation4 + $0x25] sm:$0x1] %v2712_v39  ;;  %v5147_v41 = vpop.f32.mrb[81].mxu1  ;;  %v5159_v43 = vpop.f32.mrb[89].mxu0 }
 0x516   :  { %v2665_v48 = vpop.f32.mrb[82].mxu1  ;;  %v2715_v44 = vpop.f32.mrb[90].mxu0 }
 0x517   :  { %v5148_v63 = vpop.f32.mrb[83].mxu1  ;;  %v5160_v45 = vpop.f32.mrb[91].mxu0 }
 0x524   :  { %v2762_v46 = vpop.f32.mrb[84].mxu1  ;;  %v2812_v47 = vpop.f32.mrb[92].mxu0 }
 0x525   :  { %2768 = vst [vmem:[#allocation4 + $0x26] sm:$0x1] %v2762_v46  ;;  %2818 = vst [vmem:[#allocation4 + $0x27] sm:$0x1] %v2812_v47  ;;  %v5171_v42 = vpop.f32.mrb[85].mxu1  ;;  %v5183_v49 = vpop.f32.mrb[93].mxu0 }
 0x526   :  { %v2765_v50 = vpop.f32.mrb[86].mxu1  ;;  %v2815_v51 = vpop.f32.mrb[94].mxu0 }
 0x527   :  { %v5172_v15 = vpop.f32.mrb[87].mxu1  ;;  %v5184_v1 = vpop.f32.mrb[95].mxu0 }
 0x534   :  { %v2862_v54 = vpop.f32.mrb[88].mxu1  ;;  %v2912_v55 = vpop.f32.mrb[96].mxu0 }
 0x535   :  { %2868 = vst [vmem:[#allocation4 + $0x28] sm:$0x1] %v2862_v54  ;;  %2918 = vst [vmem:[#allocation4 + $0x29] sm:$0x1] %v2912_v55  ;;  %v5195_v56 = vpop.f32.mrb[89].mxu1  ;;  %v5207_v57 = vpop.f32.mrb[97].mxu0 }
 0x536   :  { %v2865_v18 = vpop.f32.mrb[90].mxu1  ;;  %v2915_v31 = vpop.f32.mrb[98].mxu0 }
 0x537   :  { %v5196_v8 = vpop.f32.mrb[91].mxu1  ;;  %v5208_v58 = vpop.f32.mrb[99].mxu0 }
 0x544   :  { %v2962_v59 = vpop.f32.mrb[92].mxu1  ;;  %v3012_v20 = vpop.f32.mrb[100].mxu0 }
 0x545   :  { %2968 = vst [vmem:[#allocation4 + $0x2a] sm:$0x1] %v2962_v59  ;;  %3018 = vst [vmem:[#allocation4 + $0x2b] sm:$0x1] %v3012_v20  ;;  %v5219_v60 = vpop.f32.mrb[93].mxu1  ;;  %v5231_v24 = vpop.f32.mrb[101].mxu0 }
 0x546   :  { %v2965_v26 = vpop.f32.mrb[94].mxu1  ;;  %v3015_v40 = vpop.f32.mrb[102].mxu0 }
 0x547   :  { %v5220_v52 = vpop.f32.mrb[95].mxu1  ;;  %v5232_v28 = vpop.f32.mrb[103].mxu0 }
 0x554   :  { %v3062_v61 = vpop.f32.mrb[96].mxu1  ;;  %v3112_v62 = vpop.f32.mrb[104].mxu0 }
 0x555   :  { %3068 = vst [vmem:[#allocation4 + $0x2c] sm:$0x1] %v3062_v61  ;;  %3118 = vst [vmem:[#allocation4 + $0x2d] sm:$0x1] %v3112_v62  ;;  %v5243_v53 = vpop.f32.mrb[97].mxu1  ;;  %v5255_v2 = vpop.f32.mrb[105].mxu0 }
 0x556   :  { %v3065_v3 = vpop.f32.mrb[98].mxu1  ;;  %v3115_v23 = vpop.f32.mrb[106].mxu0 }
 0x557   :  { %v5244_v16 = vpop.f32.mrb[99].mxu1  ;;  %v5256_v4 = vpop.f32.mrb[107].mxu0 }
 0x564   :  { %v3162_v5 = vpop.f32.mrb[100].mxu1  ;;  %v3212_v6 = vpop.f32.mrb[108].mxu0 }
 0x565   :  { %3168 = vst [vmem:[#allocation4 + $0x2e] sm:$0x1] %v3162_v5  ;;  %3218 = vst [vmem:[#allocation4 + $0x2f] sm:$0x1] %v3212_v6  ;;  %v5267_v7 = vpop.f32.mrb[101].mxu1  ;;  %v5279_v10 = vpop.f32.mrb[109].mxu0 }
 0x566   :  { %v3165_v11 = vpop.f32.mrb[102].mxu1  ;;  %v3215_v12 = vpop.f32.mrb[110].mxu0  ;;  %v4020_v7 = vld [vmem:[#allocation4] sm:$0xff]  ;;  %v4021_v10 = vld [vmem:[#allocation4 + $0x8] sm:$0xff] }
 0x567   :  { %v5268_v13 = vpop.f32.mrb[103].mxu1  ;;  %v5280_v14 = vpop.f32.mrb[111].mxu0  ;;  %v4028_v11 = vadd.f32 %v4021_v10, %v4020_v7  ;;  %v4022_v12 = vld [vmem:[#allocation4 + $0x10] sm:$0xff] }
 0x568   :  { %v4023_v14 = vld [vmem:[#allocation4 + $0x18] sm:$0xff] }
 0x569   :  { %v4029_v13 = vadd.f32 %v4028_v11, %v4022_v12 }
 0x574   :  { %v3261_v17 = vpop.f32.mrb[104].mxu1  ;;  %v3312_v19 = vpop.f32.mrb[112].mxu0 }
 0x575   :  { %3267 = vst [vmem:[#allocation4 + $0x30] sm:$0x1] %v3261_v17  ;;  %3318 = vst [vmem:[#allocation4 + $0x31] sm:$0x1] %v3312_v19  ;;  %v5291_v21 = vpop.f32.mrb[105].mxu1  ;;  %v5303_v25 = vpop.f32.mrb[113].mxu0  ;;  %v4030_v17 = vadd.f32 %v4029_v13, %v4023_v14 }
 0x576   :  { %v3264_v27 = vpop.f32.mrb[106].mxu1  ;;  %v3315_v29 = vpop.f32.mrb[114].mxu0  ;;  %v4024_v25 = vld [vmem:[#allocation4 + $0x20] sm:$0xff] }
 0x577   :  { %v5292_v9 = vpop.f32.mrb[107].mxu1  ;;  %v5304_v30 = vpop.f32.mrb[115].mxu0 }
 0x584   :  { %v3363_v32 = vpop.f32.mrb[108].mxu1  ;;  %v3413_v33 = vpop.f32.mrb[116].mxu0 }
 0x585   :  { %3369 = vst [vmem:[#allocation4 + $0x32] sm:$0x1] %v3363_v32  ;;  %3419 = vst [vmem:[#allocation4 + $0x33] sm:$0x1] %v3413_v33  ;;  %v5315_v34 = vpop.f32.mrb[109].mxu1  ;;  %v5327_v35 = vpop.f32.mrb[117].mxu0 }
 0x586   :  { %v3366_v36 = vpop.f32.mrb[110].mxu1  ;;  %v3416_v37 = vpop.f32.mrb[118].mxu0  ;;  %v4025_v32 = vld [vmem:[#allocation4 + $0x28] sm:$0xff]  ;;  %v4031_v35 = vadd.f32 %v4030_v17, %v4024_v25 }
 0x587   :  { %v5316_v38 = vpop.f32.mrb[111].mxu1  ;;  %v5328_v39 = vpop.f32.mrb[119].mxu0 }
 0x588   :  { %v4032_v37 = vadd.f32 %v4031_v35, %v4025_v32 }
 0x594   :  { %v3463_v41 = vpop.f32.mrb[112].mxu1  ;;  %v3513_v43 = vpop.f32.mrb[120].mxu0 }
 0x595   :  { %3469 = vst [vmem:[#allocation4 + $0x34] sm:$0x1] %v3463_v41  ;;  %3519 = vst [vmem:[#allocation4 + $0x35] sm:$0x1] %v3513_v43  ;;  %v5339_v48 = vpop.f32.mrb[113].mxu1  ;;  %v5351_v44 = vpop.f32.mrb[121].mxu0 }
 0x596   :  { %v3466_v63 = vpop.f32.mrb[114].mxu1  ;;  %v3516_v45 = vpop.f32.mrb[122].mxu0 }
 0x597   :  { %v5340_v46 = vpop.f32.mrb[115].mxu1  ;;  %v5352_v47 = vpop.f32.mrb[123].mxu0 }
 0x5a4   :  { %v3563_v42 = vpop.f32.mrb[116].mxu1  ;;  %v3613_v49 = vpop.f32.mrb[124].mxu0 }
 0x5a5   :  { %3569 = vst [vmem:[#allocation4 + $0x36] sm:$0x1] %v3563_v42  ;;  %3619 = vst [vmem:[#allocation4 + $0x37] sm:$0x1] %v3613_v49  ;;  %v5363_v50 = vpop.f32.mrb[117].mxu1  ;;  %v5375_v51 = vpop.f32.mrb[125].mxu0 }
 0x5a6   :  { %v3566_v15 = vpop.f32.mrb[118].mxu1  ;;  %v3616_v1 = vpop.f32.mrb[126].mxu0  ;;  %v4267_v49 = vld [vmem:[%s6450_s4] ss:$0 sm:$0xff] }
 0x5a7   :  { %v5364_v54 = vpop.f32.mrb[119].mxu1  ;;  %v5376_v55 = vpop.f32.mrb[127].mxu0 }
 0x5ac   :  { %v4026_v36 = vld [vmem:[#allocation4 + $0x30] sm:$0xff] }
 0x5ad   :  { %v4033_v38 = vadd.f32 %v4032_v37, %v4026_v36 }
 0x5b4   :  { %v3663_v56 = vpop.f32.mrb[120].mxu1  ;;  %v3713_v57 = vpop.f32.mrb[128].mxu0 }
 0x5b5   :  { %3669 = vst [vmem:[#allocation4 + $0x38] sm:$0x1] %v3663_v56  ;;  %3719 = vst [vmem:[#allocation4 + $0x39] sm:$0x1] %v3713_v57  ;;  %v5387_v18 = vpop.f32.mrb[121].mxu1  ;;  %v5399_v31 = vpop.f32.mrb[129].mxu0 }
 0x5b6   :  { %v3666_v8 = vpop.f32.mrb[122].mxu1  ;;  %v3716_v58 = vpop.f32.mrb[130].mxu0  ;;  %v4075_v31 = vld [vmem:[#allocation5 + $0x110] sm:$0xff] }
 0x5b7   :  { %v5388_v59 = vpop.f32.mrb[123].mxu1  ;;  %v5400_v20 = vpop.f32.mrb[131].mxu0  ;;  %v4076_v8 = vld [vmem:[#allocation5 + $0x118] sm:$0xff]  ;;  %v4077_v58 = vld [vmem:[#allocation5 + $0x120] sm:$0xff] }
 0x5b8   :  { %v5518_v59 = vpack.c.bf16 %v4076_v8, %v4075_v31  ;;  %v4078_v20 = vld [vmem:[#allocation5 + $0x128] sm:$0xff] }
 0x5ba   :  { %5519 = vmatpush3.bf16.msra.mxu1 %v5518_v59 }
 0x5bb   :  { %5520 = vmatprep.subr.bf16.mxu1 %v5625_v0 }
 0x5c4   :  { %v3763_v60 = vpop.f32.mrb[124].mxu1  ;;  %v3813_v24 = vpop.f32.mrb[132].mxu0 }
 0x5c5   :  { %3769 = vst [vmem:[#allocation4 + $0x3a] sm:$0x1] %v3763_v60  ;;  %3819 = vst [vmem:[#allocation4 + $0x3b] sm:$0x1] %v3813_v24  ;;  %v5411_v26 = vpop.f32.mrb[125].mxu1  ;;  %v5423_v40 = vpop.f32.mrb[133].mxu0  ;;  %v5521_v60 = vpack.c.bf16 %v4078_v20, %v4077_v58 }
 0x5c6   :  { %v3766_v52 = vpop.f32.mrb[126].mxu1  ;;  %v3816_v28 = vpop.f32.mrb[134].mxu0 }
 0x5c7   :  { %v5412_v61 = vpop.f32.mrb[127].mxu1  ;;  %v5424_v62 = vpop.f32.mrb[135].mxu0  ;;  %5522 = vmatpush3.bf16.msra.mxu1 %v5521_v60  ;;  %v4079_v28 = vld [vmem:[#allocation5 + $0x130] sm:$0x1] }
 0x5d4   :  { %v3863_v53 = vpop.f32.mrb[128].mxu1  ;;  %v3913_v2 = vpop.f32.mrb[136].mxu0 }
 0x5d5   :  { %3869 = vst [vmem:[#allocation4 + $0x3c] sm:$0x1] %v3863_v53  ;;  %3919 = vst [vmem:[#allocation4 + $0x3d] sm:$0x1] %v3913_v2  ;;  %v5435_v3 = vpop.f32.mrb[129].mxu1  ;;  %v5447_v23 = vpop.f32.mrb[137].mxu0 }
 0x5d6   :  { %v3866_v16 = vpop.f32.mrb[130].mxu1  ;;  %v3916_v4 = vpop.f32.mrb[138].mxu0 }
 0x5d7   :  { %v5436_v5 = vpop.f32.mrb[131].mxu1  ;;  %v5448_v6 = vpop.f32.mrb[139].mxu0 }
 0x5e4   :  { %v3963_v19 = vpop.f32.mrb[132].mxu1  ;;  %v4013_v21 = vpop.f32.mrb[140].mxu0 }
 0x5e5   :  { %3969 = vst [vmem:[#allocation4 + $0x3e] sm:$0x1] %v3963_v19  ;;  %4019 = vst [vmem:[#allocation4 + $0x3f] sm:$0x1] %v4013_v21  ;;  %v5459_v27 = vpop.f32.mrb[133].mxu1  ;;  %v5471_v29 = vpop.f32.mrb[141].mxu0 }
 0x5e6   :  { %v3966_v9 = vpop.f32.mrb[134].mxu1  ;;  %v4016_v30 = vpop.f32.mrb[142].mxu0 }
 0x5e7   :  { %v5460_v33 = vpop.f32.mrb[135].mxu1  ;;  %v5472_v34 = vpop.f32.mrb[143].mxu0 }
 0x5ec   :  { %v4027_v39 = vld [vmem:[#allocation4 + $0x38] sm:$0xff] }
 0x5ed   :  { %v4034_v41 = vadd.f32 %v4033_v38, %v4027_v39 }
 0x5ef   :  { %v4035_v43 = vrot.slane %v4034_v41, 4 }
 0x5f1   :  { %v4036_v48 = vadd.f32 %v4035_v43, %v4034_v41 }
 0x5f3   :  { %v4037_v44 = vrot.slane %v4036_v48, 2 }
 0x5f5   :  { %v4038_v63 = vadd.f32 %v4037_v44, %v4036_v48 }
 0x5f7   :  { %v4039_v45 = vrot.slane %v4038_v63, 1 }
 0x5f9   :  { %v4040_v46 = vadd.f32 %v4039_v45, %v4038_v63 }
 0x5fb   :  { %v4041_v47 = vadd.f32 %v4040_v46, %v5847_v22 }
 0x5fd   :  { %5539 = vtanh.f32 %v4041_v47  ;;  %v4266_v50 = vmul.f32 -1.442695, %v4041_v47 }
 0x5ff   :  { %5541 = vpow2.f32 %v4266_v50 }
 0x607   :  { %v5540_v42 = vpop.eup %5539 }
 0x608   :  { %4060 = vrot.lane.b32.xlu0 %v5540_v42, %s5632_s6 }
 0x609   :  { %v5542_v51 = vpop.eup %5541 }
 0x60a   :  { %v4045_v15 = vadd.f32 1.0, %v5542_v51 }
 0x60c   :  { %4055 = vrot.lane.b32.xlu0 %v4267_v49, %s5633_s14  ;;  %5543 = vrcp.f32 %v4045_v15 }
 0x616   :  { %v5544_v1 = vpop.eup %5543 }
 0x67a   :  { %v4061_v54 = vpop.permute.xlu0 %4060 }
 0x67b   :  { %v4063_v55 = vmul.f32 %v5544_v1, %v4061_v54 }
 0x67d   :  { %4065 = vrot.lane.b32.xlu1 %v4063_v55, %s5633_s14 }
 0x67e   :  { %v4056_v22 = vpop.permute.xlu0 %4055 }
 0x67f   :  { %v4058_v56 = vmul.f32 %v5544_v1, %v4056_v22 }
 0x6ef   :  { %v4066_v57 = vpop.permute.xlu1 %4065 }
 0x6f0   :  { %v4068_v18 = vadd.f32 %v4066_v57, %v4058_v56 }
 0x6f2   :  { %5545 = vtanh.f32 %v4068_v18 }
 0x6fc   :  { %v5546_v24 = vpop.eup %5545 }
 0x6fd   :  { %4071 = vrot.lane.b32.xlu1 %v5546_v24, %s5632_s6 }
 0x76f   :  { %v4072_v26 = vpop.permute.xlu1 %4071 }
 0x770   :  { %v4074_v40 = vmul.f32 %v5544_v1, %v4072_v26 }
 0x772   :  { %4081 = vrot.lane.b32.xlu0 %v4074_v40, %s5633_s14 }
 0x7e4   :  { %v4082_v52 = vpop.permute.xlu0 %4081 }
 0x7e5   :  { %5482 = vmatmul.mubr.msk.f32.vlgmr.msra.gmra.mrb[6].mxu1 %vm124_vm1, %v4082_v52  ;;  %v4160_v2 = vsel %vm124_vm1, %v4082_v52, %v4068_v18 }
 0x8b8   :  { %v4151_v61 = vpop.f32.mrb[6].mxu1 }
 0x8b9   :  { %v4152_v62 = vadd.f32 %v4151_v61, %v4079_v28  ;;  %v5483_v53 = vpop.f32.mrb[7].mxu1 }
 0x8bb   :  { %4157 = vrot.lane.b32.xlu1 %v4152_v62, %s5632_s6 }
 0x92d   :  { %v4158_v0 = vpop.permute.xlu1 %4157 }
 0x92e   :  { %v4161_v3 = vsel %vm464_vm4, %v4160_v2, %v4158_v0 }
 0x92f   :  { %v4163_v23 = vsel %vm4162_vm7, %v4161_v3, 0.0 }
 0x930   :  { %4164 = vst [vmem:[%s6453_s7 + $0x40] sm:$0xff] %v4163_v23 }
 0x931   :  { %4169 = vsyncpa [#allocation6], 1 }
 0x932   :  { %4170 = vsyncmov [#allocation3] }
 0x935   :  { %s4171_s16 = vpop.sfrf %4170 }
 0x936   :  { %p4269_p9 = scmp.ne.s32.totalorder %s4171_s16, 0 }
 0x938   :  { %4175 = shalt.err (%p4269_p9)  }
 0x939   :  { %4177 = vsyncmov [#allocation3 + $0x1] }
 0x93c   :  { %s4178_s5 = vpop.sfrf %4177 }
 0x93d   :  { %p4270_p10 = scmp.ne.s32.totalorder %s4178_s5, 0 }
 0x93f   :  { %4182 = shalt.err (%p4270_p10)  }

</bundles_post_ra>
